<compile_context>
chip_gen: v7x
topology: tpu7x:2x2x1
jax: 0.10.0
libtpu: 0.0.40
codegen_flags: <defaults>
</compile_context>

<pallas_src>
import numpy as np
import jax
import jax.numpy as jnp
from jax.experimental import pallas as pl
from jax.experimental.pallas import tpu as pltpu

_LANES = 128


# ----------------------------------------------------------------------------
# Pallas kernel: whole decoder rollout (LSTM steps + attention pooling + MLP
# state refinement) stays resident in VMEM; single program, fully unrolled.
# ----------------------------------------------------------------------------
def _decoder_kernel(in_ref, bias_ref, w_ref, pred_ref):
    f32, bf16 = jnp.float32, jnp.bfloat16
    L = _LANES
    H = L // 4                                  # 4 * h_dim == 128 (asserted in wrapper)
    seq_len, Bp = pred_ref.shape[0], pred_ref.shape[1]

    def mm(a, b):                               # bf16 MXU matmul, f32 accumulate
        return jnp.dot(a, b, preferred_element_type=f32)

    # ---- one-time loads, hoisted out of the rollout loop ----
    h = in_ref[0 * Bp:1 * Bp, :]                # (Bp, 128) refined hidden, lanes H: zero
    c = in_ref[1 * Bp:2 * Bp, 0:H]              # (Bp, H)   LSTM cell state
    lpr = in_ref[2 * Bp:3 * Bp, 0:16]           # (Bp, 16)  last_pos_rel, lanes 2: zero
    mask = in_ref[3 * Bp:4 * Bp, 0:Bp]          # (Bp, Bp)  additive group mask (0 / -1e30)

    bias = bias_ref[...]
    b_gx0, b_xf = bias[0:1, :], bias[1:2, :]
    s_vec, p_vec, q_vec = bias[2:3, :], bias[3:4, :], bias[4:5, :]
    b_m1, b_m2, b_hp = bias[5:6, :], bias[6:7, :], bias[7:8, :]

    w_hh = w_ref[0:L, :]                        # (128,128) LSTM recurrent, rows H: zero
    w_xf = w_ref[L:L + H, :]                    # (H, 128)  hidden2pos∘spatial_emb∘w_ih
    w_hp = w_ref[L + H:L + 2 * H, :]            # (H, 128)  hidden2pos, lanes 2: zero
    w_m1h = w_ref[L + 2 * H:L + 3 * H, :]       # (H, 128)  mlp L1 (h_lstm half)
    w_m1p = w_ref[L + 3 * H:L + 4 * H, :]       # (H, 128)  mlp L1 (pool half)
    w_m2 = w_ref[L + 4 * H:2 * L + 4 * H, :]    # (128,128) mlp L2 (zero padded)
    w_spih = w_ref[2 * L + 4 * H:2 * L + 4 * H + 16, :]  # (16,128) spatial_emb∘w_ih

    # Step-0 gate-input contribution (spatial_embedding + LSTM bias folded).
    gx = mm(lpr.astype(bf16), w_spih) + b_gx0   # (Bp, 128)

    for t in range(seq_len):                    # static full unroll (seq_len is small)
        # ---- LSTM gates: one fused 128-lane matmul on the recurrence path ----
        gates = gx + mm(h.astype(bf16), w_hh)   # (Bp, 128)
        # sigmoid(x) = 0.5*(tanh(0.5x)+1) and tanh(x) from a single vreg tanh.
        act = jnp.tanh(gates * s_vec) * p_vec + q_vec
        i_g, f_g = act[:, 0:H], act[:, H:2 * H]
        g_g, o_g = act[:, 2 * H:3 * H], act[:, 3 * H:4 * H]
        c = f_g * c + i_g * g_g
        h_lstm = o_g * jnp.tanh(c)              # (Bp, H)
        hb = h_lstm.astype(bf16)

        # ---- hidden2pos output: dead-end branch, off the critical path ----
        pred_ref[t] = mm(hb, w_hp) + b_hp       # lanes 0:2 hold rel_pos

        # ---- next-step gate input (hidden2pos + spatial_embedding folded) ----
        gx = mm(hb, w_xf) + b_xf

        # ---- attention pooling: block-diagonal additive-mask softmax ----
        score = jax.lax.dot_general(hb, hb, (((1,), (1,)), ((), ())),
                                    preferred_element_type=f32) + mask
        score = score - jnp.max(score, axis=1, keepdims=True)
        e = jnp.exp(score)
        attn = e * pl.reciprocal(jnp.sum(e, axis=1, keepdims=True), approx=True)
        pool = mm(attn.astype(bf16), hb)        # (Bp, H)

        # ---- mlp([h_lstm, pool_h]) without the lane concat ----
        m1 = jnp.maximum(mm(hb, w_m1h) + mm(pool.astype(bf16), w_m1p) + b_m1, 0.0)
        h = jnp.maximum(mm(m1.astype(bf16), w_m2) + b_m2, 0.0)  # (Bp,128), lanes H: zero


# ----------------------------------------------------------------------------
# Wrapper: host-side algebraic folds + slab packing (done once) + pallas_call.
# ----------------------------------------------------------------------------
def decoder_forward(params, last_pos, last_pos_rel, state_tuple, seq_start_end,
                    seq_len):
    # last_pos only feeds curr_pos, which never reaches the returned prediction
    # (AttentionHiddenNet ignores end_pos) -> dropped from the kernel.
    del last_pos
    hh, ch = state_tuple                        # (num_layers=1, B, H)
    B, H = hh.shape[1], hh.shape[2]
    L = _LANES
    assert 4 * H == L, "kernel assumes 4 * h_dim == 128 lanes"
    M = params['w_m2'].shape[0]
    assert M <= L and B <= L
    Bp = max(8, ((B + 7) // 8) * 8)             # pad batch to a sublane multiple

    def pad(a, rows, cols=L):
        out = jnp.zeros((rows, cols), jnp.float32)
        return out.at[:a.shape[0], :a.shape[1]].set(a.astype(jnp.float32))

    # ---- host-side algebraic folds (pure linear algebra, done once) ----
    w_sp_ih = params['w_sp'] @ params['w_ih']                    # (2, 4H)
    b_gx0 = params['b_sp'] @ params['w_ih'] + params['b_lstm']   # (1, 4H)
    w_xf = params['w_hp'] @ w_sp_ih                              # (H, 4H)
    b_xf = params['b_hp'] @ w_sp_ih + b_gx0                      # (1, 4H)

    # Per-lane scale/affine so sigmoid & tanh come from one full-vreg tanh
    # (gate order i, f, g, o).
    s_vec = np.full((1, L), 0.5, np.float32); s_vec[0, 2 * H:3 * H] = 1.0
    p_vec = np.full((1, L), 0.5, np.float32); p_vec[0, 2 * H:3 * H] = 1.0
    q_vec = np.full((1, L), 0.5, np.float32); q_vec[0, 2 * H:3 * H] = 0.0

    bias_slab = jnp.concatenate([
        pad(b_gx0, 1), pad(b_xf, 1),
        jnp.asarray(s_vec), jnp.asarray(p_vec), jnp.asarray(q_vec),
        pad(params['b_m1'], 1), pad(params['b_m2'], 1), pad(params['b_hp'], 1),
    ], axis=0)                                                   # (8, 128) f32

    w_slab = jnp.concatenate([
        pad(params['w_hh'], L),        # rows   0:128  LSTM recurrent weights
        pad(w_xf, H),                  # rows 128:160  folded input path (t >= 1)
        pad(params['w_hp'], H),        # rows 160:192  hidden2pos
        pad(params['w_m1'][:H], H),    # rows 192:224  mlp L1 (h_lstm half)
        pad(params['w_m1'][H:], H),    # rows 224:256  mlp L1 (pool half)
        pad(params['w_m2'], L),        # rows 256:384  mlp L2
        pad(w_sp_ih, 16),              # rows 384:400  folded input path (t == 0)
    ], axis=0).astype(jnp.bfloat16)    # single bf16 weight slab -> one DMA

    # ---- runtime-input slab: h0 | c0 | last_pos_rel | additive group mask ----
    # NOTE: seq_start_end is assumed to partition [0, B) (as in the PyTorch use).
    mask = np.full((Bp, Bp), -1e30, np.float32)
    for (s, e) in seq_start_end:
        mask[int(s):int(e), int(s):int(e)] = 0.0
    in_slab = jnp.concatenate([
        pad(hh.reshape(B, H), Bp),
        pad(ch.reshape(B, H), Bp),
        pad(last_pos_rel, Bp),
        pad(jnp.asarray(mask), Bp),
    ], axis=0)                                                   # (4*Bp, 128) f32

    vmem = lambda: pl.BlockSpec(memory_space=pltpu.MemorySpace.VMEM)
    pred = pl.pallas_call(
        _decoder_kernel,
        out_shape=jax.ShapeDtypeStruct((seq_len, Bp, L), jnp.float32),
        in_specs=[vmem(), vmem(), vmem()],
        out_specs=vmem(),
        # Single rollout -> single program.  With many independent scenes, add a
        # leading "parallel" grid axis to use the second TensorCore on v7x.
    )(in_slab, bias_slab, w_slab)

    # Layout plumbing only: kernel writes a lane-dense slab, slice to (seq, B, 2).
    return pred[:, :B, :2]


# ----------------------------------------------------------------------------
# Pure-JAX reference (mirrors the PyTorch per-group loop semantics, f32,
# original unfolded weights).
# ----------------------------------------------------------------------------
def reference_forward(params, last_pos, last_pos_rel, state_tuple,
                      seq_start_end, seq_len):
    def _sigmoid(x):
        return 1.0 / (1.0 + jnp.exp(-x))

    hh, ch = state_tuple
    B, H = hh.shape[1], hh.shape[2]
    h, c = hh.reshape(B, H), ch.reshape(B, H)
    x = last_pos_rel @ params['w_sp'] + params['b_sp']
    preds = []
    for _ in range(seq_len):
        gates = x @ params['w_ih'] + h @ params['w_hh'] + params['b_lstm']
        i_g = _sigmoid(gates[:, :H])
        f_g = _sigmoid(gates[:, H:2 * H])
        g_g = jnp.tanh(gates[:, 2 * H:3 * H])
        o_g = _sigmoid(gates[:, 3 * H:])
        c = f_g * c + i_g * g_g
        h_lstm = o_g * jnp.tanh(c)
        rel_pos = h_lstm @ params['w_hp'] + params['b_hp']
        curr_pos = rel_pos + last_pos
        pool_rows = []
        for (s, e) in seq_start_end:
            chid = h_lstm[s:e]
            score = chid @ chid.T
            score = score - jnp.max(score, axis=1, keepdims=True)
            p = jnp.exp(score)
            attn = p / jnp.sum(p, axis=1, keepdims=True)
            pool_rows.append(attn @ chid)
        pool_h = jnp.concatenate(pool_rows, axis=0)
        cat = jnp.concatenate([h_lstm, pool_h], axis=1)
        m1 = jnp.maximum(cat @ params['w_m1'] + params['b_m1'], 0.0)
        h = jnp.maximum(m1 @ params['w_m2'] + params['b_m2'], 0.0)
        x = rel_pos @ params['w_sp'] + params['b_sp']
        preds.append(rel_pos)
        last_pos = curr_pos
    return jnp.stack(preds, axis=0)


# ----------------------------------------------------------------------------
# Deterministic parameter init (synthetic, not a checkpoint)
# ----------------------------------------------------------------------------
def init_params(key, embedding_dim, h_dim, mlp_dim):
    E, H, M = embedding_dim, h_dim, mlp_dim
    ks = jax.random.split(key, 10)
    s = 0.1
    return {
        # spatial_embedding: Linear(2, E)
        'w_sp': s * jax.random.normal(ks[0], (2, E), jnp.float32),
        'b_sp': s * jax.random.normal(ks[1], (1, E), jnp.float32),
        # LSTM(E, H), gate order i,f,g,o; b_lstm = b_ih + b_hh
        'w_ih': s * jax.random.normal(ks[2], (E, 4 * H), jnp.float32),
        'w_hh': s * jax.random.normal(ks[3], (H, 4 * H), jnp.float32),
        'b_lstm': s * jax.random.normal(ks[4], (1, 4 * H), jnp.float32),
        # hidden2pos: Linear(H, 2)
        'w_hp': s * jax.random.normal(ks[5], (H, 2), jnp.float32),
        'b_hp': s * jax.random.normal(ks[6], (1, 2), jnp.float32),
        # mlp: Linear(2H, mlp_dim) + ReLU + Linear(mlp_dim, H) + ReLU
        'w_m1': s * jax.random.normal(ks[7], (2 * H, M), jnp.float32),
        'b_m1': s * jax.random.normal(ks[8], (1, M), jnp.float32),
        'w_m2': s * jax.random.normal(ks[9], (M, H), jnp.float32),
        'b_m2': jnp.zeros((1, H), jnp.float32),
    }


if __name__ == "__main__":
    key = jax.random.PRNGKey(0)
    B, H, E, MLP, SEQ_LEN = 8, 32, 16, 64, 8
    seq_start_end = [(0, 3), (3, 8)]            # two pedestrian groups in the batch

    kp, k1, k2, k3, k4 = jax.random.split(key, 5)
    params = init_params(kp, embedding_dim=E, h_dim=H, mlp_dim=MLP)

    last_pos = jax.random.normal(k1, (B, 2), jnp.float32)
    last_pos_rel = jax.random.normal(k2, (B, 2), jnp.float32)
    hh = jax.random.normal(k3, (1, B, H), jnp.float32)
    ch = jax.random.normal(k4, (1, B, H), jnp.float32)
    state_tuple = (hh, ch)

    out = decoder_forward(params, last_pos, last_pos_rel, state_tuple,
                          seq_start_end, SEQ_LEN)
    out = jax.block_until_ready(out)
    assert out.shape == (SEQ_LEN, B, 2)

    ref = reference_forward(params, last_pos, last_pos_rel, state_tuple,
                            seq_start_end, SEQ_LEN)
    # bf16 MXU operands + host-folded weights + approx softmax reciprocal ->
    # slightly looser tolerance than an all-f32 path (observed error ~1e-3).
    np.testing.assert_allclose(np.asarray(out), np.asarray(ref),
                               rtol=2e-2, atol=2e-2)
    print("KERNEL_OK")
</pallas_src>

<mosaic_0001>
module attributes {stable_mosaic.version = 11 : i64} {
  func.func @_decoder_kernel(%arg0: memref<32x128xf32, #tpu.memory_space<vmem>>, %arg1: memref<8x128xf32, #tpu.memory_space<vmem>>, %arg2: memref<400x128xbf16, #tpu.memory_space<vmem>>, %arg3: memref<8x8x128xf32, #tpu.memory_space<vmem>>) attributes {dimension_semantics = [], scalar_prefetch = 0 : i64, scratch_operands = 0 : i64, tpu.core_type = #tpu.core_type<tc>} {
    %c0 = arith.constant 0 : index
    %c0_0 = arith.constant 0 : index
    %0 = vector.load %arg0[%c0, %c0_0] : memref<32x128xf32, #tpu.memory_space<vmem>>, vector<8x128xf32>
    %c8 = arith.constant 8 : index
    %c0_1 = arith.constant 0 : index
    %1 = vector.load %arg0[%c8, %c0_1] : memref<32x128xf32, #tpu.memory_space<vmem>>, vector<8x32xf32>
    %c16 = arith.constant 16 : index
    %c0_2 = arith.constant 0 : index
    %2 = vector.load %arg0[%c16, %c0_2] : memref<32x128xf32, #tpu.memory_space<vmem>>, vector<8x16xf32>
    %c24 = arith.constant 24 : index
    %c0_3 = arith.constant 0 : index
    %3 = vector.load %arg0[%c24, %c0_3] : memref<32x128xf32, #tpu.memory_space<vmem>>, vector<8x8xf32>
    %c0_4 = arith.constant 0 : index
    %c0_5 = arith.constant 0 : index
    %4 = vector.load %arg1[%c0_4, %c0_5] : memref<8x128xf32, #tpu.memory_space<vmem>>, vector<8x128xf32>
    %5 = vector.extract_strided_slice %4 {offsets = [0, 0], sizes = [1, 128], strides = [1, 1]} : vector<8x128xf32> to vector<1x128xf32>
    %6 = vector.extract_strided_slice %4 {offsets = [1, 0], sizes = [1, 128], strides = [1, 1]} : vector<8x128xf32> to vector<1x128xf32>
    %7 = vector.extract_strided_slice %4 {offsets = [2, 0], sizes = [1, 128], strides = [1, 1]} : vector<8x128xf32> to vector<1x128xf32>
    %8 = vector.extract_strided_slice %4 {offsets = [3, 0], sizes = [1, 128], strides = [1, 1]} : vector<8x128xf32> to vector<1x128xf32>
    %9 = vector.extract_strided_slice %4 {offsets = [4, 0], sizes = [1, 128], strides = [1, 1]} : vector<8x128xf32> to vector<1x128xf32>
    %10 = vector.extract_strided_slice %4 {offsets = [5, 0], sizes = [1, 128], strides = [1, 1]} : vector<8x128xf32> to vector<1x128xf32>
    %11 = vector.extract_strided_slice %4 {offsets = [6, 0], sizes = [1, 128], strides = [1, 1]} : vector<8x128xf32> to vector<1x128xf32>
    %12 = vector.extract_strided_slice %4 {offsets = [7, 0], sizes = [1, 128], strides = [1, 1]} : vector<8x128xf32> to vector<1x128xf32>
    %c0_6 = arith.constant 0 : index
    %c0_7 = arith.constant 0 : index
    %13 = vector.load %arg2[%c0_6, %c0_7] : memref<400x128xbf16, #tpu.memory_space<vmem>>, vector<128x128xbf16>
    %c128 = arith.constant 128 : index
    %c0_8 = arith.constant 0 : index
    %14 = vector.load %arg2[%c128, %c0_8] : memref<400x128xbf16, #tpu.memory_space<vmem>>, vector<32x128xbf16>
    %c160 = arith.constant 160 : index
    %c0_9 = arith.constant 0 : index
    %15 = vector.load %arg2[%c160, %c0_9] : memref<400x128xbf16, #tpu.memory_space<vmem>>, vector<32x128xbf16>
    %c192 = arith.constant 192 : index
    %c0_10 = arith.constant 0 : index
    %16 = vector.load %arg2[%c192, %c0_10] : memref<400x128xbf16, #tpu.memory_space<vmem>>, vector<32x128xbf16>
    %c224 = arith.constant 224 : index
    %c0_11 = arith.constant 0 : index
    %17 = vector.load %arg2[%c224, %c0_11] : memref<400x128xbf16, #tpu.memory_space<vmem>>, vector<32x128xbf16>
    %c256 = arith.constant 256 : index
    %c0_12 = arith.constant 0 : index
    %18 = vector.load %arg2[%c256, %c0_12] : memref<400x128xbf16, #tpu.memory_space<vmem>>, vector<128x128xbf16>
    %c384 = arith.constant 384 : index
    %c0_13 = arith.constant 0 : index
    %19 = vector.load %arg2[%c384, %c0_13] : memref<400x128xbf16, #tpu.memory_space<vmem>>, vector<16x128xbf16>
    %20 = arith.truncf %2 : vector<8x16xf32> to vector<8x16xbf16>
    %cst = arith.constant dense<0.000000e+00> : vector<8x128xf32>
    %21 = tpu.matmul %20, %19, %cst {dimension_numbers = #tpu.dot_dimension_numbers<[1], [0], [0], [1], [0, 0, 1, 1], [], []>} : vector<8x16xbf16>, vector<16x128xbf16>, vector<8x128xf32> -> vector<8x128xf32>
    %22 = vector.broadcast %5 : vector<1x128xf32> to vector<8x128xf32>
    %23 = arith.addf %21, %22 : vector<8x128xf32>
    %24 = arith.truncf %0 : vector<8x128xf32> to vector<8x128xbf16>
    %cst_14 = arith.constant dense<0.000000e+00> : vector<8x128xf32>
    %25 = tpu.matmul %24, %13, %cst_14 {dimension_numbers = #tpu.dot_dimension_numbers<[1], [0], [0], [1], [0, 0, 1, 1], [], []>} : vector<8x128xbf16>, vector<128x128xbf16>, vector<8x128xf32> -> vector<8x128xf32>
    %26 = arith.addf %23, %25 : vector<8x128xf32>
    %27 = vector.broadcast %7 : vector<1x128xf32> to vector<8x128xf32>
    %28 = arith.mulf %26, %27 : vector<8x128xf32>
    %29 = math.tanh %28 : vector<8x128xf32>
    %30 = vector.broadcast %8 : vector<1x128xf32> to vector<8x128xf32>
    %31 = arith.mulf %29, %30 : vector<8x128xf32>
    %32 = vector.broadcast %9 : vector<1x128xf32> to vector<8x128xf32>
    %33 = arith.addf %31, %32 : vector<8x128xf32>
    %34 = vector.extract_strided_slice %33 {offsets = [0, 0], sizes = [8, 32], strides = [1, 1]} : vector<8x128xf32> to vector<8x32xf32>
    %35 = vector.extract_strided_slice %33 {offsets = [0, 32], sizes = [8, 32], strides = [1, 1]} : vector<8x128xf32> to vector<8x32xf32>
    %36 = vector.extract_strided_slice %33 {offsets = [0, 64], sizes = [8, 32], strides = [1, 1]} : vector<8x128xf32> to vector<8x32xf32>
    %37 = vector.extract_strided_slice %33 {offsets = [0, 96], sizes = [8, 32], strides = [1, 1]} : vector<8x128xf32> to vector<8x32xf32>
    %38 = arith.mulf %35, %1 : vector<8x32xf32>
    %39 = arith.mulf %34, %36 : vector<8x32xf32>
    %40 = arith.addf %38, %39 : vector<8x32xf32>
    %41 = math.tanh %40 : vector<8x32xf32>
    %42 = arith.mulf %37, %41 : vector<8x32xf32>
    %43 = arith.truncf %42 : vector<8x32xf32> to vector<8x32xbf16>
    %cst_15 = arith.constant dense<0.000000e+00> : vector<8x128xf32>
    %44 = tpu.matmul %43, %15, %cst_15 {dimension_numbers = #tpu.dot_dimension_numbers<[1], [0], [0], [1], [0, 0, 1, 1], [], []>} : vector<8x32xbf16>, vector<32x128xbf16>, vector<8x128xf32> -> vector<8x128xf32>
    %45 = vector.broadcast %12 : vector<1x128xf32> to vector<8x128xf32>
    %46 = arith.addf %44, %45 : vector<8x128xf32>
    %c0_16 = arith.constant 0 : index
    %c0_17 = arith.constant 0 : index
    %c0_18 = arith.constant 0 : index
    %47 = vector.load %arg3[%c0_16, %c0_17, %c0_18] : memref<8x8x128xf32, #tpu.memory_space<vmem>>, vector<1x8x128xf32>
    %48 = vector.shape_cast %47 : vector<1x8x128xf32> to vector<8x128xf32>
    %49 = vector.shape_cast %46 : vector<8x128xf32> to vector<1x8x128xf32>
    tpu.vector_store %arg3[%c0_16, %c0_17, %c0_18], %49 {strides = array<i32>} : memref<8x8x128xf32, #tpu.memory_space<vmem>>, vector<1x8x128xf32>,
    %cst_19 = arith.constant dense<0.000000e+00> : vector<8x128xf32>
    %50 = tpu.matmul %43, %14, %cst_19 {dimension_numbers = #tpu.dot_dimension_numbers<[1], [0], [0], [1], [0, 0, 1, 1], [], []>} : vector<8x32xbf16>, vector<32x128xbf16>, vector<8x128xf32> -> vector<8x128xf32>
    %51 = vector.broadcast %6 : vector<1x128xf32> to vector<8x128xf32>
    %52 = arith.addf %50, %51 : vector<8x128xf32>
    %cst_20 = arith.constant dense<0.000000e+00> : vector<8x8xf32>
    %53 = tpu.matmul %43, %43, %cst_20 {dimension_numbers = #tpu.dot_dimension_numbers<[1], [1], [0], [0], [0, 0, 1, 0], [], []>} : vector<8x32xbf16>, vector<8x32xbf16>, vector<8x8xf32> -> vector<8x8xf32>
    %54 = arith.addf %53, %3 : vector<8x8xf32>
    %cst_21 = arith.constant dense<0xFF800000> : vector<8xf32>
    %55 = vector.multi_reduction <maximumf>, %54, %cst_21 [1] : vector<8x8xf32> to vector<8xf32>
    %56 = vector.shape_cast %55 : vector<8xf32> to vector<8x1xf32>
    %57 = vector.broadcast %56 : vector<8x1xf32> to vector<8x8xf32>
    %58 = arith.subf %54, %57 : vector<8x8xf32>
    %59 = math.exp %58 : vector<8x8xf32>
    %cst_22 = arith.constant dense<0.000000e+00> : vector<8xf32>
    %60 = vector.multi_reduction <add>, %59, %cst_22 [1] : vector<8x8xf32> to vector<8xf32>
    %61 = vector.shape_cast %60 : vector<8xf32> to vector<8x1xf32>
    %62 = tpu.reciprocal %61 {approx = true} : vector<8x1xf32> -> vector<8x1xf32>
    %63 = vector.broadcast %62 : vector<8x1xf32> to vector<8x8xf32>
    %64 = arith.mulf %59, %63 : vector<8x8xf32>
    %65 = arith.truncf %64 : vector<8x8xf32> to vector<8x8xbf16>
    %cst_23 = arith.constant dense<0.000000e+00> : vector<8x32xf32>
    %66 = tpu.matmul %65, %43, %cst_23 {dimension_numbers = #tpu.dot_dimension_numbers<[1], [0], [0], [1], [0, 0, 1, 1], [], []>} : vector<8x8xbf16>, vector<8x32xbf16>, vector<8x32xf32> -> vector<8x32xf32>
    %cst_24 = arith.constant dense<0.000000e+00> : vector<8x128xf32>
    %67 = tpu.matmul %43, %16, %cst_24 {dimension_numbers = #tpu.dot_dimension_numbers<[1], [0], [0], [1], [0, 0, 1, 1], [], []>} : vector<8x32xbf16>, vector<32x128xbf16>, vector<8x128xf32> -> vector<8x128xf32>
    %68 = arith.truncf %66 : vector<8x32xf32> to vector<8x32xbf16>
    %cst_25 = arith.constant dense<0.000000e+00> : vector<8x128xf32>
    %69 = tpu.matmul %68, %17, %cst_25 {dimension_numbers = #tpu.dot_dimension_numbers<[1], [0], [0], [1], [0, 0, 1, 1], [], []>} : vector<8x32xbf16>, vector<32x128xbf16>, vector<8x128xf32> -> vector<8x128xf32>
    %70 = arith.addf %67, %69 : vector<8x128xf32>
    %71 = vector.broadcast %10 : vector<1x128xf32> to vector<8x128xf32>
    %72 = arith.addf %70, %71 : vector<8x128xf32>
    %cst_26 = arith.constant 0.000000e+00 : f32
    %73 = vector.broadcast %cst_26 : f32 to vector<8x128xf32>
    %74 = arith.maximumf %72, %73 : vector<8x128xf32>
    %75 = arith.truncf %74 : vector<8x128xf32> to vector<8x128xbf16>
    %cst_27 = arith.constant dense<0.000000e+00> : vector<8x128xf32>
    %76 = tpu.matmul %75, %18, %cst_27 {dimension_numbers = #tpu.dot_dimension_numbers<[1], [0], [0], [1], [0, 0, 1, 1], [], []>} : vector<8x128xbf16>, vector<128x128xbf16>, vector<8x128xf32> -> vector<8x128xf32>
    %77 = vector.broadcast %11 : vector<1x128xf32> to vector<8x128xf32>
    %78 = arith.addf %76, %77 : vector<8x128xf32>
    %cst_28 = arith.constant 0.000000e+00 : f32
    %79 = vector.broadcast %cst_28 : f32 to vector<8x128xf32>
    %80 = arith.maximumf %78, %79 : vector<8x128xf32>
    %81 = arith.truncf %80 : vector<8x128xf32> to vector<8x128xbf16>
    %cst_29 = arith.constant dense<0.000000e+00> : vector<8x128xf32>
    %82 = tpu.matmul %81, %13, %cst_29 {dimension_numbers = #tpu.dot_dimension_numbers<[1], [0], [0], [1], [0, 0, 1, 1], [], []>} : vector<8x128xbf16>, vector<128x128xbf16>, vector<8x128xf32> -> vector<8x128xf32>
    %83 = arith.addf %52, %82 : vector<8x128xf32>
    %84 = vector.broadcast %7 : vector<1x128xf32> to vector<8x128xf32>
    %85 = arith.mulf %83, %84 : vector<8x128xf32>
    %86 = math.tanh %85 : vector<8x128xf32>
    %87 = vector.broadcast %8 : vector<1x128xf32> to vector<8x128xf32>
    %88 = arith.mulf %86, %87 : vector<8x128xf32>
    %89 = vector.broadcast %9 : vector<1x128xf32> to vector<8x128xf32>
    %90 = arith.addf %88, %89 : vector<8x128xf32>
    %91 = vector.extract_strided_slice %90 {offsets = [0, 0], sizes = [8, 32], strides = [1, 1]} : vector<8x128xf32> to vector<8x32xf32>
    %92 = vector.extract_strided_slice %90 {offsets = [0, 32], sizes = [8, 32], strides = [1, 1]} : vector<8x128xf32> to vector<8x32xf32>
    %93 = vector.extract_strided_slice %90 {offsets = [0, 64], sizes = [8, 32], strides = [1, 1]} : vector<8x128xf32> to vector<8x32xf32>
    %94 = vector.extract_strided_slice %90 {offsets = [0, 96], sizes = [8, 32], strides = [1, 1]} : vector<8x128xf32> to vector<8x32xf32>
    %95 = arith.mulf %92, %40 : vector<8x32xf32>
    %96 = arith.mulf %91, %93 : vector<8x32xf32>
    %97 = arith.addf %95, %96 : vector<8x32xf32>
    %98 = math.tanh %97 : vector<8x32xf32>
    %99 = arith.mulf %94, %98 : vector<8x32xf32>
    %100 = arith.truncf %99 : vector<8x32xf32> to vector<8x32xbf16>
    %cst_30 = arith.constant dense<0.000000e+00> : vector<8x128xf32>
    %101 = tpu.matmul %100, %15, %cst_30 {dimension_numbers = #tpu.dot_dimension_numbers<[1], [0], [0], [1], [0, 0, 1, 1], [], []>} : vector<8x32xbf16>, vector<32x128xbf16>, vector<8x128xf32> -> vector<8x128xf32>
    %102 = vector.broadcast %12 : vector<1x128xf32> to vector<8x128xf32>
    %103 = arith.addf %101, %102 : vector<8x128xf32>
    %c1 = arith.constant 1 : index
    %c0_31 = arith.constant 0 : index
    %c0_32 = arith.constant 0 : index
    %104 = vector.load %arg3[%c1, %c0_31, %c0_32] : memref<8x8x128xf32, #tpu.memory_space<vmem>>, vector<1x8x128xf32>
    %105 = vector.shape_cast %104 : vector<1x8x128xf32> to vector<8x128xf32>
    %106 = vector.shape_cast %103 : vector<8x128xf32> to vector<1x8x128xf32>
    tpu.vector_store %arg3[%c1, %c0_31, %c0_32], %106 {strides = array<i32>} : memref<8x8x128xf32, #tpu.memory_space<vmem>>, vector<1x8x128xf32>,
    %cst_33 = arith.constant dense<0.000000e+00> : vector<8x128xf32>
    %107 = tpu.matmul %100, %14, %cst_33 {dimension_numbers = #tpu.dot_dimension_numbers<[1], [0], [0], [1], [0, 0, 1, 1], [], []>} : vector<8x32xbf16>, vector<32x128xbf16>, vector<8x128xf32> -> vector<8x128xf32>
    %108 = vector.broadcast %6 : vector<1x128xf32> to vector<8x128xf32>
    %109 = arith.addf %107, %108 : vector<8x128xf32>
    %cst_34 = arith.constant dense<0.000000e+00> : vector<8x8xf32>
    %110 = tpu.matmul %100, %100, %cst_34 {dimension_numbers = #tpu.dot_dimension_numbers<[1], [1], [0], [0], [0, 0, 1, 0], [], []>} : vector<8x32xbf16>, vector<8x32xbf16>, vector<8x8xf32> -> vector<8x8xf32>
    %111 = arith.addf %110, %3 : vector<8x8xf32>
    %cst_35 = arith.constant dense<0xFF800000> : vector<8xf32>
    %112 = vector.multi_reduction <maximumf>, %111, %cst_35 [1] : vector<8x8xf32> to vector<8xf32>
    %113 = vector.shape_cast %112 : vector<8xf32> to vector<8x1xf32>
    %114 = vector.broadcast %113 : vector<8x1xf32> to vector<8x8xf32>
    %115 = arith.subf %111, %114 : vector<8x8xf32>
    %116 = math.exp %115 : vector<8x8xf32>
    %cst_36 = arith.constant dense<0.000000e+00> : vector<8xf32>
    %117 = vector.multi_reduction <add>, %116, %cst_36 [1] : vector<8x8xf32> to vector<8xf32>
    %118 = vector.shape_cast %117 : vector<8xf32> to vector<8x1xf32>
    %119 = tpu.reciprocal %118 {approx = true} : vector<8x1xf32> -> vector<8x1xf32>
    %120 = vector.broadcast %119 : vector<8x1xf32> to vector<8x8xf32>
    %121 = arith.mulf %116, %120 : vector<8x8xf32>
    %122 = arith.truncf %121 : vector<8x8xf32> to vector<8x8xbf16>
    %cst_37 = arith.constant dense<0.000000e+00> : vector<8x32xf32>
    %123 = tpu.matmul %122, %100, %cst_37 {dimension_numbers = #tpu.dot_dimension_numbers<[1], [0], [0], [1], [0, 0, 1, 1], [], []>} : vector<8x8xbf16>, vector<8x32xbf16>, vector<8x32xf32> -> vector<8x32xf32>
    %cst_38 = arith.constant dense<0.000000e+00> : vector<8x128xf32>
    %124 = tpu.matmul %100, %16, %cst_38 {dimension_numbers = #tpu.dot_dimension_numbers<[1], [0], [0], [1], [0, 0, 1, 1], [], []>} : vector<8x32xbf16>, vector<32x128xbf16>, vector<8x128xf32> -> vector<8x128xf32>
    %125 = arith.truncf %123 : vector<8x32xf32> to vector<8x32xbf16>
    %cst_39 = arith.constant dense<0.000000e+00> : vector<8x128xf32>
    %126 = tpu.matmul %125, %17, %cst_39 {dimension_numbers = #tpu.dot_dimension_numbers<[1], [0], [0], [1], [0, 0, 1, 1], [], []>} : vector<8x32xbf16>, vector<32x128xbf16>, vector<8x128xf32> -> vector<8x128xf32>
    %127 = arith.addf %124, %126 : vector<8x128xf32>
    %128 = vector.broadcast %10 : vector<1x128xf32> to vector<8x128xf32>
    %129 = arith.addf %127, %128 : vector<8x128xf32>
    %cst_40 = arith.constant 0.000000e+00 : f32
    %130 = vector.broadcast %cst_40 : f32 to vector<8x128xf32>
    %131 = arith.maximumf %129, %130 : vector<8x128xf32>
    %132 = arith.truncf %131 : vector<8x128xf32> to vector<8x128xbf16>
    %cst_41 = arith.constant dense<0.000000e+00> : vector<8x128xf32>
    %133 = tpu.matmul %132, %18, %cst_41 {dimension_numbers = #tpu.dot_dimension_numbers<[1], [0], [0], [1], [0, 0, 1, 1], [], []>} : vector<8x128xbf16>, vector<128x128xbf16>, vector<8x128xf32> -> vector<8x128xf32>
    %134 = vector.broadcast %11 : vector<1x128xf32> to vector<8x128xf32>
    %135 = arith.addf %133, %134 : vector<8x128xf32>
    %cst_42 = arith.constant 0.000000e+00 : f32
    %136 = vector.broadcast %cst_42 : f32 to vector<8x128xf32>
    %137 = arith.maximumf %135, %136 : vector<8x128xf32>
    %138 = arith.truncf %137 : vector<8x128xf32> to vector<8x128xbf16>
    %cst_43 = arith.constant dense<0.000000e+00> : vector<8x128xf32>
    %139 = tpu.matmul %138, %13, %cst_43 {dimension_numbers = #tpu.dot_dimension_numbers<[1], [0], [0], [1], [0, 0, 1, 1], [], []>} : vector<8x128xbf16>, vector<128x128xbf16>, vector<8x128xf32> -> vector<8x128xf32>
    %140 = arith.addf %109, %139 : vector<8x128xf32>
    %141 = vector.broadcast %7 : vector<1x128xf32> to vector<8x128xf32>
    %142 = arith.mulf %140, %141 : vector<8x128xf32>
    %143 = math.tanh %142 : vector<8x128xf32>
    %144 = vector.broadcast %8 : vector<1x128xf32> to vector<8x128xf32>
    %145 = arith.mulf %143, %144 : vector<8x128xf32>
    %146 = vector.broadcast %9 : vector<1x128xf32> to vector<8x128xf32>
    %147 = arith.addf %145, %146 : vector<8x128xf32>
    %148 = vector.extract_strided_slice %147 {offsets = [0, 0], sizes = [8, 32], strides = [1, 1]} : vector<8x128xf32> to vector<8x32xf32>
    %149 = vector.extract_strided_slice %147 {offsets = [0, 32], sizes = [8, 32], strides = [1, 1]} : vector<8x128xf32> to vector<8x32xf32>
    %150 = vector.extract_strided_slice %147 {offsets = [0, 64], sizes = [8, 32], strides = [1, 1]} : vector<8x128xf32> to vector<8x32xf32>
    %151 = vector.extract_strided_slice %147 {offsets = [0, 96], sizes = [8, 32], strides = [1, 1]} : vector<8x128xf32> to vector<8x32xf32>
    %152 = arith.mulf %149, %97 : vector<8x32xf32>
    %153 = arith.mulf %148, %150 : vector<8x32xf32>
    %154 = arith.addf %152, %153 : vector<8x32xf32>
    %155 = math.tanh %154 : vector<8x32xf32>
    %156 = arith.mulf %151, %155 : vector<8x32xf32>
    %157 = arith.truncf %156 : vector<8x32xf32> to vector<8x32xbf16>
    %cst_44 = arith.constant dense<0.000000e+00> : vector<8x128xf32>
    %158 = tpu.matmul %157, %15, %cst_44 {dimension_numbers = #tpu.dot_dimension_numbers<[1], [0], [0], [1], [0, 0, 1, 1], [], []>} : vector<8x32xbf16>, vector<32x128xbf16>, vector<8x128xf32> -> vector<8x128xf32>
    %159 = vector.broadcast %12 : vector<1x128xf32> to vector<8x128xf32>
    %160 = arith.addf %158, %159 : vector<8x128xf32>
    %c2 = arith.constant 2 : index
    %c0_45 = arith.constant 0 : index
    %c0_46 = arith.constant 0 : index
    %161 = vector.load %arg3[%c2, %c0_45, %c0_46] : memref<8x8x128xf32, #tpu.memory_space<vmem>>, vector<1x8x128xf32>
    %162 = vector.shape_cast %161 : vector<1x8x128xf32> to vector<8x128xf32>
    %163 = vector.shape_cast %160 : vector<8x128xf32> to vector<1x8x128xf32>
    tpu.vector_store %arg3[%c2, %c0_45, %c0_46], %163 {strides = array<i32>} : memref<8x8x128xf32, #tpu.memory_space<vmem>>, vector<1x8x128xf32>,
    %cst_47 = arith.constant dense<0.000000e+00> : vector<8x128xf32>
    %164 = tpu.matmul %157, %14, %cst_47 {dimension_numbers = #tpu.dot_dimension_numbers<[1], [0], [0], [1], [0, 0, 1, 1], [], []>} : vector<8x32xbf16>, vector<32x128xbf16>, vector<8x128xf32> -> vector<8x128xf32>
    %165 = vector.broadcast %6 : vector<1x128xf32> to vector<8x128xf32>
    %166 = arith.addf %164, %165 : vector<8x128xf32>
    %cst_48 = arith.constant dense<0.000000e+00> : vector<8x8xf32>
    %167 = tpu.matmul %157, %157, %cst_48 {dimension_numbers = #tpu.dot_dimension_numbers<[1], [1], [0], [0], [0, 0, 1, 0], [], []>} : vector<8x32xbf16>, vector<8x32xbf16>, vector<8x8xf32> -> vector<8x8xf32>
    %168 = arith.addf %167, %3 : vector<8x8xf32>
    %cst_49 = arith.constant dense<0xFF800000> : vector<8xf32>
    %169 = vector.multi_reduction <maximumf>, %168, %cst_49 [1] : vector<8x8xf32> to vector<8xf32>
    %170 = vector.shape_cast %169 : vector<8xf32> to vector<8x1xf32>
    %171 = vector.broadcast %170 : vector<8x1xf32> to vector<8x8xf32>
    %172 = arith.subf %168, %171 : vector<8x8xf32>
    %173 = math.exp %172 : vector<8x8xf32>
    %cst_50 = arith.constant dense<0.000000e+00> : vector<8xf32>
    %174 = vector.multi_reduction <add>, %173, %cst_50 [1] : vector<8x8xf32> to vector<8xf32>
    %175 = vector.shape_cast %174 : vector<8xf32> to vector<8x1xf32>
    %176 = tpu.reciprocal %175 {approx = true} : vector<8x1xf32> -> vector<8x1xf32>
    %177 = vector.broadcast %176 : vector<8x1xf32> to vector<8x8xf32>
    %178 = arith.mulf %173, %177 : vector<8x8xf32>
    %179 = arith.truncf %178 : vector<8x8xf32> to vector<8x8xbf16>
    %cst_51 = arith.constant dense<0.000000e+00> : vector<8x32xf32>
    %180 = tpu.matmul %179, %157, %cst_51 {dimension_numbers = #tpu.dot_dimension_numbers<[1], [0], [0], [1], [0, 0, 1, 1], [], []>} : vector<8x8xbf16>, vector<8x32xbf16>, vector<8x32xf32> -> vector<8x32xf32>
    %cst_52 = arith.constant dense<0.000000e+00> : vector<8x128xf32>
    %181 = tpu.matmul %157, %16, %cst_52 {dimension_numbers = #tpu.dot_dimension_numbers<[1], [0], [0], [1], [0, 0, 1, 1], [], []>} : vector<8x32xbf16>, vector<32x128xbf16>, vector<8x128xf32> -> vector<8x128xf32>
    %182 = arith.truncf %180 : vector<8x32xf32> to vector<8x32xbf16>
    %cst_53 = arith.constant dense<0.000000e+00> : vector<8x128xf32>
    %183 = tpu.matmul %182, %17, %cst_53 {dimension_numbers = #tpu.dot_dimension_numbers<[1], [0], [0], [1], [0, 0, 1, 1], [], []>} : vector<8x32xbf16>, vector<32x128xbf16>, vector<8x128xf32> -> vector<8x128xf32>
    %184 = arith.addf %181, %183 : vector<8x128xf32>
    %185 = vector.broadcast %10 : vector<1x128xf32> to vector<8x128xf32>
    %186 = arith.addf %184, %185 : vector<8x128xf32>
    %cst_54 = arith.constant 0.000000e+00 : f32
    %187 = vector.broadcast %cst_54 : f32 to vector<8x128xf32>
    %188 = arith.maximumf %186, %187 : vector<8x128xf32>
    %189 = arith.truncf %188 : vector<8x128xf32> to vector<8x128xbf16>
    %cst_55 = arith.constant dense<0.000000e+00> : vector<8x128xf32>
    %190 = tpu.matmul %189, %18, %cst_55 {dimension_numbers = #tpu.dot_dimension_numbers<[1], [0], [0], [1], [0, 0, 1, 1], [], []>} : vector<8x128xbf16>, vector<128x128xbf16>, vector<8x128xf32> -> vector<8x128xf32>
    %191 = vector.broadcast %11 : vector<1x128xf32> to vector<8x128xf32>
    %192 = arith.addf %190, %191 : vector<8x128xf32>
    %cst_56 = arith.constant 0.000000e+00 : f32
    %193 = vector.broadcast %cst_56 : f32 to vector<8x128xf32>
    %194 = arith.maximumf %192, %193 : vector<8x128xf32>
    %195 = arith.truncf %194 : vector<8x128xf32> to vector<8x128xbf16>
    %cst_57 = arith.constant dense<0.000000e+00> : vector<8x128xf32>
    %196 = tpu.matmul %195, %13, %cst_57 {dimension_numbers = #tpu.dot_dimension_numbers<[1], [0], [0], [1], [0, 0, 1, 1], [], []>} : vector<8x128xbf16>, vector<128x128xbf16>, vector<8x128xf32> -> vector<8x128xf32>
    %197 = arith.addf %166, %196 : vector<8x128xf32>
    %198 = vector.broadcast %7 : vector<1x128xf32> to vector<8x128xf32>
    %199 = arith.mulf %197, %198 : vector<8x128xf32>
    %200 = math.tanh %199 : vector<8x128xf32>
    %201 = vector.broadcast %8 : vector<1x128xf32> to vector<8x128xf32>
    %202 = arith.mulf %200, %201 : vector<8x128xf32>
    %203 = vector.broadcast %9 : vector<1x128xf32> to vector<8x128xf32>
    %204 = arith.addf %202, %203 : vector<8x128xf32>
    %205 = vector.extract_strided_slice %204 {offsets = [0, 0], sizes = [8, 32], strides = [1, 1]} : vector<8x128xf32> to vector<8x32xf32>
    %206 = vector.extract_strided_slice %204 {offsets = [0, 32], sizes = [8, 32], strides = [1, 1]} : vector<8x128xf32> to vector<8x32xf32>
    %207 = vector.extract_strided_slice %204 {offsets = [0, 64], sizes = [8, 32], strides = [1, 1]} : vector<8x128xf32> to vector<8x32xf32>
    %208 = vector.extract_strided_slice %204 {offsets = [0, 96], sizes = [8, 32], strides = [1, 1]} : vector<8x128xf32> to vector<8x32xf32>
    %209 = arith.mulf %206, %154 : vector<8x32xf32>
    %210 = arith.mulf %205, %207 : vector<8x32xf32>
    %211 = arith.addf %209, %210 : vector<8x32xf32>
    %212 = math.tanh %211 : vector<8x32xf32>
    %213 = arith.mulf %208, %212 : vector<8x32xf32>
    %214 = arith.truncf %213 : vector<8x32xf32> to vector<8x32xbf16>
    %cst_58 = arith.constant dense<0.000000e+00> : vector<8x128xf32>
    %215 = tpu.matmul %214, %15, %cst_58 {dimension_numbers = #tpu.dot_dimension_numbers<[1], [0], [0], [1], [0, 0, 1, 1], [], []>} : vector<8x32xbf16>, vector<32x128xbf16>, vector<8x128xf32> -> vector<8x128xf32>
    %216 = vector.broadcast %12 : vector<1x128xf32> to vector<8x128xf32>
    %217 = arith.addf %215, %216 : vector<8x128xf32>
    %c3 = arith.constant 3 : index
    %c0_59 = arith.constant 0 : index
    %c0_60 = arith.constant 0 : index
    %218 = vector.load %arg3[%c3, %c0_59, %c0_60] : memref<8x8x128xf32, #tpu.memory_space<vmem>>, vector<1x8x128xf32>
    %219 = vector.shape_cast %218 : vector<1x8x128xf32> to vector<8x128xf32>
    %220 = vector.shape_cast %217 : vector<8x128xf32> to vector<1x8x128xf32>
    tpu.vector_store %arg3[%c3, %c0_59, %c0_60], %220 {strides = array<i32>} : memref<8x8x128xf32, #tpu.memory_space<vmem>>, vector<1x8x128xf32>,
    %cst_61 = arith.constant dense<0.000000e+00> : vector<8x128xf32>
    %221 = tpu.matmul %214, %14, %cst_61 {dimension_numbers = #tpu.dot_dimension_numbers<[1], [0], [0], [1], [0, 0, 1, 1], [], []>} : vector<8x32xbf16>, vector<32x128xbf16>, vector<8x128xf32> -> vector<8x128xf32>
    %222 = vector.broadcast %6 : vector<1x128xf32> to vector<8x128xf32>
    %223 = arith.addf %221, %222 : vector<8x128xf32>
    %cst_62 = arith.constant dense<0.000000e+00> : vector<8x8xf32>
    %224 = tpu.matmul %214, %214, %cst_62 {dimension_numbers = #tpu.dot_dimension_numbers<[1], [1], [0], [0], [0, 0, 1, 0], [], []>} : vector<8x32xbf16>, vector<8x32xbf16>, vector<8x8xf32> -> vector<8x8xf32>
    %225 = arith.addf %224, %3 : vector<8x8xf32>
    %cst_63 = arith.constant dense<0xFF800000> : vector<8xf32>
    %226 = vector.multi_reduction <maximumf>, %225, %cst_63 [1] : vector<8x8xf32> to vector<8xf32>
    %227 = vector.shape_cast %226 : vector<8xf32> to vector<8x1xf32>
    %228 = vector.broadcast %227 : vector<8x1xf32> to vector<8x8xf32>
    %229 = arith.subf %225, %228 : vector<8x8xf32>
    %230 = math.exp %229 : vector<8x8xf32>
    %cst_64 = arith.constant dense<0.000000e+00> : vector<8xf32>
    %231 = vector.multi_reduction <add>, %230, %cst_64 [1] : vector<8x8xf32> to vector<8xf32>
    %232 = vector.shape_cast %231 : vector<8xf32> to vector<8x1xf32>
    %233 = tpu.reciprocal %232 {approx = true} : vector<8x1xf32> -> vector<8x1xf32>
    %234 = vector.broadcast %233 : vector<8x1xf32> to vector<8x8xf32>
    %235 = arith.mulf %230, %234 : vector<8x8xf32>
    %236 = arith.truncf %235 : vector<8x8xf32> to vector<8x8xbf16>
    %cst_65 = arith.constant dense<0.000000e+00> : vector<8x32xf32>
    %237 = tpu.matmul %236, %214, %cst_65 {dimension_numbers = #tpu.dot_dimension_numbers<[1], [0], [0], [1], [0, 0, 1, 1], [], []>} : vector<8x8xbf16>, vector<8x32xbf16>, vector<8x32xf32> -> vector<8x32xf32>
    %cst_66 = arith.constant dense<0.000000e+00> : vector<8x128xf32>
    %238 = tpu.matmul %214, %16, %cst_66 {dimension_numbers = #tpu.dot_dimension_numbers<[1], [0], [0], [1], [0, 0, 1, 1], [], []>} : vector<8x32xbf16>, vector<32x128xbf16>, vector<8x128xf32> -> vector<8x128xf32>
    %239 = arith.truncf %237 : vector<8x32xf32> to vector<8x32xbf16>
    %cst_67 = arith.constant dense<0.000000e+00> : vector<8x128xf32>
    %240 = tpu.matmul %239, %17, %cst_67 {dimension_numbers = #tpu.dot_dimension_numbers<[1], [0], [0], [1], [0, 0, 1, 1], [], []>} : vector<8x32xbf16>, vector<32x128xbf16>, vector<8x128xf32> -> vector<8x128xf32>
    %241 = arith.addf %238, %240 : vector<8x128xf32>
    %242 = vector.broadcast %10 : vector<1x128xf32> to vector<8x128xf32>
    %243 = arith.addf %241, %242 : vector<8x128xf32>
    %cst_68 = arith.constant 0.000000e+00 : f32
    %244 = vector.broadcast %cst_68 : f32 to vector<8x128xf32>
    %245 = arith.maximumf %243, %244 : vector<8x128xf32>
    %246 = arith.truncf %245 : vector<8x128xf32> to vector<8x128xbf16>
    %cst_69 = arith.constant dense<0.000000e+00> : vector<8x128xf32>
    %247 = tpu.matmul %246, %18, %cst_69 {dimension_numbers = #tpu.dot_dimension_numbers<[1], [0], [0], [1], [0, 0, 1, 1], [], []>} : vector<8x128xbf16>, vector<128x128xbf16>, vector<8x128xf32> -> vector<8x128xf32>
    %248 = vector.broadcast %11 : vector<1x128xf32> to vector<8x128xf32>
    %249 = arith.addf %247, %248 : vector<8x128xf32>
    %cst_70 = arith.constant 0.000000e+00 : f32
    %250 = vector.broadcast %cst_70 : f32 to vector<8x128xf32>
    %251 = arith.maximumf %249, %250 : vector<8x128xf32>
    %252 = arith.truncf %251 : vector<8x128xf32> to vector<8x128xbf16>
    %cst_71 = arith.constant dense<0.000000e+00> : vector<8x128xf32>
    %253 = tpu.matmul %252, %13, %cst_71 {dimension_numbers = #tpu.dot_dimension_numbers<[1], [0], [0], [1], [0, 0, 1, 1], [], []>} : vector<8x128xbf16>, vector<128x128xbf16>, vector<8x128xf32> -> vector<8x128xf32>
    %254 = arith.addf %223, %253 : vector<8x128xf32>
    %255 = vector.broadcast %7 : vector<1x128xf32> to vector<8x128xf32>
    %256 = arith.mulf %254, %255 : vector<8x128xf32>
    %257 = math.tanh %256 : vector<8x128xf32>
    %258 = vector.broadcast %8 : vector<1x128xf32> to vector<8x128xf32>
    %259 = arith.mulf %257, %258 : vector<8x128xf32>
    %260 = vector.broadcast %9 : vector<1x128xf32> to vector<8x128xf32>
    %261 = arith.addf %259, %260 : vector<8x128xf32>
    %262 = vector.extract_strided_slice %261 {offsets = [0, 0], sizes = [8, 32], strides = [1, 1]} : vector<8x128xf32> to vector<8x32xf32>
    %263 = vector.extract_strided_slice %261 {offsets = [0, 32], sizes = [8, 32], strides = [1, 1]} : vector<8x128xf32> to vector<8x32xf32>
    %264 = vector.extract_strided_slice %261 {offsets = [0, 64], sizes = [8, 32], strides = [1, 1]} : vector<8x128xf32> to vector<8x32xf32>
    %265 = vector.extract_strided_slice %261 {offsets = [0, 96], sizes = [8, 32], strides = [1, 1]} : vector<8x128xf32> to vector<8x32xf32>
    %266 = arith.mulf %263, %211 : vector<8x32xf32>
    %267 = arith.mulf %262, %264 : vector<8x32xf32>
    %268 = arith.addf %266, %267 : vector<8x32xf32>
    %269 = math.tanh %268 : vector<8x32xf32>
    %270 = arith.mulf %265, %269 : vector<8x32xf32>
    %271 = arith.truncf %270 : vector<8x32xf32> to vector<8x32xbf16>
    %cst_72 = arith.constant dense<0.000000e+00> : vector<8x128xf32>
    %272 = tpu.matmul %271, %15, %cst_72 {dimension_numbers = #tpu.dot_dimension_numbers<[1], [0], [0], [1], [0, 0, 1, 1], [], []>} : vector<8x32xbf16>, vector<32x128xbf16>, vector<8x128xf32> -> vector<8x128xf32>
    %273 = vector.broadcast %12 : vector<1x128xf32> to vector<8x128xf32>
    %274 = arith.addf %272, %273 : vector<8x128xf32>
    %c4 = arith.constant 4 : index
    %c0_73 = arith.constant 0 : index
    %c0_74 = arith.constant 0 : index
    %275 = vector.load %arg3[%c4, %c0_73, %c0_74] : memref<8x8x128xf32, #tpu.memory_space<vmem>>, vector<1x8x128xf32>
    %276 = vector.shape_cast %275 : vector<1x8x128xf32> to vector<8x128xf32>
    %277 = vector.shape_cast %274 : vector<8x128xf32> to vector<1x8x128xf32>
    tpu.vector_store %arg3[%c4, %c0_73, %c0_74], %277 {strides = array<i32>} : memref<8x8x128xf32, #tpu.memory_space<vmem>>, vector<1x8x128xf32>,
    %cst_75 = arith.constant dense<0.000000e+00> : vector<8x128xf32>
    %278 = tpu.matmul %271, %14, %cst_75 {dimension_numbers = #tpu.dot_dimension_numbers<[1], [0], [0], [1], [0, 0, 1, 1], [], []>} : vector<8x32xbf16>, vector<32x128xbf16>, vector<8x128xf32> -> vector<8x128xf32>
    %279 = vector.broadcast %6 : vector<1x128xf32> to vector<8x128xf32>
    %280 = arith.addf %278, %279 : vector<8x128xf32>
    %cst_76 = arith.constant dense<0.000000e+00> : vector<8x8xf32>
    %281 = tpu.matmul %271, %271, %cst_76 {dimension_numbers = #tpu.dot_dimension_numbers<[1], [1], [0], [0], [0, 0, 1, 0], [], []>} : vector<8x32xbf16>, vector<8x32xbf16>, vector<8x8xf32> -> vector<8x8xf32>
    %282 = arith.addf %281, %3 : vector<8x8xf32>
    %cst_77 = arith.constant dense<0xFF800000> : vector<8xf32>
    %283 = vector.multi_reduction <maximumf>, %282, %cst_77 [1] : vector<8x8xf32> to vector<8xf32>
    %284 = vector.shape_cast %283 : vector<8xf32> to vector<8x1xf32>
    %285 = vector.broadcast %284 : vector<8x1xf32> to vector<8x8xf32>
    %286 = arith.subf %282, %285 : vector<8x8xf32>
    %287 = math.exp %286 : vector<8x8xf32>
    %cst_78 = arith.constant dense<0.000000e+00> : vector<8xf32>
    %288 = vector.multi_reduction <add>, %287, %cst_78 [1] : vector<8x8xf32> to vector<8xf32>
    %289 = vector.shape_cast %288 : vector<8xf32> to vector<8x1xf32>
    %290 = tpu.reciprocal %289 {approx = true} : vector<8x1xf32> -> vector<8x1xf32>
    %291 = vector.broadcast %290 : vector<8x1xf32> to vector<8x8xf32>
    %292 = arith.mulf %287, %291 : vector<8x8xf32>
    %293 = arith.truncf %292 : vector<8x8xf32> to vector<8x8xbf16>
    %cst_79 = arith.constant dense<0.000000e+00> : vector<8x32xf32>
    %294 = tpu.matmul %293, %271, %cst_79 {dimension_numbers = #tpu.dot_dimension_numbers<[1], [0], [0], [1], [0, 0, 1, 1], [], []>} : vector<8x8xbf16>, vector<8x32xbf16>, vector<8x32xf32> -> vector<8x32xf32>
    %cst_80 = arith.constant dense<0.000000e+00> : vector<8x128xf32>
    %295 = tpu.matmul %271, %16, %cst_80 {dimension_numbers = #tpu.dot_dimension_numbers<[1], [0], [0], [1], [0, 0, 1, 1], [], []>} : vector<8x32xbf16>, vector<32x128xbf16>, vector<8x128xf32> -> vector<8x128xf32>
    %296 = arith.truncf %294 : vector<8x32xf32> to vector<8x32xbf16>
    %cst_81 = arith.constant dense<0.000000e+00> : vector<8x128xf32>
    %297 = tpu.matmul %296, %17, %cst_81 {dimension_numbers = #tpu.dot_dimension_numbers<[1], [0], [0], [1], [0, 0, 1, 1], [], []>} : vector<8x32xbf16>, vector<32x128xbf16>, vector<8x128xf32> -> vector<8x128xf32>
    %298 = arith.addf %295, %297 : vector<8x128xf32>
    %299 = vector.broadcast %10 : vector<1x128xf32> to vector<8x128xf32>
    %300 = arith.addf %298, %299 : vector<8x128xf32>
    %cst_82 = arith.constant 0.000000e+00 : f32
    %301 = vector.broadcast %cst_82 : f32 to vector<8x128xf32>
    %302 = arith.maximumf %300, %301 : vector<8x128xf32>
    %303 = arith.truncf %302 : vector<8x128xf32> to vector<8x128xbf16>
    %cst_83 = arith.constant dense<0.000000e+00> : vector<8x128xf32>
    %304 = tpu.matmul %303, %18, %cst_83 {dimension_numbers = #tpu.dot_dimension_numbers<[1], [0], [0], [1], [0, 0, 1, 1], [], []>} : vector<8x128xbf16>, vector<128x128xbf16>, vector<8x128xf32> -> vector<8x128xf32>
    %305 = vector.broadcast %11 : vector<1x128xf32> to vector<8x128xf32>
    %306 = arith.addf %304, %305 : vector<8x128xf32>
    %cst_84 = arith.constant 0.000000e+00 : f32
    %307 = vector.broadcast %cst_84 : f32 to vector<8x128xf32>
    %308 = arith.maximumf %306, %307 : vector<8x128xf32>
    %309 = arith.truncf %308 : vector<8x128xf32> to vector<8x128xbf16>
    %cst_85 = arith.constant dense<0.000000e+00> : vector<8x128xf32>
    %310 = tpu.matmul %309, %13, %cst_85 {dimension_numbers = #tpu.dot_dimension_numbers<[1], [0], [0], [1], [0, 0, 1, 1], [], []>} : vector<8x128xbf16>, vector<128x128xbf16>, vector<8x128xf32> -> vector<8x128xf32>
    %311 = arith.addf %280, %310 : vector<8x128xf32>
    %312 = vector.broadcast %7 : vector<1x128xf32> to vector<8x128xf32>
    %313 = arith.mulf %311, %312 : vector<8x128xf32>
    %314 = math.tanh %313 : vector<8x128xf32>
    %315 = vector.broadcast %8 : vector<1x128xf32> to vector<8x128xf32>
    %316 = arith.mulf %314, %315 : vector<8x128xf32>
    %317 = vector.broadcast %9 : vector<1x128xf32> to vector<8x128xf32>
    %318 = arith.addf %316, %317 : vector<8x128xf32>
    %319 = vector.extract_strided_slice %318 {offsets = [0, 0], sizes = [8, 32], strides = [1, 1]} : vector<8x128xf32> to vector<8x32xf32>
    %320 = vector.extract_strided_slice %318 {offsets = [0, 32], sizes = [8, 32], strides = [1, 1]} : vector<8x128xf32> to vector<8x32xf32>
    %321 = vector.extract_strided_slice %318 {offsets = [0, 64], sizes = [8, 32], strides = [1, 1]} : vector<8x128xf32> to vector<8x32xf32>
    %322 = vector.extract_strided_slice %318 {offsets = [0, 96], sizes = [8, 32], strides = [1, 1]} : vector<8x128xf32> to vector<8x32xf32>
    %323 = arith.mulf %320, %268 : vector<8x32xf32>
    %324 = arith.mulf %319, %321 : vector<8x32xf32>
    %325 = arith.addf %323, %324 : vector<8x32xf32>
    %326 = math.tanh %325 : vector<8x32xf32>
    %327 = arith.mulf %322, %326 : vector<8x32xf32>
    %328 = arith.truncf %327 : vector<8x32xf32> to vector<8x32xbf16>
    %cst_86 = arith.constant dense<0.000000e+00> : vector<8x128xf32>
    %329 = tpu.matmul %328, %15, %cst_86 {dimension_numbers = #tpu.dot_dimension_numbers<[1], [0], [0], [1], [0, 0, 1, 1], [], []>} : vector<8x32xbf16>, vector<32x128xbf16>, vector<8x128xf32> -> vector<8x128xf32>
    %330 = vector.broadcast %12 : vector<1x128xf32> to vector<8x128xf32>
    %331 = arith.addf %329, %330 : vector<8x128xf32>
    %c5 = arith.constant 5 : index
    %c0_87 = arith.constant 0 : index
    %c0_88 = arith.constant 0 : index
    %332 = vector.load %arg3[%c5, %c0_87, %c0_88] : memref<8x8x128xf32, #tpu.memory_space<vmem>>, vector<1x8x128xf32>
    %333 = vector.shape_cast %332 : vector<1x8x128xf32> to vector<8x128xf32>
    %334 = vector.shape_cast %331 : vector<8x128xf32> to vector<1x8x128xf32>
    tpu.vector_store %arg3[%c5, %c0_87, %c0_88], %334 {strides = array<i32>} : memref<8x8x128xf32, #tpu.memory_space<vmem>>, vector<1x8x128xf32>,
    %cst_89 = arith.constant dense<0.000000e+00> : vector<8x128xf32>
    %335 = tpu.matmul %328, %14, %cst_89 {dimension_numbers = #tpu.dot_dimension_numbers<[1], [0], [0], [1], [0, 0, 1, 1], [], []>} : vector<8x32xbf16>, vector<32x128xbf16>, vector<8x128xf32> -> vector<8x128xf32>
    %336 = vector.broadcast %6 : vector<1x128xf32> to vector<8x128xf32>
    %337 = arith.addf %335, %336 : vector<8x128xf32>
    %cst_90 = arith.constant dense<0.000000e+00> : vector<8x8xf32>
    %338 = tpu.matmul %328, %328, %cst_90 {dimension_numbers = #tpu.dot_dimension_numbers<[1], [1], [0], [0], [0, 0, 1, 0], [], []>} : vector<8x32xbf16>, vector<8x32xbf16>, vector<8x8xf32> -> vector<8x8xf32>
    %339 = arith.addf %338, %3 : vector<8x8xf32>
    %cst_91 = arith.constant dense<0xFF800000> : vector<8xf32>
    %340 = vector.multi_reduction <maximumf>, %339, %cst_91 [1] : vector<8x8xf32> to vector<8xf32>
    %341 = vector.shape_cast %340 : vector<8xf32> to vector<8x1xf32>
    %342 = vector.broadcast %341 : vector<8x1xf32> to vector<8x8xf32>
    %343 = arith.subf %339, %342 : vector<8x8xf32>
    %344 = math.exp %343 : vector<8x8xf32>
    %cst_92 = arith.constant dense<0.000000e+00> : vector<8xf32>
    %345 = vector.multi_reduction <add>, %344, %cst_92 [1] : vector<8x8xf32> to vector<8xf32>
    %346 = vector.shape_cast %345 : vector<8xf32> to vector<8x1xf32>
    %347 = tpu.reciprocal %346 {approx = true} : vector<8x1xf32> -> vector<8x1xf32>
    %348 = vector.broadcast %347 : vector<8x1xf32> to vector<8x8xf32>
    %349 = arith.mulf %344, %348 : vector<8x8xf32>
    %350 = arith.truncf %349 : vector<8x8xf32> to vector<8x8xbf16>
    %cst_93 = arith.constant dense<0.000000e+00> : vector<8x32xf32>
    %351 = tpu.matmul %350, %328, %cst_93 {dimension_numbers = #tpu.dot_dimension_numbers<[1], [0], [0], [1], [0, 0, 1, 1], [], []>} : vector<8x8xbf16>, vector<8x32xbf16>, vector<8x32xf32> -> vector<8x32xf32>
    %cst_94 = arith.constant dense<0.000000e+00> : vector<8x128xf32>
    %352 = tpu.matmul %328, %16, %cst_94 {dimension_numbers = #tpu.dot_dimension_numbers<[1], [0], [0], [1], [0, 0, 1, 1], [], []>} : vector<8x32xbf16>, vector<32x128xbf16>, vector<8x128xf32> -> vector<8x128xf32>
    %353 = arith.truncf %351 : vector<8x32xf32> to vector<8x32xbf16>
    %cst_95 = arith.constant dense<0.000000e+00> : vector<8x128xf32>
    %354 = tpu.matmul %353, %17, %cst_95 {dimension_numbers = #tpu.dot_dimension_numbers<[1], [0], [0], [1], [0, 0, 1, 1], [], []>} : vector<8x32xbf16>, vector<32x128xbf16>, vector<8x128xf32> -> vector<8x128xf32>
    %355 = arith.addf %352, %354 : vector<8x128xf32>
    %356 = vector.broadcast %10 : vector<1x128xf32> to vector<8x128xf32>
    %357 = arith.addf %355, %356 : vector<8x128xf32>
    %cst_96 = arith.constant 0.000000e+00 : f32
    %358 = vector.broadcast %cst_96 : f32 to vector<8x128xf32>
    %359 = arith.maximumf %357, %358 : vector<8x128xf32>
    %360 = arith.truncf %359 : vector<8x128xf32> to vector<8x128xbf16>
    %cst_97 = arith.constant dense<0.000000e+00> : vector<8x128xf32>
    %361 = tpu.matmul %360, %18, %cst_97 {dimension_numbers = #tpu.dot_dimension_numbers<[1], [0], [0], [1], [0, 0, 1, 1], [], []>} : vector<8x128xbf16>, vector<128x128xbf16>, vector<8x128xf32> -> vector<8x128xf32>
    %362 = vector.broadcast %11 : vector<1x128xf32> to vector<8x128xf32>
    %363 = arith.addf %361, %362 : vector<8x128xf32>
    %cst_98 = arith.constant 0.000000e+00 : f32
    %364 = vector.broadcast %cst_98 : f32 to vector<8x128xf32>
    %365 = arith.maximumf %363, %364 : vector<8x128xf32>
    %366 = arith.truncf %365 : vector<8x128xf32> to vector<8x128xbf16>
    %cst_99 = arith.constant dense<0.000000e+00> : vector<8x128xf32>
    %367 = tpu.matmul %366, %13, %cst_99 {dimension_numbers = #tpu.dot_dimension_numbers<[1], [0], [0], [1], [0, 0, 1, 1], [], []>} : vector<8x128xbf16>, vector<128x128xbf16>, vector<8x128xf32> -> vector<8x128xf32>
    %368 = arith.addf %337, %367 : vector<8x128xf32>
    %369 = vector.broadcast %7 : vector<1x128xf32> to vector<8x128xf32>
    %370 = arith.mulf %368, %369 : vector<8x128xf32>
    %371 = math.tanh %370 : vector<8x128xf32>
    %372 = vector.broadcast %8 : vector<1x128xf32> to vector<8x128xf32>
    %373 = arith.mulf %371, %372 : vector<8x128xf32>
    %374 = vector.broadcast %9 : vector<1x128xf32> to vector<8x128xf32>
    %375 = arith.addf %373, %374 : vector<8x128xf32>
    %376 = vector.extract_strided_slice %375 {offsets = [0, 0], sizes = [8, 32], strides = [1, 1]} : vector<8x128xf32> to vector<8x32xf32>
    %377 = vector.extract_strided_slice %375 {offsets = [0, 32], sizes = [8, 32], strides = [1, 1]} : vector<8x128xf32> to vector<8x32xf32>
    %378 = vector.extract_strided_slice %375 {offsets = [0, 64], sizes = [8, 32], strides = [1, 1]} : vector<8x128xf32> to vector<8x32xf32>
    %379 = vector.extract_strided_slice %375 {offsets = [0, 96], sizes = [8, 32], strides = [1, 1]} : vector<8x128xf32> to vector<8x32xf32>
    %380 = arith.mulf %377, %325 : vector<8x32xf32>
    %381 = arith.mulf %376, %378 : vector<8x32xf32>
    %382 = arith.addf %380, %381 : vector<8x32xf32>
    %383 = math.tanh %382 : vector<8x32xf32>
    %384 = arith.mulf %379, %383 : vector<8x32xf32>
    %385 = arith.truncf %384 : vector<8x32xf32> to vector<8x32xbf16>
    %cst_100 = arith.constant dense<0.000000e+00> : vector<8x128xf32>
    %386 = tpu.matmul %385, %15, %cst_100 {dimension_numbers = #tpu.dot_dimension_numbers<[1], [0], [0], [1], [0, 0, 1, 1], [], []>} : vector<8x32xbf16>, vector<32x128xbf16>, vector<8x128xf32> -> vector<8x128xf32>
    %387 = vector.broadcast %12 : vector<1x128xf32> to vector<8x128xf32>
    %388 = arith.addf %386, %387 : vector<8x128xf32>
    %c6 = arith.constant 6 : index
    %c0_101 = arith.constant 0 : index
    %c0_102 = arith.constant 0 : index
    %389 = vector.load %arg3[%c6, %c0_101, %c0_102] : memref<8x8x128xf32, #tpu.memory_space<vmem>>, vector<1x8x128xf32>
    %390 = vector.shape_cast %389 : vector<1x8x128xf32> to vector<8x128xf32>
    %391 = vector.shape_cast %388 : vector<8x128xf32> to vector<1x8x128xf32>
    tpu.vector_store %arg3[%c6, %c0_101, %c0_102], %391 {strides = array<i32>} : memref<8x8x128xf32, #tpu.memory_space<vmem>>, vector<1x8x128xf32>,
    %cst_103 = arith.constant dense<0.000000e+00> : vector<8x128xf32>
    %392 = tpu.matmul %385, %14, %cst_103 {dimension_numbers = #tpu.dot_dimension_numbers<[1], [0], [0], [1], [0, 0, 1, 1], [], []>} : vector<8x32xbf16>, vector<32x128xbf16>, vector<8x128xf32> -> vector<8x128xf32>
    %393 = vector.broadcast %6 : vector<1x128xf32> to vector<8x128xf32>
    %394 = arith.addf %392, %393 : vector<8x128xf32>
    %cst_104 = arith.constant dense<0.000000e+00> : vector<8x8xf32>
    %395 = tpu.matmul %385, %385, %cst_104 {dimension_numbers = #tpu.dot_dimension_numbers<[1], [1], [0], [0], [0, 0, 1, 0], [], []>} : vector<8x32xbf16>, vector<8x32xbf16>, vector<8x8xf32> -> vector<8x8xf32>
    %396 = arith.addf %395, %3 : vector<8x8xf32>
    %cst_105 = arith.constant dense<0xFF800000> : vector<8xf32>
    %397 = vector.multi_reduction <maximumf>, %396, %cst_105 [1] : vector<8x8xf32> to vector<8xf32>
    %398 = vector.shape_cast %397 : vector<8xf32> to vector<8x1xf32>
    %399 = vector.broadcast %398 : vector<8x1xf32> to vector<8x8xf32>
    %400 = arith.subf %396, %399 : vector<8x8xf32>
    %401 = math.exp %400 : vector<8x8xf32>
    %cst_106 = arith.constant dense<0.000000e+00> : vector<8xf32>
    %402 = vector.multi_reduction <add>, %401, %cst_106 [1] : vector<8x8xf32> to vector<8xf32>
    %403 = vector.shape_cast %402 : vector<8xf32> to vector<8x1xf32>
    %404 = tpu.reciprocal %403 {approx = true} : vector<8x1xf32> -> vector<8x1xf32>
    %405 = vector.broadcast %404 : vector<8x1xf32> to vector<8x8xf32>
    %406 = arith.mulf %401, %405 : vector<8x8xf32>
    %407 = arith.truncf %406 : vector<8x8xf32> to vector<8x8xbf16>
    %cst_107 = arith.constant dense<0.000000e+00> : vector<8x32xf32>
    %408 = tpu.matmul %407, %385, %cst_107 {dimension_numbers = #tpu.dot_dimension_numbers<[1], [0], [0], [1], [0, 0, 1, 1], [], []>} : vector<8x8xbf16>, vector<8x32xbf16>, vector<8x32xf32> -> vector<8x32xf32>
    %cst_108 = arith.constant dense<0.000000e+00> : vector<8x128xf32>
    %409 = tpu.matmul %385, %16, %cst_108 {dimension_numbers = #tpu.dot_dimension_numbers<[1], [0], [0], [1], [0, 0, 1, 1], [], []>} : vector<8x32xbf16>, vector<32x128xbf16>, vector<8x128xf32> -> vector<8x128xf32>
    %410 = arith.truncf %408 : vector<8x32xf32> to vector<8x32xbf16>
    %cst_109 = arith.constant dense<0.000000e+00> : vector<8x128xf32>
    %411 = tpu.matmul %410, %17, %cst_109 {dimension_numbers = #tpu.dot_dimension_numbers<[1], [0], [0], [1], [0, 0, 1, 1], [], []>} : vector<8x32xbf16>, vector<32x128xbf16>, vector<8x128xf32> -> vector<8x128xf32>
    %412 = arith.addf %409, %411 : vector<8x128xf32>
    %413 = vector.broadcast %10 : vector<1x128xf32> to vector<8x128xf32>
    %414 = arith.addf %412, %413 : vector<8x128xf32>
    %cst_110 = arith.constant 0.000000e+00 : f32
    %415 = vector.broadcast %cst_110 : f32 to vector<8x128xf32>
    %416 = arith.maximumf %414, %415 : vector<8x128xf32>
    %417 = arith.truncf %416 : vector<8x128xf32> to vector<8x128xbf16>
    %cst_111 = arith.constant dense<0.000000e+00> : vector<8x128xf32>
    %418 = tpu.matmul %417, %18, %cst_111 {dimension_numbers = #tpu.dot_dimension_numbers<[1], [0], [0], [1], [0, 0, 1, 1], [], []>} : vector<8x128xbf16>, vector<128x128xbf16>, vector<8x128xf32> -> vector<8x128xf32>
    %419 = vector.broadcast %11 : vector<1x128xf32> to vector<8x128xf32>
    %420 = arith.addf %418, %419 : vector<8x128xf32>
    %cst_112 = arith.constant 0.000000e+00 : f32
    %421 = vector.broadcast %cst_112 : f32 to vector<8x128xf32>
    %422 = arith.maximumf %420, %421 : vector<8x128xf32>
    %423 = arith.truncf %422 : vector<8x128xf32> to vector<8x128xbf16>
    %cst_113 = arith.constant dense<0.000000e+00> : vector<8x128xf32>
    %424 = tpu.matmul %423, %13, %cst_113 {dimension_numbers = #tpu.dot_dimension_numbers<[1], [0], [0], [1], [0, 0, 1, 1], [], []>} : vector<8x128xbf16>, vector<128x128xbf16>, vector<8x128xf32> -> vector<8x128xf32>
    %425 = arith.addf %394, %424 : vector<8x128xf32>
    %426 = vector.broadcast %7 : vector<1x128xf32> to vector<8x128xf32>
    %427 = arith.mulf %425, %426 : vector<8x128xf32>
    %428 = math.tanh %427 : vector<8x128xf32>
    %429 = vector.broadcast %8 : vector<1x128xf32> to vector<8x128xf32>
    %430 = arith.mulf %428, %429 : vector<8x128xf32>
    %431 = vector.broadcast %9 : vector<1x128xf32> to vector<8x128xf32>
    %432 = arith.addf %430, %431 : vector<8x128xf32>
    %433 = vector.extract_strided_slice %432 {offsets = [0, 0], sizes = [8, 32], strides = [1, 1]} : vector<8x128xf32> to vector<8x32xf32>
    %434 = vector.extract_strided_slice %432 {offsets = [0, 32], sizes = [8, 32], strides = [1, 1]} : vector<8x128xf32> to vector<8x32xf32>
    %435 = vector.extract_strided_slice %432 {offsets = [0, 64], sizes = [8, 32], strides = [1, 1]} : vector<8x128xf32> to vector<8x32xf32>
    %436 = vector.extract_strided_slice %432 {offsets = [0, 96], sizes = [8, 32], strides = [1, 1]} : vector<8x128xf32> to vector<8x32xf32>
    %437 = arith.mulf %434, %382 : vector<8x32xf32>
    %438 = arith.mulf %433, %435 : vector<8x32xf32>
    %439 = arith.addf %437, %438 : vector<8x32xf32>
    %440 = math.tanh %439 : vector<8x32xf32>
    %441 = arith.mulf %436, %440 : vector<8x32xf32>
    %442 = arith.truncf %441 : vector<8x32xf32> to vector<8x32xbf16>
    %cst_114 = arith.constant dense<0.000000e+00> : vector<8x128xf32>
    %443 = tpu.matmul %442, %15, %cst_114 {dimension_numbers = #tpu.dot_dimension_numbers<[1], [0], [0], [1], [0, 0, 1, 1], [], []>} : vector<8x32xbf16>, vector<32x128xbf16>, vector<8x128xf32> -> vector<8x128xf32>
    %444 = vector.broadcast %12 : vector<1x128xf32> to vector<8x128xf32>
    %445 = arith.addf %443, %444 : vector<8x128xf32>
    %c7 = arith.constant 7 : index
    %c0_115 = arith.constant 0 : index
    %c0_116 = arith.constant 0 : index
    %446 = vector.load %arg3[%c7, %c0_115, %c0_116] : memref<8x8x128xf32, #tpu.memory_space<vmem>>, vector<1x8x128xf32>
    %447 = vector.shape_cast %446 : vector<1x8x128xf32> to vector<8x128xf32>
    %448 = vector.shape_cast %445 : vector<8x128xf32> to vector<1x8x128xf32>
    tpu.vector_store %arg3[%c7, %c0_115, %c0_116], %448 {strides = array<i32>} : memref<8x8x128xf32, #tpu.memory_space<vmem>>, vector<1x8x128xf32>,
    return
  }
}

</mosaic_0001>

<bundles_post_ra>
// kernel: tpu_custom_call.1
= control target key start
LH: loop header
LB: loop body
LE: loop exit
PB: predicated region body
PF: predicated region fallthrough
CT: control target
= control target key end

     0   :  { %8 = vsyncpa [#allocation3], 0  ;;  %s5227_s0 = inlined_call_operand.hbm [shape: f32[32,128], index: 0, kind: input, shape index: {}]   ;;  %s5228_s1 = inlined_call_operand.hbm [shape: f32[8,128], index: 1, kind: input, shape index: {}]   ;;  %s5229_s2 = inlined_call_operand.hbm [shape: bf16[400,128], index: 2, kind: input, shape index: {}]   ;;  %s5230_s3 = inlined_call_operand.hbm [shape: f32[8,8,128], index: 3, kind: output, shape index: {}]  }
   0x1   :  { %9 = vsyncpa [#allocation6], 0 }
   0x2   :  { %10 = vsyncpa [#allocation4], 0  ;;  %s4312_s12 = smov [#allocation5]   ;;  %s4313_s14 = smov [#allocation2]  }
   0x3   :  { %s29_s13 = sshll.u32 %s4312_s12, 4  ;;  %s16_s15 = sshll.u32 %s4313_s14, 4  ;;  %s30_s13 = int_to_ptr.vmem [resolvable:$true] %s29_s13  ;;  %s4343_s15 = int_to_ptr.vmem [resolvable:$true] %s16_s15 }
   0x4   :  { %s4218_s18 = scalar_lea.hbm %s5228_s1, 128 }
   0x5   :  { %p4219_p0 = scmp.ne.s32.totalorder %s5228_s1, %s4218_s18  ;;  %p4222_p1 = scmp.lt.u32.totalorder %s4218_s18, %s5228_s1 }
   0x7   :  { %p4224_p2 = pnand %p4222_p1, %p4219_p0 }
   0x9   :  { %4227 = shalt.err (!%p4224_p2)
}
   0xa   :  { %s4228_s23 = scalar_lea.vmem %s30_s13, 128  ;;  %p4233_p4 = scmp.lt.s32.totalorder %s30_s13, %s30_s13 }
   0xb   :  { %p4229_p3 = scmp.ne.s32.totalorder %s30_s13, %s4228_s23  ;;  %p4234_p5 = scmp.lt.s32.totalorder %s4228_s23, %s4228_s23 }
   0xd   :  { %p4235_p6 = por %p4234_p5, %p4233_p4 }
   0xf   :  { %p4236_p7 = pnand %p4235_p6, %p4229_p3 }
  0x11   :  { %4239 = shalt.err (!%p4236_p7)
}
  0x12   :  { %32 = dma.hbm_to_vmem [thread:$0]  %s5228_s1, 128, %s30_s13, [#allocation6]  }
  0x13   :  { %s4240_s28 = scalar_lea.hbm %s5227_s0, 512 }
  0x14   :  { %p4241_p8 = scmp.ne.s32.totalorder %s5227_s0, %s4240_s28  ;;  %p4244_p9 = scmp.lt.u32.totalorder %s4240_s28, %s5227_s0 }
  0x16   :  { %p4246_p10 = pnand %p4244_p9, %p4241_p8 }
  0x18   :  { %4249 = shalt.err (!%p4246_p10)
}
  0x19   :  { %s4250_s6 = scalar_lea.vmem %s4343_s15, 512  ;;  %p4255_p12 = scmp.lt.s32.totalorder %s4343_s15, %s4343_s15 }
  0x1a   :  { %p4251_p11 = scmp.ne.s32.totalorder %s4343_s15, %s4250_s6  ;;  %p4256_p13 = scmp.lt.s32.totalorder %s4250_s6, %s4250_s6 }
  0x1c   :  { %p4257_p0 = por %p4256_p13, %p4255_p12 }
  0x1e   :  { %p4258_p1 = pnand %p4257_p0, %p4251_p11 }
  0x20   :  { %4261 = shalt.err (!%p4258_p1)
}
  0x21   :  { %s4314_s1 = smov 128   ;;  %s4315_s7 = smov 8  }
  0x22   :  { %22 = dma.hbm_to_vmem [thread:$0]  %s5227_s0, 512, %s4343_s15, [#allocation3], %s4314_s1, %s4314_s1, %s4315_s7  }
  0x23   :  { %s4316_s10 = smov [#allocation7]   ;;  %s4262_s14 = scalar_lea.hbm %s5229_s2, 3200 }
  0x24   :  { %s38_s11 = sshll.u32 %s4316_s10, 4  ;;  %p4263_p2 = scmp.ne.s32.totalorder %s5229_s2, %s4262_s14  ;;  %s39_s11 = int_to_ptr.vmem [resolvable:$true] %s38_s11 }
  0x25   :  { %p4266_p3 = scmp.lt.u32.totalorder %s4262_s14, %s5229_s2 }
  0x27   :  { %p4268_p4 = pnand %p4266_p3, %p4263_p2 }
  0x29   :  { %4271 = shalt.err (!%p4268_p4)
}
  0x2a   :  { %s4272_s20 = scalar_lea.vmem %s39_s11, 3200  ;;  %p4277_p6 = scmp.lt.s32.totalorder %s39_s11, %s39_s11 }
  0x2b   :  { %p4273_p5 = scmp.ne.s32.totalorder %s39_s11, %s4272_s20  ;;  %p4278_p7 = scmp.lt.s32.totalorder %s4272_s20, %s4272_s20 }
  0x2d   :  { %p4279_p8 = por %p4278_p7, %p4277_p6 }
  0x2f   :  { %p4280_p9 = pnand %p4279_p8, %p4273_p5 }
  0x31   :  { %4283 = shalt.err (!%p4280_p9)
}
  0x32   :  { %s4317_s0 = smov 64   ;;  %s4318_s15 = smov 4  }
  0x33   :  { %44 = dma.hbm_to_vmem [thread:$0]  %s5229_s2, 3200, %s39_s11, [#allocation6], %s4317_s0, %s4317_s0, %s4318_s15  }
  0x34   :  { %4306 = dma.done.wait [#allocation3], 512  }
  0x35   :  { %4307 = vsyncadd [#allocation3], 4294966784 }
  0x36   :  { %4308 = dma.done.wait [#allocation6], 3328  }
  0x37   :  { %4309 = vsyncadd [#allocation6], 4294963968  ;;  %v4319_v0 = vmov 0.0   ;;  %vm4320_vm0 = vmmov 0   ;;  %v4397_v1 = vld [vmem:[#allocation7] sm:$0xff]   ;;  %v4400_v2 = vld [vmem:[#allocation7 + $0x8] sm:$0xff]   ;;  %v111_v17 = vlaneseq }
  0x38   :  { %3439 = vmatprep.subr.bf16.mxu0 %v4319_v0  ;;  %3433 = vmatprep.subr.bf16.mxu1 %v4319_v0  ;;  %v4403_v3 = vld [vmem:[#allocation7 + $0x10] sm:$0xff]   ;;  %v4109_v4 = vld [vmem:[#allocation7 + $0xc0] sm:$0xff]   ;;  %v57_v5 = vld [vmem:[#allocation2 + $0x10] sm:$0xff]  ;;  %vm121_vm1 = vcmask 130048   ;;  %s4321_s2 = smov 32   ;;  %vm312_vm2 = vcmask 261120  }
  0x39   :  { %3435 = vmatprep.mubr.msk.bf16.mxu1 %vm4320_vm0, %v4319_v0  ;;  %3455 = vmatprep.mubr.msk.bf16.mxu0 %vm4320_vm0, %v4319_v0  ;;  %v4407_v6 = vld [vmem:[#allocation7 + $0x18] sm:$0xff]   ;;  %v110_v7 = vpack.c.bf16 %v57_v5, %v57_v5  ;;  %v4412_v8 = vld [vmem:[#allocation7 + $0x20] sm:$0xff]   ;;  %v4418_v9 = vld [vmem:[#allocation7 + $0x28] sm:$0xff]   ;;  %v4434_v19 = vshrl.u32 %v111_v17, 7  ;;  %vm469_vm3 = vcmask 1043456   ;;  %vm453_vm4 = vcmask 64512  }
  0x3a   :  { %3440 = vmatpush3.bf16.msra.mxu0 %v4397_v1  ;;  %3434 = vmatpush3.bf16.msra.mxu1 %v4109_v4  ;;  %v4423_v10 = vld [vmem:[#allocation7 + $0x30] sm:$0xff]   ;;  %v4427_v11 = vld [vmem:[#allocation7 + $0x38] sm:$0xff]   ;;  %v56_v39 = vld [vmem:[#allocation2 + $0x8] sm:$0xff]  ;;  %s4322_s23 = smov [#allocation8]  }
  0x3b   :  { %3441 = vmatprep.subr.bf16.mxu0 %v4319_v0  ;;  %3459 = vmatprep.subr.bf16.mxu1 %v4319_v0  ;;  %v55_v12 = vld [vmem:[#allocation2] sm:$0xff]  ;;  %v113_v20 = vsub.s32 0, %v4434_v19  ;;  %v257_v23 = vsub.s32 2, %v4434_v19  ;;  %v263_v32 = vsub.s32 3, %v4434_v19  ;;  %v268_v33 = vsub.s32 4, %v4434_v19  ;;  %v4461_v46 = vld [vmem:[#allocation7 + $0x50] sm:$0xff]  }
  0x3c   :  { %v165_v13 = vpack.c.bf16 %v55_v12, %v55_v12  ;;  %v4437_v21 = vld [vmem:[#allocation5] sm:$0xff]  ;;  %v4463_v47 = vld [vmem:[#allocation7 + $0x60] sm:$0xff]   ;;  %v4469_v49 = vld [vmem:[#allocation7 + $0x68] sm:$0xff]   ;;  %v295_v59 = vsub.s32 7, %v4434_v19  ;;  %s3099_s24 = sshll.u32 %s4322_s23, 4  ;;  %s3100_s24 = int_to_ptr.vmem [resolvable:$true] %s3099_s24 }
  0x3d   :  { %3436 = vmatmul.mubr.msk.bf16.vlgmr.msra.gmra.mrb[0].mxu1 %vm121_vm1, %v110_v7  ;;  %v114_v22 = vrot.slane %v4437_v21, %v113_v20  ;;  %v4442_v25 = vrot.slane %v4437_v21, %v257_v23  ;;  %v4448_v34 = vrot.slane %v4437_v21, %v263_v32  ;;  %v4451_v35 = vrot.slane %v4437_v21, %v268_v33  ;;  %v4467_v48 = vld [vmem:[#allocation7 + $0x58] sm:$0xff]   ;;  %v4479_v54 = vld [vmem:[#allocation7 + $0x40] sm:$0xff]   ;;  %v4484_v56 = vld [vmem:[#allocation7 + $0x48] sm:$0xff]   ;;  %s4284_s25 = scalar_lea.vmem %s3100_s24, 1024  ;;  %p4289_p11 = scmp.lt.s32.totalorder %s3100_s24, %s3100_s24 }
  0x3e   :  { %3442 = vmatpush3.bf16.msra.mxu0 %v4400_v2  ;;  %3463 = vmatprep.mubr.msk.bf16.mxu1 %vm4320_vm0, %v4319_v0  ;;  %v4505_v60 = vrot.slane %v4437_v21, %v295_v59  ;;  %v4515_v33 = vld [vmem:[#allocation7 + $0x70] sm:$0xff]   ;;  %p4285_p10 = scmp.ne.s32.totalorder %s3100_s24, %s4284_s25  ;;  %p4290_p12 = scmp.lt.s32.totalorder %s4284_s25, %s4284_s25 }
  0x3f   :  { %3443 = vmatprep.subr.bf16.mxu0 %v4319_v0  ;;  %3460 = vmatpush3.bf16.msra.mxu1 %v4461_v46 }
  0x40   :  { %3461 = vmatprep.subr.bf16.mxu1 %v4319_v0  ;;  %p4291_p13 = por %p4290_p12, %p4289_p11 }
  0x42   :  { %3444 = vmatpush3.bf16.msra.mxu0 %v4403_v3  ;;  %p4292_p0 = pnand %p4291_p13, %p4285_p10 }
  0x43   :  { %3445 = vmatprep.subr.bf16.mxu0 %v4319_v0  ;;  %3462 = vmatpush3.bf16.msra.mxu1 %v4467_v48 }
  0x44   :  { %3467 = vmatprep.subr.bf16.mxu1 %v4319_v0 }
  0x46   :  { %3446 = vmatpush3.bf16.msra.mxu0 %v4407_v6 }
  0x47   :  { %3447 = vmatprep.subr.bf16.mxu0 %v4319_v0 }
  0x4a   :  { %3448 = vmatpush3.bf16.msra.mxu0 %v4412_v8 }
  0x4b   :  { %3449 = vmatprep.subr.bf16.mxu0 %v4319_v0 }
  0x4e   :  { %3450 = vmatpush3.bf16.msra.mxu0 %v4418_v9 }
  0x4f   :  { %3451 = vmatprep.subr.bf16.mxu0 %v4319_v0 }
  0x52   :  { %3452 = vmatpush3.bf16.msra.mxu0 %v4423_v10 }
  0x53   :  { %3453 = vmatprep.subr.bf16.mxu0 %v4319_v0 }
  0x56   :  { %3454 = vmatpush3.bf16.msra.mxu0 %v4427_v11 }
  0x57   :  { %3495 = vmatprep.subr.bf16.mxu0 %v4319_v0 }
  0x59   :  { %3456 = vmatmul.mubr.bf16.vlgmr.msra.gmra.mrb[0].mxu0 %v165_v13 }
  0x5a   :  { %3499 = vmatprep.mubr.msk.bf16.mxu0 %vm4320_vm0, %v4319_v0  ;;  %3496 = vmatpush3.bf16.msra.mxu0 %v4463_v47 }
  0x5b   :  { %3497 = vmatprep.subr.bf16.mxu0 %v4319_v0 }
  0x5e   :  { %3498 = vmatpush3.bf16.msra.mxu0 %v4469_v49 }
  0x5f   :  { %3503 = vmatprep.subr.bf16.mxu0 %v4319_v0 }
 0x110   :  { %v159_v14 = vpop.f32.mrb[0].mxu1 }
 0x111   :  { %v3437_v15 = vpop.f32.mrb[1].mxu1  ;;  %v160_v24 = vadd.f32 %v159_v14, %v114_v22 }
 0x112   :  { %v162_v16 = vpop.f32.mrb[2].mxu1  ;;  %v4510_v15 = vld [vmem:[#allocation2 + $0x18] sm:$0xff] }
 0x113   :  { %v3438_v18 = vpop.f32.mrb[3].mxu1 }
 0x12c   :  { %v248_v26 = vpop.f32.mrb[0].mxu0 }
 0x12d   :  { %v254_v27 = vadd.f32 %v248_v26, %v160_v24  ;;  %v3457_v28 = vpop.f32.mrb[1].mxu0 }
 0x12e   :  { %v251_v29 = vpop.f32.mrb[2].mxu0 }
 0x12f   :  { %v259_v30 = vmul.f32 %v4442_v25, %v254_v27  ;;  %v3458_v31 = vpop.f32.mrb[3].mxu0 }
 0x131   :  { %4128 = vtanh.f32 %v259_v30 }
 0x13b   :  { %v4129_v36 = vpop.eup %4128 }
 0x13c   :  { %v265_v37 = vmul.f32 %v4129_v36, %v4448_v34 }
 0x13e   :  { %v270_v38 = vadd.f32 %v4451_v35, %v265_v37  ;;  %v4522_v37 = vld [vmem:[#allocation7 + $0x78] sm:$0xff]  }
 0x140   :  { %277 = vrot.lane.b32.xlu0 %v270_v38, %s4317_s0 }
 0x144   :  { %272 = vrot.lane.b32.xlu0 %v56_v39, %s4321_s2  ;;  %v4529_v39 = vld [vmem:[#allocation7 + $0x88] sm:$0xff]  }
 0x1b2   :  { %v278_v40 = vpop.permute.xlu0 %277 }
 0x1b3   :  { %v280_v41 = vmul.f32 %v278_v40, %v270_v38  ;;  %v4533_v40 = vld [vmem:[#allocation7 + $0x90] sm:$0xff]  }
 0x1b5   :  { %282 = vrot.lane.b32.xlu1 %v280_v41, %s4321_s2  ;;  %v4537_v41 = vld [vmem:[#allocation7 + $0x98] sm:$0xff]  }
 0x1b6   :  { %v273_v42 = vpop.permute.xlu0 %272 }
 0x1b7   :  { %v275_v43 = vmul.f32 %v273_v42, %v270_v38  ;;  %v4541_v42 = vld [vmem:[#allocation7 + $0xa0] sm:$0xff]  }
 0x227   :  { %v283_v44 = vpop.permute.xlu1 %282 }
 0x228   :  { %v4458_v45 = vadd.f32 %v283_v44, %v275_v43  ;;  %v4545_v43 = vld [vmem:[#allocation7 + $0xa8] sm:$0xff]  }
 0x22a   :  { %4130 = vtanh.f32 %v4458_v45 }
 0x234   :  { %v4131_v50 = vpop.eup %4130 }
 0x235   :  { %288 = vrot.lane.b32.xlu1 %v4131_v50, %s4317_s0 }
 0x2a7   :  { %v289_v51 = vpop.permute.xlu1 %288 }
 0x2a8   :  { %v291_v52 = vmul.f32 %v289_v51, %v270_v38  ;;  %v4526_v38 = vld [vmem:[#allocation7 + $0x80] sm:$0xff]  }
 0x2aa   :  { %v292_v53 = vpack.c.bf16 %v291_v52, %v291_v52 }
 0x2ac   :  { %298 = vrot.lane.b32.xlu0 %v292_v53, %s4321_s2 }
 0x31e   :  { %v299_v55 = vpop.permute.xlu0 %298 }
 0x31f   :  { %3464 = vmatmul.mubr.msk.bf16.vlgmr.msra.gmra.mrb[4].mxu1 %vm312_vm2, %v299_v55  ;;  %3500 = vmatmul.mubr.msk.bf16.vlgmr.msra.gmra.mrb[4].mxu0 %vm312_vm2, %v299_v55  ;;  %v314_v57 = vsel %vm312_vm2, %v299_v55, 0  ;;  %v470_v58 = vsel %vm469_vm3, %v299_v55, 0 }
 0x320   :  { %3468 = vmatpush3.bf16.msra.mxu1 %v4479_v54  ;;  %3471 = vmatprep.mubr.msk.bf16.mxu1 %vm4320_vm0, %v4319_v0 }
 0x321   :  { %3469 = vmatprep.subr.bf16.mxu1 %v4319_v0  ;;  %3519 = vmatprep.mubr.msk.bf16.mxu0 %vm4320_vm0, %v4319_v0 }
 0x322   :  { %3504 = vmatpush3.bf16.msra.mxu0 %v4526_v38 }
 0x323   :  { %3505 = vmatprep.subr.bf16.mxu0 %v4319_v0 }
 0x324   :  { %3470 = vmatpush3.bf16.msra.mxu1 %v4484_v56 }
 0x325   :  { %3475 = vmatprep.subr.bf16.mxu1 %v4319_v0 }
 0x326   :  { %3506 = vmatpush3.bf16.msra.mxu0 %v4529_v39 }
 0x327   :  { %3472 = vmatmul.mubr.msk.bf16.vlgmr.msra.gmra.mrb[8].mxu1 %vm312_vm2, %v299_v55  ;;  %3507 = vmatprep.subr.bf16.mxu0 %v4319_v0 }
 0x328   :  { %3477 = vmatprep.mubr.msk.bf16.mxu1 %vm4320_vm0, %v4319_v0 }
 0x32a   :  { %3508 = vmatpush3.bf16.msra.mxu0 %v4533_v40 }
 0x32b   :  { %3509 = vmatprep.subr.bf16.mxu0 %v4319_v0 }
 0x32d   :  { %3476 = vmatpush3.bf16.xpose.msra.mxu1 %v314_v57  ;;  %v4573_v57 = vld [vmem:[#allocation7 + $0xb8] sm:$0xff]  }
 0x32e   :  { %3481 = vmatprep.subr.bf16.mxu1 %v4319_v0  ;;  %3510 = vmatpush3.bf16.msra.mxu0 %v4537_v41 }
 0x32f   :  { %3511 = vmatprep.subr.bf16.mxu0 %v4319_v0 }
 0x332   :  { %3512 = vmatpush3.bf16.msra.mxu0 %v4541_v42 }
 0x333   :  { %3513 = vmatprep.subr.bf16.mxu0 %v4319_v0 }
 0x334   :  { %3478 = vmatmul.mubr.msk.bf16.vlgmr.msra.gmra.mrb[12].mxu1 %vm312_vm2, %v299_v55  ;;  %v4569_v55 = vld [vmem:[#allocation7 + $0xb0] sm:$0xff]  }
 0x335   :  { %3482 = vmatpush3.bf16.msra.mxu1 %v470_v58  ;;  %3483 = vmatprep.mubr.msk.bf16.mxu1 %vm4320_vm0, %v4319_v0  ;;  %v622_v58 = vsub.s32 5, %v4434_v19 }
 0x336   :  { %3487 = vmatprep.subr.bf16.mxu1 %v4319_v0  ;;  %3514 = vmatpush3.bf16.msra.mxu0 %v4545_v43 }
 0x337   :  { %3515 = vmatprep.subr.bf16.mxu0 %v4319_v0  ;;  %v4579_v59 = vrot.slane %v4437_v21, %v622_v58 }
 0x33a   :  { %3516 = vmatpush3.bf16.msra.mxu0 %v4569_v55 }
 0x33b   :  { %3517 = vmatprep.subr.bf16.mxu0 %v4319_v0 }
 0x33e   :  { %3518 = vmatpush3.bf16.msra.mxu0 %v4573_v57 }
 0x33f   :  { %3543 = vmatprep.subr.bf16.mxu0 %v4319_v0 }
 0x3f2   :  { %v350_v61 = vpop.f32.mrb[4].mxu1  ;;  %v4507_v62 = vpop.f32.mrb[4].mxu0 }
 0x3f3   :  { %v351_v63 = vadd.f32 %v350_v61, %v4505_v60  ;;  %v3465_v4 = vpop.f32.mrb[5].mxu1  ;;  %v3501_v5 = vpop.f32.mrb[5].mxu0 }
 0x3f4   :  { %v353_v7 = vpop.f32.mrb[6].mxu1  ;;  %v617_v12 = vpop.f32.mrb[6].mxu0 }
 0x3f5   :  { %356 = vst [vmem:[#allocation8] sm:$0xff] %v351_v63  ;;  %v3466_v13 = vpop.f32.mrb[7].mxu1  ;;  %v3502_v14 = vpop.f32.mrb[7].mxu0 }
 0x407   :  { %v447_v16 = vpop.f32.mrb[12].mxu1 }
 0x408   :  { %v448_v17 = vadd.f32 %v447_v16, %v4510_v15  ;;  %v3479_v18 = vpop.f32.mrb[13].mxu1 }
 0x409   :  { %v450_v20 = vpop.f32.mrb[14].mxu1 }
 0x40a   :  { %v3480_v22 = vpop.f32.mrb[15].mxu1  ;;  %v454_v23 = vsel %vm453_vm4, %v448_v17, -inf }
 0x40b   :  { %455 = vmax.xlane.f32.xlu1 %v454_v23 }
 0x498   :  { %v456_v24 = vpop.xlane.xlu1 %455 }
 0x499   :  { %v457_v26 = vsub.f32 %v448_v17, %v456_v24 }
 0x49b   :  { %v458_v27 = vmul.f32 1.442695, %v457_v26 }
 0x49d   :  { %4132 = vpow2.f32 %v458_v27  ;;  %v359_v27 = vsub.s32 1, %v4434_v19 }
 0x4a7   :  { %v4133_v28 = vpop.eup %4132 }
 0x4a8   :  { %v460_v29 = vsel %vm453_vm4, %v4133_v28, 0.0 }
 0x4a9   :  { %461 = vadd.xlane.f32.xlu0 %v460_v29 }
 0x536   :  { %v462_v30 = vpop.xlane.xlu0 %461 }
 0x537   :  { %4134 = vrcp.f32 %v462_v30 }
 0x541   :  { %v4135_v31 = vpop.eup %4134 }
 0x542   :  { %v464_v32 = vmul.f32 %v4135_v31, %v4133_v28  ;;  %v4602_v28 = vrot.slane %v4437_v21, %v359_v27 }
 0x544   :  { %v465_v36 = vpack.c.bf16 %v464_v32, %v464_v32 }
 0x546   :  { %3484 = vmatmul.mubr.msk.bf16.vlgmr.msra.gmra.mrb[16].mxu1 %vm453_vm4, %v465_v36 }
 0x547   :  { %3488 = vmatpush3.bf16.msra.mxu1 %v4515_v33  ;;  %3491 = vmatprep.mubr.msk.bf16.mxu1 %vm4320_vm0, %v4319_v0 }
 0x548   :  { %3489 = vmatprep.subr.bf16.mxu1 %v4319_v0 }
 0x54b   :  { %3490 = vmatpush3.bf16.msra.mxu1 %v4522_v37 }
 0x54c   :  { %3523 = vmatprep.subr.bf16.mxu1 %v4319_v0 }
 0x619   :  { %v506_v44 = vpop.f32.mrb[16].mxu1 }
 0x61a   :  { %v512_v50 = vpack.c.bf16 %v506_v44, %v506_v44  ;;  %v3485_v51 = vpop.f32.mrb[17].mxu1 }
 0x61b   :  { %v509_v52 = vpop.f32.mrb[18].mxu1 }
 0x61c   :  { %v3486_v53 = vpop.f32.mrb[19].mxu1  ;;  %3492 = vmatmul.mubr.msk.bf16.vlgmr.msra.gmra.mrb[20].mxu1 %vm312_vm2, %v512_v50 }
 0x61d   :  { %3524 = vmatpush3.bf16.msra.mxu1 %v4397_v1  ;;  %3539 = vmatprep.mubr.msk.bf16.mxu1 %vm4320_vm0, %v4319_v0 }
 0x61e   :  { %3525 = vmatprep.subr.bf16.mxu1 %v4319_v0 }
 0x621   :  { %3526 = vmatpush3.bf16.msra.mxu1 %v4400_v2 }
 0x622   :  { %3527 = vmatprep.subr.bf16.mxu1 %v4319_v0 }
 0x625   :  { %3528 = vmatpush3.bf16.msra.mxu1 %v4403_v3 }
 0x626   :  { %3529 = vmatprep.subr.bf16.mxu1 %v4319_v0 }
 0x629   :  { %3530 = vmatpush3.bf16.msra.mxu1 %v4407_v6 }
 0x62a   :  { %3531 = vmatprep.subr.bf16.mxu1 %v4319_v0 }
 0x62d   :  { %3532 = vmatpush3.bf16.msra.mxu1 %v4412_v8 }
 0x62e   :  { %3533 = vmatprep.subr.bf16.mxu1 %v4319_v0 }
 0x631   :  { %3534 = vmatpush3.bf16.msra.mxu1 %v4418_v9 }
 0x632   :  { %3535 = vmatprep.subr.bf16.mxu1 %v4319_v0 }
 0x635   :  { %3536 = vmatpush3.bf16.msra.mxu1 %v4423_v10 }
 0x636   :  { %3537 = vmatprep.subr.bf16.mxu1 %v4319_v0 }
 0x639   :  { %3538 = vmatpush3.bf16.msra.mxu1 %v4427_v11 }
 0x63a   :  { %3627 = vmatprep.subr.bf16.mxu1 %v4319_v0 }
 0x6ef   :  { %v562_v61 = vpop.f32.mrb[20].mxu1 }
 0x6f0   :  { %v615_v63 = vadd.f32 %v4507_v62, %v562_v61  ;;  %v3493_v4 = vpop.f32.mrb[21].mxu1  ;;  %v629_v62 = vsub.s32 6, %v4434_v19 }
 0x6f1   :  { %v565_v5 = vpop.f32.mrb[22].mxu1 }
 0x6f2   :  { %v624_v7 = vadd.f32 %v4579_v59, %v615_v63  ;;  %v3494_v12 = vpop.f32.mrb[23].mxu1  ;;  %v4591_v16 = vrot.slane %v4437_v21, %v629_v62 }
 0x6f4   :  { %v625_v13 = vmax.f32 %v624_v7, 0.0 }
 0x6f6   :  { %v626_v14 = vpack.c.bf16 %v625_v13, %v625_v13 }
 0x6f8   :  { %3520 = vmatmul.mubr.bf16.vlgmr.msra.gmra.mrb[8].mxu0 %v626_v14 }
 0x6f9   :  { %3544 = vmatpush3.bf16.msra.mxu0 %v4461_v46  ;;  %3547 = vmatprep.mubr.msk.bf16.mxu0 %vm4320_vm0, %v4319_v0 }
 0x6fa   :  { %3545 = vmatprep.subr.bf16.mxu0 %v4319_v0 }
 0x6fd   :  { %3546 = vmatpush3.bf16.msra.mxu0 %v4467_v48 }
 0x6fe   :  { %3551 = vmatprep.subr.bf16.mxu0 %v4319_v0 }
 0x7cb   :  { %v713_v17 = vpop.f32.mrb[8].mxu0 }
 0x7cc   :  { %v714_v18 = vadd.f32 %v713_v17, %v4591_v16  ;;  %v3521_v20 = vpop.f32.mrb[9].mxu0 }
 0x7cd   :  { %v716_v22 = vpop.f32.mrb[10].mxu0 }
 0x7ce   :  { %v719_v23 = vmax.f32 %v714_v18, 0.0  ;;  %v3522_v24 = vpop.f32.mrb[11].mxu0 }
 0x7d0   :  { %v720_v26 = vpack.c.bf16 %v719_v23, %v719_v23 }
 0x7d2   :  { %3540 = vmatmul.mubr.bf16.vlgmr.msra.gmra.mrb[8].mxu1 %v720_v26 }
 0x7d3   :  { %3628 = vmatpush3.bf16.msra.mxu1 %v4461_v46  ;;  %3631 = vmatprep.mubr.msk.bf16.mxu1 %vm4320_vm0, %v4319_v0 }
 0x7d4   :  { %3629 = vmatprep.subr.bf16.mxu1 %v4319_v0 }
 0x7d7   :  { %3630 = vmatpush3.bf16.msra.mxu1 %v4467_v48 }
 0x7d8   :  { %3635 = vmatprep.subr.bf16.mxu1 %v4319_v0 }
 0x8a5   :  { %v755_v29 = vpop.f32.mrb[8].mxu1 }
 0x8a6   :  { %v4057_v30 = vadd.f32 %v755_v29, %v4602_v28  ;;  %v3541_v31 = vpop.f32.mrb[9].mxu1 }
 0x8a7   :  { %v758_v32 = vpop.f32.mrb[10].mxu1 }
 0x8a8   :  { %v762_v36 = vmul.f32 %v4057_v30, %v4442_v25  ;;  %v3542_v44 = vpop.f32.mrb[11].mxu1 }
 0x8aa   :  { %4136 = vtanh.f32 %v762_v36 }
 0x8b4   :  { %v4137_v50 = vpop.eup %4136 }
 0x8b5   :  { %v764_v51 = vmul.f32 %v4137_v50, %v4448_v34 }
 0x8b7   :  { %v765_v52 = vadd.f32 %v764_v51, %v4451_v35 }
 0x8b9   :  { %768 = vrot.lane.b32.xlu0 %v765_v52, %s4317_s0  ;;  %v766_v21 = vmul.f32 %v765_v52, %v4458_v45 }
 0x92b   :  { %v769_v19 = vpop.permute.xlu0 %768 }
 0x92c   :  { %v771_v53 = vmul.f32 %v769_v19, %v765_v52 }
 0x92e   :  { %773 = vrot.lane.b32.xlu1 %v771_v53, %s4321_s2 }
 0x9a0   :  { %v774_v58 = vpop.permute.xlu1 %773 }
 0x9a1   :  { %v4611_v61 = vadd.f32 %v774_v58, %v766_v21 }
 0x9a3   :  { %4138 = vtanh.f32 %v4611_v61 }
 0x9ad   :  { %v4139_v63 = vpop.eup %4138 }
 0x9ae   :  { %779 = vrot.lane.b32.xlu1 %v4139_v63, %s4317_s0 }
 0xa20   :  { %v780_v4 = vpop.permute.xlu1 %779 }
 0xa21   :  { %v782_v5 = vmul.f32 %v780_v4, %v765_v52 }
 0xa23   :  { %v783_v7 = vpack.c.bf16 %v782_v5, %v782_v5 }
 0xa25   :  { %785 = vrot.lane.b32.xlu0 %v783_v7, %s4321_s2 }
 0xa97   :  { %v786_v12 = vpop.permute.xlu0 %785 }
 0xa98   :  { %3548 = vmatmul.mubr.msk.bf16.vlgmr.msra.gmra.mrb[12].mxu0 %vm312_vm2, %v786_v12  ;;  %v788_v45 = vsel %vm312_vm2, %v786_v12, 0  ;;  %v927_v13 = vsel %vm469_vm3, %v786_v12, 0 }
 0xa99   :  { %3552 = vmatpush3.bf16.msra.mxu0 %v4479_v54  ;;  %3555 = vmatprep.mubr.msk.bf16.mxu0 %vm4320_vm0, %v4319_v0 }
 0xa9a   :  { %3553 = vmatprep.subr.bf16.mxu0 %v4319_v0 }
 0xa9d   :  { %3554 = vmatpush3.bf16.msra.mxu0 %v4484_v56 }
 0xa9e   :  { %3559 = vmatprep.subr.bf16.mxu0 %v4319_v0 }
 0xaa0   :  { %3556 = vmatmul.mubr.msk.bf16.vlgmr.msra.gmra.mrb[16].mxu0 %vm312_vm2, %v786_v12 }
 0xaa1   :  { %3561 = vmatprep.mubr.msk.bf16.mxu0 %vm4320_vm0, %v4319_v0 }
 0xaa6   :  { %3560 = vmatpush3.bf16.xpose.msra.mxu0 %v788_v45 }
 0xaa7   :  { %3565 = vmatprep.subr.bf16.mxu0 %v4319_v0 }
 0xaad   :  { %3562 = vmatmul.mubr.msk.bf16.vlgmr.msra.gmra.mrb[20].mxu0 %vm312_vm2, %v786_v12 }
 0xaae   :  { %3566 = vmatpush3.bf16.msra.mxu0 %v927_v13  ;;  %3567 = vmatprep.mubr.msk.bf16.mxu0 %vm4320_vm0, %v4319_v0 }
 0xaaf   :  { %3571 = vmatprep.subr.bf16.mxu0 %v4319_v0 }
 0xb6b   :  { %v824_v14 = vpop.f32.mrb[12].mxu0 }
 0xb6c   :  { %v825_v62 = vadd.f32 %v824_v14, %v4505_v60  ;;  %v3549_v17 = vpop.f32.mrb[13].mxu0 }
 0xb6d   :  { %v827_v18 = vpop.f32.mrb[14].mxu0 }
 0xb6e   :  { %831 = vst [vmem:[#allocation8 + $0x8] sm:$0xff] %v825_v62  ;;  %v3550_v20 = vpop.f32.mrb[15].mxu0 }
 0xb80   :  { %v906_v22 = vpop.f32.mrb[20].mxu0 }
 0xb81   :  { %v907_v23 = vadd.f32 %v906_v22, %v4510_v15  ;;  %v3563_v24 = vpop.f32.mrb[21].mxu0 }
 0xb82   :  { %v909_v26 = vpop.f32.mrb[22].mxu0 }
 0xb83   :  { %v3564_v27 = vpop.f32.mrb[23].mxu0  ;;  %v912_v29 = vsel %vm453_vm4, %v907_v23, -inf }
 0xb84   :  { %913 = vmax.xlane.f32.xlu1 %v912_v29 }
 0xc11   :  { %v914_v30 = vpop.xlane.xlu1 %913 }
 0xc12   :  { %v915_v31 = vsub.f32 %v907_v23, %v914_v30 }
 0xc14   :  { %v916_v32 = vmul.f32 1.442695, %v915_v31 }
 0xc16   :  { %4140 = vpow2.f32 %v916_v32 }
 0xc20   :  { %v4141_v36 = vpop.eup %4140 }
 0xc21   :  { %v918_v44 = vsel %vm453_vm4, %v4141_v36, 0.0 }
 0xc22   :  { %919 = vadd.xlane.f32.xlu0 %v918_v44 }
 0xcaf   :  { %v920_v50 = vpop.xlane.xlu0 %919 }
 0xcb0   :  { %4142 = vrcp.f32 %v920_v50 }
 0xcba   :  { %v4143_v51 = vpop.eup %4142 }
 0xcbb   :  { %v922_v52 = vmul.f32 %v4143_v51, %v4141_v36 }
 0xcbd   :  { %v923_v19 = vpack.c.bf16 %v922_v52, %v922_v52 }
 0xcbf   :  { %3568 = vmatmul.mubr.msk.bf16.vlgmr.msra.gmra.mrb[24].mxu0 %vm453_vm4, %v923_v19 }
 0xcc0   :  { %3572 = vmatpush3.bf16.msra.mxu0 %v4515_v33  ;;  %3575 = vmatprep.mubr.msk.bf16.mxu0 %vm4320_vm0, %v4319_v0 }
 0xcc1   :  { %3573 = vmatprep.subr.bf16.mxu0 %v4319_v0 }
 0xcc4   :  { %3574 = vmatpush3.bf16.msra.mxu0 %v4522_v37 }
 0xcc5   :  { %3579 = vmatprep.subr.bf16.mxu0 %v4319_v0 }
 0xd92   :  { %v963_v53 = vpop.f32.mrb[24].mxu0 }
 0xd93   :  { %v969_v21 = vpack.c.bf16 %v963_v53, %v963_v53  ;;  %v3569_v58 = vpop.f32.mrb[25].mxu0 }
 0xd94   :  { %v966_v63 = vpop.f32.mrb[26].mxu0 }
 0xd95   :  { %v3570_v4 = vpop.f32.mrb[27].mxu0  ;;  %3576 = vmatmul.mubr.msk.bf16.vlgmr.msra.gmra.mrb[28].mxu0 %vm312_vm2, %v969_v21 }
 0xd96   :  { %3580 = vmatpush3.bf16.msra.mxu0 %v4463_v47  ;;  %3583 = vmatprep.mubr.msk.bf16.mxu0 %vm4320_vm0, %v4319_v0 }
 0xd97   :  { %3581 = vmatprep.subr.bf16.mxu0 %v4319_v0 }
 0xd9a   :  { %3582 = vmatpush3.bf16.msra.mxu0 %v4469_v49 }
 0xd9b   :  { %3587 = vmatprep.subr.bf16.mxu0 %v4319_v0 }
 0xd9d   :  { %3584 = vmatmul.mubr.msk.bf16.vlgmr.msra.gmra.mrb[32].mxu0 %vm312_vm2, %v786_v12 }
 0xd9e   :  { %3588 = vmatpush3.bf16.msra.mxu0 %v4526_v38  ;;  %3603 = vmatprep.mubr.msk.bf16.mxu0 %vm4320_vm0, %v4319_v0 }
 0xd9f   :  { %3589 = vmatprep.subr.bf16.mxu0 %v4319_v0 }
 0xda2   :  { %3590 = vmatpush3.bf16.msra.mxu0 %v4529_v39 }
 0xda3   :  { %3591 = vmatprep.subr.bf16.mxu0 %v4319_v0 }
 0xda6   :  { %3592 = vmatpush3.bf16.msra.mxu0 %v4533_v40 }
 0xda7   :  { %3593 = vmatprep.subr.bf16.mxu0 %v4319_v0 }
 0xdaa   :  { %3594 = vmatpush3.bf16.msra.mxu0 %v4537_v41 }
 0xdab   :  { %3595 = vmatprep.subr.bf16.mxu0 %v4319_v0 }
 0xdae   :  { %3596 = vmatpush3.bf16.msra.mxu0 %v4541_v42 }
 0xdaf   :  { %3597 = vmatprep.subr.bf16.mxu0 %v4319_v0 }
 0xdb2   :  { %3598 = vmatpush3.bf16.msra.mxu0 %v4545_v43 }
 0xdb3   :  { %3599 = vmatprep.subr.bf16.mxu0 %v4319_v0 }
 0xdb6   :  { %3600 = vmatpush3.bf16.msra.mxu0 %v4569_v55 }
 0xdb7   :  { %3601 = vmatprep.subr.bf16.mxu0 %v4319_v0 }
 0xdba   :  { %3602 = vmatpush3.bf16.msra.mxu0 %v4573_v57 }
 0xdbb   :  { %3607 = vmatprep.subr.bf16.mxu0 %v4319_v0 }
 0xe68   :  { %v1007_v5 = vpop.f32.mrb[28].mxu0 }
 0xe69   :  { %v3577_v7 = vpop.f32.mrb[29].mxu0 }
 0xe6a   :  { %v1010_v12 = vpop.f32.mrb[30].mxu0 }
 0xe6b   :  { %v3578_v45 = vpop.f32.mrb[31].mxu0 }
 0xe70   :  { %v1047_v13 = vpop.f32.mrb[32].mxu0 }
 0xe71   :  { %v1048_v14 = vadd.f32 %v1047_v13, %v1007_v5  ;;  %v3585_v62 = vpop.f32.mrb[33].mxu0 }
 0xe72   :  { %v1050_v17 = vpop.f32.mrb[34].mxu0 }
 0xe73   :  { %v1053_v18 = vadd.f32 %v1048_v14, %v4579_v59  ;;  %v3586_v20 = vpop.f32.mrb[35].mxu0 }
 0xe75   :  { %v1054_v22 = vmax.f32 %v1053_v18, 0.0 }
 0xe77   :  { %v1055_v23 = vpack.c.bf16 %v1054_v22, %v1054_v22 }
 0xe79   :  { %3604 = vmatmul.mubr.bf16.vlgmr.msra.gmra.mrb[36].mxu0 %v1055_v23 }
 0xe7a   :  { %3608 = vmatpush3.bf16.msra.mxu0 %v4397_v1  ;;  %3623 = vmatprep.mubr.msk.bf16.mxu0 %vm4320_vm0, %v4319_v0 }
 0xe7b   :  { %3609 = vmatprep.subr.bf16.mxu0 %v4319_v0 }
 0xe7e   :  { %3610 = vmatpush3.bf16.msra.mxu0 %v4400_v2 }
 0xe7f   :  { %3611 = vmatprep.subr.bf16.mxu0 %v4319_v0 }
 0xe82   :  { %3612 = vmatpush3.bf16.msra.mxu0 %v4403_v3 }
 0xe83   :  { %3613 = vmatprep.subr.bf16.mxu0 %v4319_v0 }
 0xe86   :  { %3614 = vmatpush3.bf16.msra.mxu0 %v4407_v6 }
 0xe87   :  { %3615 = vmatprep.subr.bf16.mxu0 %v4319_v0 }
 0xe8a   :  { %3616 = vmatpush3.bf16.msra.mxu0 %v4412_v8 }
 0xe8b   :  { %3617 = vmatprep.subr.bf16.mxu0 %v4319_v0 }
 0xe8e   :  { %3618 = vmatpush3.bf16.msra.mxu0 %v4418_v9 }
 0xe8f   :  { %3619 = vmatprep.subr.bf16.mxu0 %v4319_v0 }
 0xe92   :  { %3620 = vmatpush3.bf16.msra.mxu0 %v4423_v10 }
 0xe93   :  { %3621 = vmatprep.subr.bf16.mxu0 %v4319_v0 }
 0xe96   :  { %3622 = vmatpush3.bf16.msra.mxu0 %v4427_v11 }
 0xe97   :  { %3711 = vmatprep.subr.bf16.mxu0 %v4319_v0 }
 0xf4c   :  { %v1090_v1 = vpop.f32.mrb[36].mxu0 }
 0xf4d   :  { %v1091_v2 = vadd.f32 %v1090_v1, %v4591_v16  ;;  %v3605_v3 = vpop.f32.mrb[37].mxu0 }
 0xf4e   :  { %v1093_v6 = vpop.f32.mrb[38].mxu0 }
 0xf4f   :  { %v1096_v8 = vmax.f32 %v1091_v2, 0.0  ;;  %v3606_v24 = vpop.f32.mrb[39].mxu0 }
 0xf51   :  { %v1097_v26 = vpack.c.bf16 %v1096_v8, %v1096_v8 }
 0xf53   :  { %3624 = vmatmul.mubr.bf16.vlgmr.msra.gmra.mrb[16].mxu0 %v1097_v26 }
 0xf54   :  { %3712 = vmatpush3.bf16.msra.mxu0 %v4461_v46  ;;  %3715 = vmatprep.mubr.msk.bf16.mxu0 %vm4320_vm0, %v4319_v0 }
 0xf55   :  { %3713 = vmatprep.subr.bf16.mxu0 %v4319_v0 }
 0xf58   :  { %3714 = vmatpush3.bf16.msra.mxu0 %v4467_v48 }
 0xf59   :  { %3719 = vmatprep.subr.bf16.mxu0 %v4319_v0 }
0x1026   :  { %v1132_v27 = vpop.f32.mrb[16].mxu0 }
0x1027   :  { %v4058_v29 = vadd.f32 %v1132_v27, %v4602_v28  ;;  %v3625_v30 = vpop.f32.mrb[17].mxu0 }
0x1028   :  { %v1135_v31 = vpop.f32.mrb[18].mxu0 }
0x1029   :  { %v1139_v32 = vmul.f32 %v4058_v29, %v4442_v25  ;;  %v3626_v36 = vpop.f32.mrb[19].mxu0 }
0x102b   :  { %4144 = vtanh.f32 %v1139_v32 }
0x1035   :  { %v4145_v44 = vpop.eup %4144 }
0x1036   :  { %v1141_v50 = vmul.f32 %v4145_v44, %v4448_v34 }
0x1038   :  { %v1142_v51 = vadd.f32 %v1141_v50, %v4451_v35 }
0x103a   :  { %1145 = vrot.lane.b32.xlu0 %v1142_v51, %s4317_s0  ;;  %v1143_v53 = vmul.f32 %v1142_v51, %v4611_v61 }
0x10ac   :  { %v1146_v52 = vpop.permute.xlu0 %1145 }
0x10ad   :  { %v1148_v19 = vmul.f32 %v1146_v52, %v1142_v51 }
0x10af   :  { %1150 = vrot.lane.b32.xlu1 %v1148_v19, %s4321_s2 }
0x1121   :  { %v1151_v21 = vpop.permute.xlu1 %1150 }
0x1122   :  { %v4703_v58 = vadd.f32 %v1151_v21, %v1143_v53 }
0x1124   :  { %4146 = vtanh.f32 %v4703_v58 }
0x112e   :  { %v4147_v63 = vpop.eup %4146 }
0x112f   :  { %1156 = vrot.lane.b32.xlu1 %v4147_v63, %s4317_s0 }
0x11a1   :  { %v1157_v4 = vpop.permute.xlu1 %1156 }
0x11a2   :  { %v1159_v5 = vmul.f32 %v1157_v4, %v1142_v51 }
0x11a4   :  { %v1160_v7 = vpack.c.bf16 %v1159_v5, %v1159_v5 }
0x11a6   :  { %1162 = vrot.lane.b32.xlu0 %v1160_v7, %s4321_s2 }
0x1218   :  { %v1163_v12 = vpop.permute.xlu0 %1162 }
0x1219   :  { %3632 = vmatmul.mubr.msk.bf16.vlgmr.msra.gmra.mrb[24].mxu1 %vm312_vm2, %v1163_v12  ;;  %v1165_v61 = vsel %vm312_vm2, %v1163_v12, 0  ;;  %v1304_v45 = vsel %vm469_vm3, %v1163_v12, 0 }
0x121a   :  { %3636 = vmatpush3.bf16.msra.mxu1 %v4479_v54  ;;  %3639 = vmatprep.mubr.msk.bf16.mxu1 %vm4320_vm0, %v4319_v0 }
0x121b   :  { %3637 = vmatprep.subr.bf16.mxu1 %v4319_v0 }
0x121e   :  { %3638 = vmatpush3.bf16.msra.mxu1 %v4484_v56 }
0x121f   :  { %3643 = vmatprep.subr.bf16.mxu1 %v4319_v0 }
0x1221   :  { %3640 = vmatmul.mubr.msk.bf16.vlgmr.msra.gmra.mrb[28].mxu1 %vm312_vm2, %v1163_v12 }
0x1222   :  { %3645 = vmatprep.mubr.msk.bf16.mxu1 %vm4320_vm0, %v4319_v0 }
0x1227   :  { %3644 = vmatpush3.bf16.xpose.msra.mxu1 %v1165_v61 }
0x1228   :  { %3649 = vmatprep.subr.bf16.mxu1 %v4319_v0 }
0x122e   :  { %3646 = vmatmul.mubr.msk.bf16.vlgmr.msra.gmra.mrb[32].mxu1 %vm312_vm2, %v1163_v12 }
0x122f   :  { %3650 = vmatpush3.bf16.msra.mxu1 %v1304_v45  ;;  %3651 = vmatprep.mubr.msk.bf16.mxu1 %vm4320_vm0, %v4319_v0 }
0x1230   :  { %3655 = vmatprep.subr.bf16.mxu1 %v4319_v0 }
0x12ec   :  { %v1201_v13 = vpop.f32.mrb[24].mxu1 }
0x12ed   :  { %v1202_v14 = vadd.f32 %v1201_v13, %v4505_v60  ;;  %v3633_v62 = vpop.f32.mrb[25].mxu1  ;;  %v4763_v13 = vld [vmem:[#allocation7] sm:$0xff]  }
0x12ee   :  { %v1204_v17 = vpop.f32.mrb[26].mxu1  ;;  %v4773_v62 = vld [vmem:[#allocation7 + $0x10] sm:$0xff]  }
0x12ef   :  { %1208 = vst [vmem:[#allocation8 + $0x10] sm:$0xff] %v1202_v14  ;;  %v3634_v18 = vpop.f32.mrb[27].mxu1  ;;  %v4769_v14 = vld [vmem:[#allocation7 + $0x8] sm:$0xff]   ;;  %v4777_v17 = vld [vmem:[#allocation7 + $0x18] sm:$0xff]  }
0x12f0   :  { %v4781_v18 = vld [vmem:[#allocation7 + $0x20] sm:$0xff]  }
0x1301   :  { %v1283_v20 = vpop.f32.mrb[32].mxu1 }
0x1302   :  { %v1284_v22 = vadd.f32 %v1283_v20, %v4510_v15  ;;  %v3647_v23 = vpop.f32.mrb[33].mxu1 }
0x1303   :  { %v1286_v1 = vpop.f32.mrb[34].mxu1 }
0x1304   :  { %v3648_v2 = vpop.f32.mrb[35].mxu1  ;;  %v1289_v3 = vsel %vm453_vm4, %v1284_v22, -inf }
0x1305   :  { %1290 = vmax.xlane.f32.xlu1 %v1289_v3 }
0x1392   :  { %v1291_v6 = vpop.xlane.xlu1 %1290 }
0x1393   :  { %v1292_v8 = vsub.f32 %v1284_v22, %v1291_v6 }
0x1395   :  { %v1293_v24 = vmul.f32 1.442695, %v1292_v8 }
0x1397   :  { %4148 = vpow2.f32 %v1293_v24 }
0x13a1   :  { %v4149_v26 = vpop.eup %4148 }
0x13a2   :  { %v1295_v27 = vsel %vm453_vm4, %v4149_v26, 0.0 }
0x13a3   :  { %1296 = vadd.xlane.f32.xlu0 %v1295_v27 }
0x1430   :  { %v1297_v29 = vpop.xlane.xlu0 %1296 }
0x1431   :  { %4150 = vrcp.f32 %v1297_v29 }
0x143b   :  { %v4151_v30 = vpop.eup %4150 }
0x143c   :  { %v1299_v31 = vmul.f32 %v4151_v30, %v4149_v26 }
0x143e   :  { %v1300_v32 = vpack.c.bf16 %v1299_v31, %v1299_v31 }
0x1440   :  { %3652 = vmatmul.mubr.msk.bf16.vlgmr.msra.gmra.mrb[36].mxu1 %vm453_vm4, %v1300_v32 }
0x1441   :  { %3656 = vmatpush3.bf16.msra.mxu1 %v4515_v33  ;;  %3659 = vmatprep.mubr.msk.bf16.mxu1 %vm4320_vm0, %v4319_v0 }
0x1442   :  { %3657 = vmatprep.subr.bf16.mxu1 %v4319_v0 }
0x1445   :  { %3658 = vmatpush3.bf16.msra.mxu1 %v4522_v37 }
0x1446   :  { %3663 = vmatprep.subr.bf16.mxu1 %v4319_v0 }
0x1513   :  { %v1340_v36 = vpop.f32.mrb[36].mxu1 }
0x1514   :  { %v1346_v44 = vpack.c.bf16 %v1340_v36, %v1340_v36  ;;  %v3653_v50 = vpop.f32.mrb[37].mxu1 }
0x1515   :  { %v1343_v51 = vpop.f32.mrb[38].mxu1 }
0x1516   :  { %v3654_v52 = vpop.f32.mrb[39].mxu1  ;;  %3660 = vmatmul.mubr.msk.bf16.vlgmr.msra.gmra.mrb[40].mxu1 %vm312_vm2, %v1346_v44 }
0x1517   :  { %3664 = vmatpush3.bf16.msra.mxu1 %v4463_v47  ;;  %3667 = vmatprep.mubr.msk.bf16.mxu1 %vm4320_vm0, %v4319_v0 }
0x1518   :  { %3665 = vmatprep.subr.bf16.mxu1 %v4319_v0 }
0x151b   :  { %3666 = vmatpush3.bf16.msra.mxu1 %v4469_v49 }
0x151c   :  { %3671 = vmatprep.subr.bf16.mxu1 %v4319_v0 }
0x151e   :  { %3668 = vmatmul.mubr.msk.bf16.vlgmr.msra.gmra.mrb[44].mxu1 %vm312_vm2, %v1163_v12 }
0x151f   :  { %3672 = vmatpush3.bf16.msra.mxu1 %v4526_v38  ;;  %3687 = vmatprep.mubr.msk.bf16.mxu1 %vm4320_vm0, %v4319_v0 }
0x1520   :  { %3673 = vmatprep.subr.bf16.mxu1 %v4319_v0 }
0x1523   :  { %3674 = vmatpush3.bf16.msra.mxu1 %v4529_v39 }
0x1524   :  { %3675 = vmatprep.subr.bf16.mxu1 %v4319_v0 }
0x1527   :  { %3676 = vmatpush3.bf16.msra.mxu1 %v4533_v40 }
0x1528   :  { %3677 = vmatprep.subr.bf16.mxu1 %v4319_v0 }
0x152b   :  { %3678 = vmatpush3.bf16.msra.mxu1 %v4537_v41 }
0x152c   :  { %3679 = vmatprep.subr.bf16.mxu1 %v4319_v0 }
0x152f   :  { %3680 = vmatpush3.bf16.msra.mxu1 %v4541_v42 }
0x1530   :  { %3681 = vmatprep.subr.bf16.mxu1 %v4319_v0 }
0x1533   :  { %3682 = vmatpush3.bf16.msra.mxu1 %v4545_v43 }
0x1534   :  { %3683 = vmatprep.subr.bf16.mxu1 %v4319_v0 }
0x1537   :  { %3684 = vmatpush3.bf16.msra.mxu1 %v4569_v55 }
0x1538   :  { %3685 = vmatprep.subr.bf16.mxu1 %v4319_v0 }
0x153b   :  { %3686 = vmatpush3.bf16.msra.mxu1 %v4573_v57 }
0x153c   :  { %3691 = vmatprep.subr.bf16.mxu1 %v4319_v0 }
0x15e9   :  { %v1384_v47 = vpop.f32.mrb[40].mxu1 }
0x15ea   :  { %v3661_v49 = vpop.f32.mrb[41].mxu1 }
0x15eb   :  { %v1387_v19 = vpop.f32.mrb[42].mxu1 }
0x15ec   :  { %v3662_v53 = vpop.f32.mrb[43].mxu1 }
0x15f1   :  { %v1424_v21 = vpop.f32.mrb[44].mxu1 }
0x15f2   :  { %v1425_v63 = vadd.f32 %v1424_v21, %v1384_v47  ;;  %v3669_v4 = vpop.f32.mrb[45].mxu1 }
0x15f3   :  { %v1427_v5 = vpop.f32.mrb[46].mxu1 }
0x15f4   :  { %v1430_v7 = vadd.f32 %v1425_v63, %v4579_v59  ;;  %v3670_v12 = vpop.f32.mrb[47].mxu1 }
0x15f6   :  { %v1431_v61 = vmax.f32 %v1430_v7, 0.0 }
0x15f8   :  { %v1432_v45 = vpack.c.bf16 %v1431_v61, %v1431_v61 }
0x15fa   :  { %3688 = vmatmul.mubr.bf16.vlgmr.msra.gmra.mrb[48].mxu1 %v1432_v45 }
0x15fb   :  { %3692 = vmatpush3.bf16.msra.mxu1 %v4763_v13  ;;  %3707 = vmatprep.mubr.msk.bf16.mxu1 %vm4320_vm0, %v4319_v0 }
0x15fc   :  { %3693 = vmatprep.subr.bf16.mxu1 %v4319_v0 }
0x15ff   :  { %3694 = vmatpush3.bf16.msra.mxu1 %v4769_v14 }
0x1600   :  { %3695 = vmatprep.subr.bf16.mxu1 %v4319_v0 }
0x1603   :  { %3696 = vmatpush3.bf16.msra.mxu1 %v4773_v62 }
0x1604   :  { %3697 = vmatprep.subr.bf16.mxu1 %v4319_v0 }
0x1607   :  { %3698 = vmatpush3.bf16.msra.mxu1 %v4777_v17 }
0x1608   :  { %3699 = vmatprep.subr.bf16.mxu1 %v4319_v0 }
0x160b   :  { %3700 = vmatpush3.bf16.msra.mxu1 %v4781_v18 }
0x160c   :  { %3701 = vmatprep.subr.bf16.mxu1 %v4319_v0 }
0x160f   :  { %3702 = vmatpush3.bf16.msra.mxu1 %v4418_v9 }
0x1610   :  { %3703 = vmatprep.subr.bf16.mxu1 %v4319_v0 }
0x1613   :  { %3704 = vmatpush3.bf16.msra.mxu1 %v4423_v10 }
0x1614   :  { %3705 = vmatprep.subr.bf16.mxu1 %v4319_v0 }
0x1617   :  { %3706 = vmatpush3.bf16.msra.mxu1 %v4427_v11 }
0x1618   :  { %3795 = vmatprep.subr.bf16.mxu1 %v4319_v0 }
0x16cd   :  { %v1467_v20 = vpop.f32.mrb[48].mxu1 }
0x16ce   :  { %v1468_v22 = vadd.f32 %v1467_v20, %v4591_v16  ;;  %v3689_v23 = vpop.f32.mrb[49].mxu1 }
0x16cf   :  { %v1470_v1 = vpop.f32.mrb[50].mxu1 }
0x16d0   :  { %v1473_v2 = vmax.f32 %v1468_v22, 0.0  ;;  %v3690_v3 = vpop.f32.mrb[51].mxu1 }
0x16d2   :  { %v1474_v6 = vpack.c.bf16 %v1473_v2, %v1473_v2 }
0x16d4   :  { %3708 = vmatmul.mubr.bf16.vlgmr.msra.gmra.mrb[28].mxu1 %v1474_v6 }
0x16d5   :  { %3796 = vmatpush3.bf16.msra.mxu1 %v4461_v46  ;;  %3799 = vmatprep.mubr.msk.bf16.mxu1 %vm4320_vm0, %v4319_v0 }
0x16d6   :  { %3797 = vmatprep.subr.bf16.mxu1 %v4319_v0 }
0x16d9   :  { %3798 = vmatpush3.bf16.msra.mxu1 %v4467_v48 }
0x16da   :  { %3803 = vmatprep.subr.bf16.mxu1 %v4319_v0 }
0x17a7   :  { %v1509_v9 = vpop.f32.mrb[28].mxu1 }
0x17a8   :  { %v4059_v10 = vadd.f32 %v1509_v9, %v4602_v28  ;;  %v3709_v11 = vpop.f32.mrb[29].mxu1 }
0x17a9   :  { %v1512_v8 = vpop.f32.mrb[30].mxu1 }
0x17aa   :  { %v1516_v24 = vmul.f32 %v4059_v10, %v4442_v25  ;;  %v3710_v26 = vpop.f32.mrb[31].mxu1 }
0x17ab   :  { %v4839_v26 = vld [vmem:[#allocation7 + $0x60] sm:$0xff]  }
0x17ac   :  { %4152 = vtanh.f32 %v1516_v24 }
0x17b6   :  { %v4153_v27 = vpop.eup %4152 }
0x17b7   :  { %v1518_v46 = vmul.f32 %v4153_v27, %v4448_v34 }
0x17b9   :  { %v1519_v29 = vadd.f32 %v1518_v46, %v4451_v35 }
0x17bb   :  { %1522 = vrot.lane.b32.xlu0 %v1519_v29, %s4317_s0  ;;  %v1520_v31 = vmul.f32 %v1519_v29, %v4703_v58 }
0x182d   :  { %v1523_v30 = vpop.permute.xlu0 %1522 }
0x182e   :  { %v1525_v48 = vmul.f32 %v1523_v30, %v1519_v29 }
0x1830   :  { %1527 = vrot.lane.b32.xlu1 %v1525_v48, %s4321_s2 }
0x18a2   :  { %v1528_v32 = vpop.permute.xlu1 %1527 }
0x18a3   :  { %v4805_v36 = vadd.f32 %v1528_v32, %v1520_v31  ;;  %v4889_v31 = vld [vmem:[#allocation7 + $0x38] sm:$0xff]  }
0x18a5   :  { %4154 = vtanh.f32 %v4805_v36 }
0x18af   :  { %v4155_v44 = vpop.eup %4154 }
0x18b0   :  { %1533 = vrot.lane.b32.xlu1 %v4155_v44, %s4317_s0 }
0x1922   :  { %v1534_v50 = vpop.permute.xlu1 %1533 }
0x1923   :  { %v1536_v51 = vmul.f32 %v1534_v50, %v1519_v29 }
0x1925   :  { %v1537_v52 = vpack.c.bf16 %v1536_v51, %v1536_v51 }
0x1927   :  { %1539 = vrot.lane.b32.xlu0 %v1537_v52, %s4321_s2 }
0x1999   :  { %v1540_v47 = vpop.permute.xlu0 %1539 }
0x199a   :  { %3716 = vmatmul.mubr.msk.bf16.vlgmr.msra.gmra.mrb[40].mxu0 %vm312_vm2, %v1540_v47  ;;  %v1542_v58 = vsel %vm312_vm2, %v1540_v47, 0 }
0x199b   :  { %3720 = vmatpush3.bf16.msra.mxu0 %v4479_v54  ;;  %3723 = vmatprep.mubr.msk.bf16.mxu0 %vm4320_vm0, %v4319_v0  ;;  %v1681_v54 = vsel %vm469_vm3, %v1540_v47, 0 }
0x199c   :  { %3721 = vmatprep.subr.bf16.mxu0 %v4319_v0 }
0x199f   :  { %3722 = vmatpush3.bf16.msra.mxu0 %v4484_v56 }
0x19a0   :  { %3727 = vmatprep.subr.bf16.mxu0 %v4319_v0 }
0x19a2   :  { %3724 = vmatmul.mubr.msk.bf16.vlgmr.msra.gmra.mrb[44].mxu0 %vm312_vm2, %v1540_v47 }
0x19a3   :  { %3729 = vmatprep.mubr.msk.bf16.mxu0 %vm4320_vm0, %v4319_v0 }
0x19a8   :  { %3728 = vmatpush3.bf16.xpose.msra.mxu0 %v1542_v58 }
0x19a9   :  { %3733 = vmatprep.subr.bf16.mxu0 %v4319_v0 }
0x19af   :  { %3730 = vmatmul.mubr.msk.bf16.vlgmr.msra.gmra.mrb[48].mxu0 %vm312_vm2, %v1540_v47 }
0x19b0   :  { %3734 = vmatpush3.bf16.msra.mxu0 %v1681_v54  ;;  %3735 = vmatprep.mubr.msk.bf16.mxu0 %vm4320_vm0, %v4319_v0  ;;  %v4894_v54 = vld [vmem:[#allocation7 + $0x50] sm:$0xff]  }
0x19b1   :  { %3739 = vmatprep.subr.bf16.mxu0 %v4319_v0 }
0x1a6d   :  { %v1578_v56 = vpop.f32.mrb[40].mxu0 }
0x1a6e   :  { %v1579_v49 = vadd.f32 %v1578_v56, %v4505_v60  ;;  %v3717_v19 = vpop.f32.mrb[41].mxu0  ;;  %v4900_v56 = vld [vmem:[#allocation7 + $0x58] sm:$0xff]  }
0x1a6f   :  { %v1581_v53 = vpop.f32.mrb[42].mxu0 }
0x1a70   :  { %1585 = vst [vmem:[#allocation8 + $0x18] sm:$0xff] %v1579_v49  ;;  %v3718_v21 = vpop.f32.mrb[43].mxu0 }
0x1a82   :  { %v1660_v63 = vpop.f32.mrb[48].mxu0 }
0x1a83   :  { %v1661_v4 = vadd.f32 %v1660_v63, %v4510_v15  ;;  %v3731_v5 = vpop.f32.mrb[49].mxu0 }
0x1a84   :  { %v1663_v7 = vpop.f32.mrb[50].mxu0 }
0x1a85   :  { %v3732_v12 = vpop.f32.mrb[51].mxu0  ;;  %v1666_v61 = vsel %vm453_vm4, %v1661_v4, -inf }
0x1a86   :  { %1667 = vmax.xlane.f32.xlu1 %v1666_v61 }
0x1b13   :  { %v1668_v45 = vpop.xlane.xlu1 %1667 }
0x1b14   :  { %v1669_v20 = vsub.f32 %v1661_v4, %v1668_v45 }
0x1b16   :  { %v1670_v22 = vmul.f32 1.442695, %v1669_v20 }
0x1b18   :  { %4156 = vpow2.f32 %v1670_v22 }
0x1b22   :  { %v4157_v23 = vpop.eup %4156 }
0x1b23   :  { %v1672_v1 = vsel %vm453_vm4, %v4157_v23, 0.0 }
0x1b24   :  { %1673 = vadd.xlane.f32.xlu0 %v1672_v1 }
0x1bb1   :  { %v1674_v2 = vpop.xlane.xlu0 %1673 }
0x1bb2   :  { %4158 = vrcp.f32 %v1674_v2 }
0x1bbc   :  { %v4159_v3 = vpop.eup %4158 }
0x1bbd   :  { %v1676_v6 = vmul.f32 %v4159_v3, %v4157_v23 }
0x1bbf   :  { %v1677_v9 = vpack.c.bf16 %v1676_v6, %v1676_v6 }
0x1bc1   :  { %3736 = vmatmul.mubr.msk.bf16.vlgmr.msra.gmra.mrb[52].mxu0 %vm453_vm4, %v1677_v9 }
0x1bc2   :  { %3740 = vmatpush3.bf16.msra.mxu0 %v4515_v33  ;;  %3743 = vmatprep.mubr.msk.bf16.mxu0 %vm4320_vm0, %v4319_v0  ;;  %v4845_v33 = vld [vmem:[#allocation7 + $0x68] sm:$0xff]  }
0x1bc3   :  { %3741 = vmatprep.subr.bf16.mxu0 %v4319_v0 }
0x1bc6   :  { %3742 = vmatpush3.bf16.msra.mxu0 %v4522_v37 }
0x1bc7   :  { %3747 = vmatprep.subr.bf16.mxu0 %v4319_v0 }
0x1c94   :  { %v1717_v15 = vpop.f32.mrb[52].mxu0 }
0x1c95   :  { %v1723_v10 = vpack.c.bf16 %v1717_v15, %v1717_v15  ;;  %v3737_v11 = vpop.f32.mrb[53].mxu0  ;;  %v4920_v15 = vld [vmem:[#allocation7 + $0x40] sm:$0xff]  }
0x1c96   :  { %v1720_v8 = vpop.f32.mrb[54].mxu0 }
0x1c97   :  { %v3738_v24 = vpop.f32.mrb[55].mxu0  ;;  %3744 = vmatmul.mubr.msk.bf16.vlgmr.msra.gmra.mrb[56].mxu0 %vm312_vm2, %v1723_v10 }
0x1c98   :  { %3748 = vmatpush3.bf16.msra.mxu0 %v4839_v26  ;;  %3751 = vmatprep.mubr.msk.bf16.mxu0 %vm4320_vm0, %v4319_v0 }
0x1c99   :  { %3749 = vmatprep.subr.bf16.mxu0 %v4319_v0 }
0x1c9c   :  { %3750 = vmatpush3.bf16.msra.mxu0 %v4845_v33 }
0x1c9d   :  { %3755 = vmatprep.subr.bf16.mxu0 %v4319_v0 }
0x1c9f   :  { %3752 = vmatmul.mubr.msk.bf16.vlgmr.msra.gmra.mrb[60].mxu0 %vm312_vm2, %v1540_v47 }
0x1ca0   :  { %3756 = vmatpush3.bf16.msra.mxu0 %v4526_v38  ;;  %3771 = vmatprep.mubr.msk.bf16.mxu0 %vm4320_vm0, %v4319_v0 }
0x1ca1   :  { %3757 = vmatprep.subr.bf16.mxu0 %v4319_v0 }
0x1ca4   :  { %3758 = vmatpush3.bf16.msra.mxu0 %v4529_v39 }
0x1ca5   :  { %3759 = vmatprep.subr.bf16.mxu0 %v4319_v0 }
0x1ca8   :  { %3760 = vmatpush3.bf16.msra.mxu0 %v4533_v40 }
0x1ca9   :  { %3761 = vmatprep.subr.bf16.mxu0 %v4319_v0 }
0x1cac   :  { %3762 = vmatpush3.bf16.msra.mxu0 %v4537_v41 }
0x1cad   :  { %3763 = vmatprep.subr.bf16.mxu0 %v4319_v0 }
0x1cb0   :  { %3764 = vmatpush3.bf16.msra.mxu0 %v4541_v42 }
0x1cb1   :  { %3765 = vmatprep.subr.bf16.mxu0 %v4319_v0 }
0x1cb4   :  { %3766 = vmatpush3.bf16.msra.mxu0 %v4545_v43 }
0x1cb5   :  { %3767 = vmatprep.subr.bf16.mxu0 %v4319_v0 }
0x1cb8   :  { %3768 = vmatpush3.bf16.msra.mxu0 %v4569_v55  ;;  %v4881_v55 = vld [vmem:[#allocation7 + $0x28] sm:$0xff]  }
0x1cb9   :  { %3769 = vmatprep.subr.bf16.mxu0 %v4319_v0 }
0x1cbc   :  { %3770 = vmatpush3.bf16.msra.mxu0 %v4573_v57  ;;  %v4885_v57 = vld [vmem:[#allocation7 + $0x30] sm:$0xff]  }
0x1cbd   :  { %3775 = vmatprep.subr.bf16.mxu0 %v4319_v0 }
0x1d6a   :  { %v1761_v37 = vpop.f32.mrb[56].mxu0 }
0x1d6b   :  { %v3745_v38 = vpop.f32.mrb[57].mxu0 }
0x1d6c   :  { %v1764_v39 = vpop.f32.mrb[58].mxu0 }
0x1d6d   :  { %v3746_v40 = vpop.f32.mrb[59].mxu0 }
0x1d72   :  { %v1801_v41 = vpop.f32.mrb[60].mxu0 }
0x1d73   :  { %v1802_v42 = vadd.f32 %v1801_v41, %v1761_v37  ;;  %v3753_v27 = vpop.f32.mrb[61].mxu0  ;;  %v4945_v41 = vld [vmem:[#allocation2 + $0x18] sm:$0xff] }
0x1d74   :  { %v1804_v46 = vpop.f32.mrb[62].mxu0 }
0x1d75   :  { %v1807_v43 = vadd.f32 %v1802_v42, %v4579_v59  ;;  %v3754_v29 = vpop.f32.mrb[63].mxu0 }
0x1d77   :  { %v1808_v30 = vmax.f32 %v1807_v43, 0.0 }
0x1d79   :  { %v1809_v48 = vpack.c.bf16 %v1808_v30, %v1808_v30 }
0x1d7b   :  { %3772 = vmatmul.mubr.bf16.vlgmr.msra.gmra.mrb[64].mxu0 %v1809_v48 }
0x1d7c   :  { %3776 = vmatpush3.bf16.msra.mxu0 %v4763_v13  ;;  %3791 = vmatprep.mubr.msk.bf16.mxu0 %vm4320_vm0, %v4319_v0 }
0x1d7d   :  { %3777 = vmatprep.subr.bf16.mxu0 %v4319_v0 }
0x1d80   :  { %3778 = vmatpush3.bf16.msra.mxu0 %v4769_v14 }
0x1d81   :  { %3779 = vmatprep.subr.bf16.mxu0 %v4319_v0 }
0x1d84   :  { %3780 = vmatpush3.bf16.msra.mxu0 %v4773_v62 }
0x1d85   :  { %3781 = vmatprep.subr.bf16.mxu0 %v4319_v0 }
0x1d88   :  { %3782 = vmatpush3.bf16.msra.mxu0 %v4777_v17 }
0x1d89   :  { %3783 = vmatprep.subr.bf16.mxu0 %v4319_v0 }
0x1d8c   :  { %3784 = vmatpush3.bf16.msra.mxu0 %v4781_v18 }
0x1d8d   :  { %3785 = vmatprep.subr.bf16.mxu0 %v4319_v0 }
0x1d90   :  { %3786 = vmatpush3.bf16.msra.mxu0 %v4881_v55 }
0x1d91   :  { %3787 = vmatprep.subr.bf16.mxu0 %v4319_v0 }
0x1d94   :  { %3788 = vmatpush3.bf16.msra.mxu0 %v4885_v57 }
0x1d95   :  { %3789 = vmatprep.subr.bf16.mxu0 %v4319_v0 }
0x1d98   :  { %3790 = vmatpush3.bf16.msra.mxu0 %v4889_v31 }
0x1d99   :  { %3879 = vmatprep.subr.bf16.mxu0 %v4319_v0 }
0x1e4e   :  { %v1844_v32 = vpop.f32.mrb[64].mxu0 }
0x1e4f   :  { %v1845_v44 = vadd.f32 %v1844_v32, %v4591_v16  ;;  %v3773_v50 = vpop.f32.mrb[65].mxu0 }
0x1e50   :  { %v1847_v51 = vpop.f32.mrb[66].mxu0 }
0x1e51   :  { %v1850_v52 = vmax.f32 %v1845_v44, 0.0  ;;  %v3774_v47 = vpop.f32.mrb[67].mxu0 }
0x1e53   :  { %v1851_v58 = vpack.c.bf16 %v1850_v52, %v1850_v52 }
0x1e55   :  { %3792 = vmatmul.mubr.bf16.vlgmr.msra.gmra.mrb[44].mxu0 %v1851_v58 }
0x1e56   :  { %3880 = vmatpush3.bf16.msra.mxu0 %v4894_v54  ;;  %3883 = vmatprep.mubr.msk.bf16.mxu0 %vm4320_vm0, %v4319_v0 }
0x1e57   :  { %3881 = vmatprep.subr.bf16.mxu0 %v4319_v0 }
0x1e5a   :  { %3882 = vmatpush3.bf16.msra.mxu0 %v4900_v56 }
0x1e5b   :  { %3887 = vmatprep.subr.bf16.mxu0 %v4319_v0 }
0x1f28   :  { %v1886_v49 = vpop.f32.mrb[44].mxu0 }
0x1f29   :  { %v4060_v19 = vadd.f32 %v1886_v49, %v4602_v28  ;;  %v3793_v53 = vpop.f32.mrb[45].mxu0  ;;  %v4951_v49 = vld [vmem:[#allocation7 + $0x70] sm:$0xff]  }
0x1f2a   :  { %v1889_v21 = vpop.f32.mrb[46].mxu0 }
0x1f2b   :  { %v1893_v63 = vmul.f32 %v4060_v19, %v4442_v25  ;;  %v3794_v4 = vpop.f32.mrb[47].mxu0  ;;  %v4957_v19 = vld [vmem:[#allocation7 + $0x78] sm:$0xff]  }
0x1f2d   :  { %4160 = vtanh.f32 %v1893_v63 }
0x1f37   :  { %v4161_v5 = vpop.eup %4160 }
0x1f38   :  { %v1895_v7 = vmul.f32 %v4161_v5, %v4448_v34 }
0x1f3a   :  { %v1896_v12 = vadd.f32 %v1895_v7, %v4451_v35  ;;  %v4970_v7 = vld [vmem:[#allocation7 + $0x80] sm:$0xff]  }
0x1f3c   :  { %1899 = vrot.lane.b32.xlu0 %v1896_v12, %s4317_s0  ;;  %v1897_v20 = vmul.f32 %v1896_v12, %v4805_v36  ;;  %v4926_v36 = vld [vmem:[#allocation7 + $0x48] sm:$0xff]  }
0x1fae   :  { %v1900_v61 = vpop.permute.xlu0 %1899 }
0x1faf   :  { %v1902_v45 = vmul.f32 %v1900_v61, %v1896_v12  ;;  %v4980_v61 = vld [vmem:[#allocation7 + $0x90] sm:$0xff]  }
0x1fb1   :  { %1904 = vrot.lane.b32.xlu1 %v1902_v45, %s4321_s2  ;;  %v4984_v45 = vld [vmem:[#allocation7 + $0x98] sm:$0xff]  }
0x2023   :  { %v1905_v22 = vpop.permute.xlu1 %1904 }
0x2024   :  { %v4911_v23 = vadd.f32 %v1905_v22, %v1897_v20  ;;  %v4988_v20 = vld [vmem:[#allocation7 + $0xa0] sm:$0xff]   ;;  %v4992_v22 = vld [vmem:[#allocation7 + $0xa8] sm:$0xff]  }
0x2026   :  { %4162 = vtanh.f32 %v4911_v23 }
0x2030   :  { %v4163_v1 = vpop.eup %4162 }
0x2031   :  { %1910 = vrot.lane.b32.xlu1 %v4163_v1, %s4317_s0  ;;  %v4996_v1 = vld [vmem:[#allocation7 + $0xb0] sm:$0xff]  }
0x20a3   :  { %v1911_v2 = vpop.permute.xlu1 %1910 }
0x20a4   :  { %v1913_v3 = vmul.f32 %v1911_v2, %v1896_v12  ;;  %v4976_v12 = vld [vmem:[#allocation7 + $0x88] sm:$0xff]   ;;  %v5000_v2 = vld [vmem:[#allocation7 + $0xb8] sm:$0xff]  }
0x20a6   :  { %v1914_v6 = vpack.c.bf16 %v1913_v3, %v1913_v3 }
0x20a8   :  { %1916 = vrot.lane.b32.xlu0 %v1914_v6, %s4321_s2 }
0x211a   :  { %v4916_v9 = vpop.permute.xlu0 %1916 }
0x211b   :  { %3800 = vmatmul.mubr.msk.bf16.vlgmr.msra.gmra.mrb[52].mxu1 %vm312_vm2, %v4916_v9  ;;  %v1919_v10 = vsel %vm312_vm2, %v4916_v9, 0  ;;  %v2058_v11 = vsel %vm469_vm3, %v4916_v9, 0 }
0x211c   :  { %3804 = vmatpush3.bf16.msra.mxu1 %v4920_v15  ;;  %3807 = vmatprep.mubr.msk.bf16.mxu1 %vm4320_vm0, %v4319_v0 }
0x211d   :  { %3805 = vmatprep.subr.bf16.mxu1 %v4319_v0 }
0x2120   :  { %3806 = vmatpush3.bf16.msra.mxu1 %v4926_v36 }
0x2121   :  { %3811 = vmatprep.subr.bf16.mxu1 %v4319_v0 }
0x2123   :  { %3808 = vmatmul.mubr.msk.bf16.vlgmr.msra.gmra.mrb[56].mxu1 %vm312_vm2, %v4916_v9 }
0x2124   :  { %3813 = vmatprep.mubr.msk.bf16.mxu1 %vm4320_vm0, %v4319_v0 }
0x2129   :  { %3812 = vmatpush3.bf16.xpose.msra.mxu1 %v1919_v10 }
0x212a   :  { %3817 = vmatprep.subr.bf16.mxu1 %v4319_v0 }
0x2130   :  { %3814 = vmatmul.mubr.msk.bf16.vlgmr.msra.gmra.mrb[60].mxu1 %vm312_vm2, %v4916_v9 }
0x2131   :  { %3818 = vmatpush3.bf16.msra.mxu1 %v2058_v11  ;;  %3819 = vmatprep.mubr.msk.bf16.mxu1 %vm4320_vm0, %v4319_v0 }
0x2132   :  { %3823 = vmatprep.subr.bf16.mxu1 %v4319_v0 }
0x21ee   :  { %v1955_v8 = vpop.f32.mrb[52].mxu1 }
0x21ef   :  { %v1956_v24 = vadd.f32 %v1955_v8, %v4505_v60  ;;  %v3801_v37 = vpop.f32.mrb[53].mxu1 }
0x21f0   :  { %v1958_v38 = vpop.f32.mrb[54].mxu1 }
0x21f1   :  { %1962 = vst [vmem:[#allocation8 + $0x20] sm:$0xff] %v1956_v24  ;;  %v3802_v39 = vpop.f32.mrb[55].mxu1 }
0x2203   :  { %v2037_v40 = vpop.f32.mrb[60].mxu1 }
0x2204   :  { %v2038_v42 = vadd.f32 %v4945_v41, %v2037_v40  ;;  %v3815_v27 = vpop.f32.mrb[61].mxu1 }
0x2205   :  { %v2040_v46 = vpop.f32.mrb[62].mxu1 }
0x2206   :  { %v3816_v43 = vpop.f32.mrb[63].mxu1  ;;  %v2043_v29 = vsel %vm453_vm4, %v2038_v42, -inf }
0x2207   :  { %2044 = vmax.xlane.f32.xlu1 %v2043_v29 }
0x2294   :  { %v2045_v30 = vpop.xlane.xlu1 %2044 }
0x2295   :  { %v2046_v48 = vsub.f32 %v2038_v42, %v2045_v30 }
0x2297   :  { %v2047_v32 = vmul.f32 1.442695, %v2046_v48 }
0x2299   :  { %4164 = vpow2.f32 %v2047_v32 }
0x22a3   :  { %v4165_v44 = vpop.eup %4164 }
0x22a4   :  { %v2049_v50 = vsel %vm453_vm4, %v4165_v44, 0.0 }
0x22a5   :  { %2050 = vadd.xlane.f32.xlu0 %v2049_v50 }
0x2332   :  { %v2051_v51 = vpop.xlane.xlu0 %2050 }
0x2333   :  { %4166 = vrcp.f32 %v2051_v51 }
0x233d   :  { %v4167_v52 = vpop.eup %4166 }
0x233e   :  { %v2053_v47 = vmul.f32 %v4167_v52, %v4165_v44 }
0x2340   :  { %v2054_v58 = vpack.c.bf16 %v2053_v47, %v2053_v47 }
0x2342   :  { %3820 = vmatmul.mubr.msk.bf16.vlgmr.msra.gmra.mrb[64].mxu1 %vm453_vm4, %v2054_v58 }
0x2343   :  { %3824 = vmatpush3.bf16.msra.mxu1 %v4951_v49  ;;  %3827 = vmatprep.mubr.msk.bf16.mxu1 %vm4320_vm0, %v4319_v0 }
0x2344   :  { %3825 = vmatprep.subr.bf16.mxu1 %v4319_v0 }
0x2347   :  { %3826 = vmatpush3.bf16.msra.mxu1 %v4957_v19 }
0x2348   :  { %3831 = vmatprep.subr.bf16.mxu1 %v4319_v0 }
0x2415   :  { %v2094_v53 = vpop.f32.mrb[64].mxu1 }
0x2416   :  { %v2100_v21 = vpack.c.bf16 %v2094_v53, %v2094_v53  ;;  %v3821_v63 = vpop.f32.mrb[65].mxu1 }
0x2417   :  { %v2097_v4 = vpop.f32.mrb[66].mxu1 }
0x2418   :  { %v3822_v5 = vpop.f32.mrb[67].mxu1  ;;  %3828 = vmatmul.mubr.msk.bf16.vlgmr.msra.gmra.mrb[68].mxu1 %vm312_vm2, %v2100_v21 }
0x2419   :  { %3832 = vmatpush3.bf16.msra.mxu1 %v4839_v26  ;;  %3835 = vmatprep.mubr.msk.bf16.mxu1 %vm4320_vm0, %v4319_v0 }
0x241a   :  { %3833 = vmatprep.subr.bf16.mxu1 %v4319_v0 }
0x241d   :  { %3834 = vmatpush3.bf16.msra.mxu1 %v4845_v33 }
0x241e   :  { %3839 = vmatprep.subr.bf16.mxu1 %v4319_v0 }
0x2420   :  { %3836 = vmatmul.mubr.msk.bf16.vlgmr.msra.gmra.mrb[72].mxu1 %vm312_vm2, %v4916_v9 }
0x2421   :  { %3840 = vmatpush3.bf16.msra.mxu1 %v4970_v7  ;;  %3855 = vmatprep.mubr.msk.bf16.mxu1 %vm4320_vm0, %v4319_v0 }
0x2422   :  { %3841 = vmatprep.subr.bf16.mxu1 %v4319_v0 }
0x2425   :  { %3842 = vmatpush3.bf16.msra.mxu1 %v4976_v12 }
0x2426   :  { %3843 = vmatprep.subr.bf16.mxu1 %v4319_v0 }
0x2429   :  { %3844 = vmatpush3.bf16.msra.mxu1 %v4980_v61 }
0x242a   :  { %3845 = vmatprep.subr.bf16.mxu1 %v4319_v0 }
0x242d   :  { %3846 = vmatpush3.bf16.msra.mxu1 %v4984_v45 }
0x242e   :  { %3847 = vmatprep.subr.bf16.mxu1 %v4319_v0 }
0x2431   :  { %3848 = vmatpush3.bf16.msra.mxu1 %v4988_v20 }
0x2432   :  { %3849 = vmatprep.subr.bf16.mxu1 %v4319_v0 }
0x2435   :  { %3850 = vmatpush3.bf16.msra.mxu1 %v4992_v22 }
0x2436   :  { %3851 = vmatprep.subr.bf16.mxu1 %v4319_v0 }
0x2439   :  { %3852 = vmatpush3.bf16.msra.mxu1 %v4996_v1 }
0x243a   :  { %3853 = vmatprep.subr.bf16.mxu1 %v4319_v0 }
0x243d   :  { %3854 = vmatpush3.bf16.msra.mxu1 %v5000_v2 }
0x243e   :  { %3859 = vmatprep.subr.bf16.mxu1 %v4319_v0 }
0x24eb   :  { %v2138_v3 = vpop.f32.mrb[68].mxu1 }
0x24ec   :  { %v3829_v6 = vpop.f32.mrb[69].mxu1 }
0x24ed   :  { %v2141_v9 = vpop.f32.mrb[70].mxu1 }
0x24ee   :  { %v3830_v10 = vpop.f32.mrb[71].mxu1 }
0x24f3   :  { %v2178_v11 = vpop.f32.mrb[72].mxu1 }
0x24f4   :  { %v2179_v8 = vadd.f32 %v2178_v11, %v2138_v3  ;;  %v3837_v24 = vpop.f32.mrb[73].mxu1 }
0x24f5   :  { %v2181_v37 = vpop.f32.mrb[74].mxu1 }
0x24f6   :  { %v2184_v38 = vadd.f32 %v2179_v8, %v4579_v59  ;;  %v3838_v39 = vpop.f32.mrb[75].mxu1 }
0x24f8   :  { %v2185_v40 = vmax.f32 %v2184_v38, 0.0 }
0x24fa   :  { %v2186_v42 = vpack.c.bf16 %v2185_v40, %v2185_v40 }
0x24fc   :  { %3856 = vmatmul.mubr.bf16.vlgmr.msra.gmra.mrb[76].mxu1 %v2186_v42 }
0x24fd   :  { %3860 = vmatpush3.bf16.msra.mxu1 %v4763_v13  ;;  %3875 = vmatprep.mubr.msk.bf16.mxu1 %vm4320_vm0, %v4319_v0 }
0x24fe   :  { %3861 = vmatprep.subr.bf16.mxu1 %v4319_v0 }
0x2501   :  { %3862 = vmatpush3.bf16.msra.mxu1 %v4769_v14 }
0x2502   :  { %3863 = vmatprep.subr.bf16.mxu1 %v4319_v0 }
0x2505   :  { %3864 = vmatpush3.bf16.msra.mxu1 %v4773_v62 }
0x2506   :  { %3865 = vmatprep.subr.bf16.mxu1 %v4319_v0 }
0x2509   :  { %3866 = vmatpush3.bf16.msra.mxu1 %v4777_v17 }
0x250a   :  { %3867 = vmatprep.subr.bf16.mxu1 %v4319_v0 }
0x250d   :  { %3868 = vmatpush3.bf16.msra.mxu1 %v4781_v18 }
0x250e   :  { %3869 = vmatprep.subr.bf16.mxu1 %v4319_v0 }
0x2511   :  { %3870 = vmatpush3.bf16.msra.mxu1 %v4881_v55 }
0x2512   :  { %3871 = vmatprep.subr.bf16.mxu1 %v4319_v0 }
0x2515   :  { %3872 = vmatpush3.bf16.msra.mxu1 %v4885_v57 }
0x2516   :  { %3873 = vmatprep.subr.bf16.mxu1 %v4319_v0 }
0x2519   :  { %3874 = vmatpush3.bf16.msra.mxu1 %v4889_v31 }
0x251a   :  { %3963 = vmatprep.subr.bf16.mxu1 %v4319_v0 }
0x25cf   :  { %v2221_v27 = vpop.f32.mrb[76].mxu1 }
0x25d0   :  { %v2222_v46 = vadd.f32 %v2221_v27, %v4591_v16  ;;  %v3857_v43 = vpop.f32.mrb[77].mxu1 }
0x25d1   :  { %v2224_v29 = vpop.f32.mrb[78].mxu1 }
0x25d2   :  { %v2227_v30 = vmax.f32 %v2222_v46, 0.0  ;;  %v3858_v48 = vpop.f32.mrb[79].mxu1 }
0x25d4   :  { %v2228_v32 = vpack.c.bf16 %v2227_v30, %v2227_v30 }
0x25d6   :  { %3876 = vmatmul.mubr.bf16.vlgmr.msra.gmra.mrb[56].mxu1 %v2228_v32 }
0x25d7   :  { %3964 = vmatpush3.bf16.msra.mxu1 %v4894_v54  ;;  %3967 = vmatprep.mubr.msk.bf16.mxu1 %vm4320_vm0, %v4319_v0 }
0x25d8   :  { %3965 = vmatprep.subr.bf16.mxu1 %v4319_v0 }
0x25db   :  { %3966 = vmatpush3.bf16.msra.mxu1 %v4900_v56 }
0x25dc   :  { %3971 = vmatprep.subr.bf16.mxu1 %v4319_v0 }
0x26a9   :  { %v2263_v44 = vpop.f32.mrb[56].mxu1 }
0x26aa   :  { %v4061_v50 = vadd.f32 %v2263_v44, %v4602_v28  ;;  %v3877_v51 = vpop.f32.mrb[57].mxu1 }
0x26ab   :  { %v2266_v52 = vpop.f32.mrb[58].mxu1 }
0x26ac   :  { %v2270_v47 = vmul.f32 %v4061_v50, %v4442_v25  ;;  %v3878_v58 = vpop.f32.mrb[59].mxu1 }
0x26ae   :  { %4168 = vtanh.f32 %v2270_v47 }
0x26b8   :  { %v4169_v53 = vpop.eup %4168 }
0x26b9   :  { %v2272_v21 = vmul.f32 %v4169_v53, %v4448_v34 }
0x26bb   :  { %v2273_v63 = vadd.f32 %v2272_v21, %v4451_v35 }
0x26bd   :  { %2276 = vrot.lane.b32.xlu0 %v2273_v63, %s4317_s0  ;;  %v2274_v3 = vmul.f32 %v2273_v63, %v4911_v23 }
0x272f   :  { %v2277_v4 = vpop.permute.xlu0 %2276 }
0x2730   :  { %v2279_v5 = vmul.f32 %v2277_v4, %v2273_v63 }
0x2732   :  { %2281 = vrot.lane.b32.xlu1 %v2279_v5, %s4321_s2 }
0x27a4   :  { %v2282_v6 = vpop.permute.xlu1 %2281 }
0x27a5   :  { %v5037_v9 = vadd.f32 %v2282_v6, %v2274_v3 }
0x27a7   :  { %4170 = vtanh.f32 %v5037_v9 }
0x27b1   :  { %v4171_v10 = vpop.eup %4170 }
0x27b2   :  { %2287 = vrot.lane.b32.xlu1 %v4171_v10, %s4317_s0 }
0x2824   :  { %v2288_v11 = vpop.permute.xlu1 %2287 }
0x2825   :  { %v2290_v8 = vmul.f32 %v2288_v11, %v2273_v63 }
0x2827   :  { %v2291_v24 = vpack.c.bf16 %v2290_v8, %v2290_v8 }
0x2829   :  { %2293 = vrot.lane.b32.xlu0 %v2291_v24, %s4321_s2 }
0x289b   :  { %v2294_v37 = vpop.permute.xlu0 %2293 }
0x289c   :  { %3884 = vmatmul.mubr.msk.bf16.vlgmr.msra.gmra.mrb[68].mxu0 %vm312_vm2, %v2294_v37  ;;  %v2296_v23 = vsel %vm312_vm2, %v2294_v37, 0  ;;  %v2435_v38 = vsel %vm469_vm3, %v2294_v37, 0 }
0x289d   :  { %3888 = vmatpush3.bf16.msra.mxu0 %v4920_v15  ;;  %3891 = vmatprep.mubr.msk.bf16.mxu0 %vm4320_vm0, %v4319_v0 }
0x289e   :  { %3889 = vmatprep.subr.bf16.mxu0 %v4319_v0 }
0x28a1   :  { %3890 = vmatpush3.bf16.msra.mxu0 %v4926_v36 }
0x28a2   :  { %3895 = vmatprep.subr.bf16.mxu0 %v4319_v0 }
0x28a4   :  { %3892 = vmatmul.mubr.msk.bf16.vlgmr.msra.gmra.mrb[72].mxu0 %vm312_vm2, %v2294_v37 }
0x28a5   :  { %3897 = vmatprep.mubr.msk.bf16.mxu0 %vm4320_vm0, %v4319_v0 }
0x28aa   :  { %3896 = vmatpush3.bf16.xpose.msra.mxu0 %v2296_v23 }
0x28ab   :  { %3901 = vmatprep.subr.bf16.mxu0 %v4319_v0 }
0x28b1   :  { %3898 = vmatmul.mubr.msk.bf16.vlgmr.msra.gmra.mrb[76].mxu0 %vm312_vm2, %v2294_v37 }
0x28b2   :  { %3902 = vmatpush3.bf16.msra.mxu0 %v2435_v38  ;;  %3903 = vmatprep.mubr.msk.bf16.mxu0 %vm4320_vm0, %v4319_v0 }
0x28b3   :  { %3907 = vmatprep.subr.bf16.mxu0 %v4319_v0 }
0x296f   :  { %v2332_v39 = vpop.f32.mrb[68].mxu0 }
0x2970   :  { %v2333_v40 = vadd.f32 %v2332_v39, %v4505_v60  ;;  %v3885_v42 = vpop.f32.mrb[69].mxu0 }
0x2971   :  { %v2335_v27 = vpop.f32.mrb[70].mxu0 }
0x2972   :  { %2339 = vst [vmem:[#allocation8 + $0x28] sm:$0xff] %v2333_v40  ;;  %v3886_v46 = vpop.f32.mrb[71].mxu0 }
0x2984   :  { %v2414_v43 = vpop.f32.mrb[76].mxu0 }
0x2985   :  { %v2415_v29 = vadd.f32 %v4945_v41, %v2414_v43  ;;  %v3899_v30 = vpop.f32.mrb[77].mxu0 }
0x2986   :  { %v2417_v48 = vpop.f32.mrb[78].mxu0 }
0x2987   :  { %v3900_v32 = vpop.f32.mrb[79].mxu0  ;;  %v2420_v44 = vsel %vm453_vm4, %v2415_v29, -inf }
0x2988   :  { %2421 = vmax.xlane.f32.xlu1 %v2420_v44 }
0x2a15   :  { %v2422_v50 = vpop.xlane.xlu1 %2421 }
0x2a16   :  { %v2423_v51 = vsub.f32 %v2415_v29, %v2422_v50 }
0x2a18   :  { %v2424_v52 = vmul.f32 1.442695, %v2423_v51 }
0x2a1a   :  { %4172 = vpow2.f32 %v2424_v52 }
0x2a24   :  { %v4173_v47 = vpop.eup %4172 }
0x2a25   :  { %v2426_v58 = vsel %vm453_vm4, %v4173_v47, 0.0 }
0x2a26   :  { %2427 = vadd.xlane.f32.xlu0 %v2426_v58 }
0x2ab3   :  { %v2428_v53 = vpop.xlane.xlu0 %2427 }
0x2ab4   :  { %4174 = vrcp.f32 %v2428_v53 }
0x2abe   :  { %v4175_v21 = vpop.eup %4174 }
0x2abf   :  { %v2430_v63 = vmul.f32 %v4175_v21, %v4173_v47 }
0x2ac1   :  { %v2431_v4 = vpack.c.bf16 %v2430_v63, %v2430_v63 }
0x2ac3   :  { %3904 = vmatmul.mubr.msk.bf16.vlgmr.msra.gmra.mrb[80].mxu0 %vm453_vm4, %v2431_v4 }
0x2ac4   :  { %3908 = vmatpush3.bf16.msra.mxu0 %v4951_v49  ;;  %3911 = vmatprep.mubr.msk.bf16.mxu0 %vm4320_vm0, %v4319_v0 }
0x2ac5   :  { %3909 = vmatprep.subr.bf16.mxu0 %v4319_v0 }
0x2ac8   :  { %3910 = vmatpush3.bf16.msra.mxu0 %v4957_v19 }
0x2ac9   :  { %3915 = vmatprep.subr.bf16.mxu0 %v4319_v0 }
0x2b96   :  { %v2471_v5 = vpop.f32.mrb[80].mxu0 }
0x2b97   :  { %v2477_v3 = vpack.c.bf16 %v2471_v5, %v2471_v5  ;;  %v3905_v6 = vpop.f32.mrb[81].mxu0 }
0x2b98   :  { %v2474_v10 = vpop.f32.mrb[82].mxu0 }
0x2b99   :  { %v3906_v11 = vpop.f32.mrb[83].mxu0  ;;  %3912 = vmatmul.mubr.msk.bf16.vlgmr.msra.gmra.mrb[84].mxu0 %vm312_vm2, %v2477_v3 }
0x2b9a   :  { %3916 = vmatpush3.bf16.msra.mxu0 %v4839_v26  ;;  %3919 = vmatprep.mubr.msk.bf16.mxu0 %vm4320_vm0, %v4319_v0 }
0x2b9b   :  { %3917 = vmatprep.subr.bf16.mxu0 %v4319_v0 }
0x2b9e   :  { %3918 = vmatpush3.bf16.msra.mxu0 %v4845_v33 }
0x2b9f   :  { %3923 = vmatprep.subr.bf16.mxu0 %v4319_v0 }
0x2ba1   :  { %3920 = vmatmul.mubr.msk.bf16.vlgmr.msra.gmra.mrb[88].mxu0 %vm312_vm2, %v2294_v37 }
0x2ba2   :  { %3924 = vmatpush3.bf16.msra.mxu0 %v4970_v7  ;;  %3939 = vmatprep.mubr.msk.bf16.mxu0 %vm4320_vm0, %v4319_v0 }
0x2ba3   :  { %3925 = vmatprep.subr.bf16.mxu0 %v4319_v0 }
0x2ba6   :  { %3926 = vmatpush3.bf16.msra.mxu0 %v4976_v12 }
0x2ba7   :  { %3927 = vmatprep.subr.bf16.mxu0 %v4319_v0 }
0x2baa   :  { %3928 = vmatpush3.bf16.msra.mxu0 %v4980_v61 }
0x2bab   :  { %3929 = vmatprep.subr.bf16.mxu0 %v4319_v0 }
0x2bae   :  { %3930 = vmatpush3.bf16.msra.mxu0 %v4984_v45 }
0x2baf   :  { %3931 = vmatprep.subr.bf16.mxu0 %v4319_v0 }
0x2bb2   :  { %3932 = vmatpush3.bf16.msra.mxu0 %v4988_v20 }
0x2bb3   :  { %3933 = vmatprep.subr.bf16.mxu0 %v4319_v0 }
0x2bb6   :  { %3934 = vmatpush3.bf16.msra.mxu0 %v4992_v22 }
0x2bb7   :  { %3935 = vmatprep.subr.bf16.mxu0 %v4319_v0 }
0x2bba   :  { %3936 = vmatpush3.bf16.msra.mxu0 %v4996_v1 }
0x2bbb   :  { %3937 = vmatprep.subr.bf16.mxu0 %v4319_v0 }
0x2bbe   :  { %3938 = vmatpush3.bf16.msra.mxu0 %v5000_v2 }
0x2bbf   :  { %3943 = vmatprep.subr.bf16.mxu0 %v4319_v0 }
0x2c6c   :  { %v2515_v8 = vpop.f32.mrb[84].mxu0 }
0x2c6d   :  { %v3913_v24 = vpop.f32.mrb[85].mxu0 }
0x2c6e   :  { %v2518_v37 = vpop.f32.mrb[86].mxu0 }
0x2c6f   :  { %v3914_v23 = vpop.f32.mrb[87].mxu0 }
0x2c74   :  { %v2555_v38 = vpop.f32.mrb[88].mxu0 }
0x2c75   :  { %v2556_v39 = vadd.f32 %v2555_v38, %v2515_v8  ;;  %v3921_v40 = vpop.f32.mrb[89].mxu0 }
0x2c76   :  { %v2558_v42 = vpop.f32.mrb[90].mxu0 }
0x2c77   :  { %v2561_v27 = vadd.f32 %v2556_v39, %v4579_v59  ;;  %v3922_v46 = vpop.f32.mrb[91].mxu0 }
0x2c79   :  { %v2562_v43 = vmax.f32 %v2561_v27, 0.0 }
0x2c7b   :  { %v2563_v29 = vpack.c.bf16 %v2562_v43, %v2562_v43 }
0x2c7d   :  { %3940 = vmatmul.mubr.bf16.vlgmr.msra.gmra.mrb[92].mxu0 %v2563_v29 }
0x2c7e   :  { %3944 = vmatpush3.bf16.msra.mxu0 %v4763_v13  ;;  %3959 = vmatprep.mubr.msk.bf16.mxu0 %vm4320_vm0, %v4319_v0 }
0x2c7f   :  { %3945 = vmatprep.subr.bf16.mxu0 %v4319_v0 }
0x2c82   :  { %3946 = vmatpush3.bf16.msra.mxu0 %v4769_v14 }
0x2c83   :  { %3947 = vmatprep.subr.bf16.mxu0 %v4319_v0 }
0x2c86   :  { %3948 = vmatpush3.bf16.msra.mxu0 %v4773_v62 }
0x2c87   :  { %3949 = vmatprep.subr.bf16.mxu0 %v4319_v0 }
0x2c8a   :  { %3950 = vmatpush3.bf16.msra.mxu0 %v4777_v17 }
0x2c8b   :  { %3951 = vmatprep.subr.bf16.mxu0 %v4319_v0 }
0x2c8e   :  { %3952 = vmatpush3.bf16.msra.mxu0 %v4781_v18 }
0x2c8f   :  { %3953 = vmatprep.subr.bf16.mxu0 %v4319_v0 }
0x2c92   :  { %3954 = vmatpush3.bf16.msra.mxu0 %v4881_v55 }
0x2c93   :  { %3955 = vmatprep.subr.bf16.mxu0 %v4319_v0 }
0x2c96   :  { %3956 = vmatpush3.bf16.msra.mxu0 %v4885_v57 }
0x2c97   :  { %3957 = vmatprep.subr.bf16.mxu0 %v4319_v0 }
0x2c9a   :  { %3958 = vmatpush3.bf16.msra.mxu0 %v4889_v31 }
0x2c9b   :  { %4047 = vmatprep.subr.bf16.mxu0 %v4319_v0 }
0x2d50   :  { %v2598_v13 = vpop.f32.mrb[92].mxu0 }
0x2d51   :  { %v2599_v14 = vadd.f32 %v2598_v13, %v4591_v16  ;;  %v3941_v62 = vpop.f32.mrb[93].mxu0 }
0x2d52   :  { %v2601_v17 = vpop.f32.mrb[94].mxu0 }
0x2d53   :  { %v2604_v18 = vmax.f32 %v2599_v14, 0.0  ;;  %v3942_v30 = vpop.f32.mrb[95].mxu0 }
0x2d55   :  { %v2605_v48 = vpack.c.bf16 %v2604_v18, %v2604_v18 }
0x2d57   :  { %3960 = vmatmul.mubr.bf16.vlgmr.msra.gmra.mrb[72].mxu0 %v2605_v48 }
0x2d58   :  { %4048 = vmatpush3.bf16.msra.mxu0 %v4894_v54  ;;  %4051 = vmatprep.mubr.msk.bf16.mxu0 %vm4320_vm0, %v4319_v0 }
0x2d59   :  { %4049 = vmatprep.subr.bf16.mxu0 %v4319_v0 }
0x2d5c   :  { %4050 = vmatpush3.bf16.msra.mxu0 %v4900_v56 }
0x2e2a   :  { %v2640_v32 = vpop.f32.mrb[72].mxu0 }
0x2e2b   :  { %v4062_v44 = vadd.f32 %v2640_v32, %v4602_v28  ;;  %v3961_v50 = vpop.f32.mrb[73].mxu0 }
0x2e2c   :  { %v2643_v51 = vpop.f32.mrb[74].mxu0 }
0x2e2d   :  { %v2647_v52 = vmul.f32 %v4062_v44, %v4442_v25  ;;  %v3962_v47 = vpop.f32.mrb[75].mxu0 }
0x2e2f   :  { %4176 = vtanh.f32 %v2647_v52 }
0x2e39   :  { %v4177_v58 = vpop.eup %4176 }
0x2e3a   :  { %v2649_v53 = vmul.f32 %v4177_v58, %v4448_v34 }
0x2e3c   :  { %v2650_v54 = vadd.f32 %v2649_v53, %v4451_v35  ;;  %v4215_v53 = vld [vmem:[#allocation7 + $0x10] sm:$0xff]  }
0x2e3e   :  { %2653 = vrot.lane.b32.xlu0 %v2650_v54, %s4317_s0  ;;  %v2651_v56 = vmul.f32 %v2650_v54, %v5037_v9 }
0x2eb0   :  { %v2654_v21 = vpop.permute.xlu0 %2653 }
0x2eb1   :  { %v2656_v63 = vmul.f32 %v2654_v21, %v2650_v54 }
0x2eb3   :  { %2658 = vrot.lane.b32.xlu1 %v2656_v63, %s4321_s2 }
0x2f25   :  { %v2659_v4 = vpop.permute.xlu1 %2658 }
0x2f26   :  { %v5128_v5 = vadd.f32 %v2659_v4, %v2651_v56 }
0x2f28   :  { %4178 = vtanh.f32 %v5128_v5 }
0x2f32   :  { %v4179_v3 = vpop.eup %4178 }
0x2f33   :  { %2664 = vrot.lane.b32.xlu1 %v4179_v3, %s4317_s0 }
0x2fa5   :  { %v2665_v6 = vpop.permute.xlu1 %2664 }
0x2fa6   :  { %v2667_v10 = vmul.f32 %v2665_v6, %v2650_v54  ;;  %v4217_v54 = vld [vmem:[#allocation7 + $0x20] sm:$0xff]  }
0x2fa8   :  { %v2668_v11 = vpack.c.bf16 %v2667_v10, %v2667_v10 }
0x2faa   :  { %2670 = vrot.lane.b32.xlu0 %v2668_v11, %s4321_s2 }
0x301c   :  { %v2671_v8 = vpop.permute.xlu0 %2670 }
0x301d   :  { %3968 = vmatmul.mubr.msk.bf16.vlgmr.msra.gmra.mrb[80].mxu1 %vm312_vm2, %v2671_v8  ;;  %v2673_v9 = vsel %vm312_vm2, %v2671_v8, 0 }
0x301e   :  { %3972 = vmatpush3.bf16.msra.mxu1 %v4920_v15  ;;  %3975 = vmatprep.mubr.msk.bf16.mxu1 %vm4320_vm0, %v4319_v0  ;;  %v2812_v15 = vsel %vm469_vm3, %v2671_v8, 0 }
0x301f   :  { %3973 = vmatprep.subr.bf16.mxu1 %v4319_v0 }
0x3022   :  { %3974 = vmatpush3.bf16.msra.mxu1 %v4926_v36 }
0x3023   :  { %3979 = vmatprep.subr.bf16.mxu1 %v4319_v0 }
0x3025   :  { %3976 = vmatmul.mubr.msk.bf16.vlgmr.msra.gmra.mrb[84].mxu1 %vm312_vm2, %v2671_v8 }
0x3026   :  { %3981 = vmatprep.mubr.msk.bf16.mxu1 %vm4320_vm0, %v4319_v0 }
0x302b   :  { %3980 = vmatpush3.bf16.xpose.msra.mxu1 %v2673_v9 }
0x302c   :  { %3985 = vmatprep.subr.bf16.mxu1 %v4319_v0 }
0x3032   :  { %3982 = vmatmul.mubr.msk.bf16.vlgmr.msra.gmra.mrb[88].mxu1 %vm312_vm2, %v2671_v8 }
0x3033   :  { %3986 = vmatpush3.bf16.msra.mxu1 %v2812_v15  ;;  %3987 = vmatprep.mubr.msk.bf16.mxu1 %vm4320_vm0, %v4319_v0 }
0x3034   :  { %3991 = vmatprep.subr.bf16.mxu1 %v4319_v0 }
0x30f0   :  { %v2709_v36 = vpop.f32.mrb[80].mxu1 }
0x30f1   :  { %v2710_v24 = vadd.f32 %v2709_v36, %v4505_v60  ;;  %v3969_v37 = vpop.f32.mrb[81].mxu1 }
0x30f2   :  { %v2712_v23 = vpop.f32.mrb[82].mxu1 }
0x30f3   :  { %2716 = vst [vmem:[#allocation8 + $0x30] sm:$0xff] %v2710_v24  ;;  %v3970_v38 = vpop.f32.mrb[83].mxu1 }
0x3105   :  { %v2791_v39 = vpop.f32.mrb[88].mxu1 }
0x3106   :  { %v2792_v40 = vadd.f32 %v4945_v41, %v2791_v39  ;;  %v3983_v42 = vpop.f32.mrb[89].mxu1 }
0x3107   :  { %v2794_v27 = vpop.f32.mrb[90].mxu1 }
0x3108   :  { %v3984_v46 = vpop.f32.mrb[91].mxu1  ;;  %v2797_v43 = vsel %vm453_vm4, %v2792_v40, -inf }
0x3109   :  { %2798 = vmax.xlane.f32.xlu1 %v2797_v43 }
0x3196   :  { %v2799_v29 = vpop.xlane.xlu1 %2798 }
0x3197   :  { %v2800_v13 = vsub.f32 %v2792_v40, %v2799_v29 }
0x3199   :  { %v2801_v14 = vmul.f32 1.442695, %v2800_v13 }
0x319b   :  { %4180 = vpow2.f32 %v2801_v14 }
0x31a5   :  { %v4181_v62 = vpop.eup %4180 }
0x31a6   :  { %v2803_v17 = vsel %vm453_vm4, %v4181_v62, 0.0 }
0x31a7   :  { %2804 = vadd.xlane.f32.xlu0 %v2803_v17 }
0x3234   :  { %v2805_v18 = vpop.xlane.xlu0 %2804 }
0x3235   :  { %4182 = vrcp.f32 %v2805_v18 }
0x323f   :  { %v4183_v30 = vpop.eup %4182 }
0x3240   :  { %v2807_v48 = vmul.f32 %v4183_v30, %v4181_v62 }
0x3242   :  { %v2808_v32 = vpack.c.bf16 %v2807_v48, %v2807_v48 }
0x3244   :  { %3988 = vmatmul.mubr.msk.bf16.vlgmr.msra.gmra.mrb[92].mxu1 %vm453_vm4, %v2808_v32 }
0x3245   :  { %3992 = vmatpush3.bf16.msra.mxu1 %v4951_v49  ;;  %3995 = vmatprep.mubr.msk.bf16.mxu1 %vm4320_vm0, %v4319_v0 }
0x3246   :  { %3993 = vmatprep.subr.bf16.mxu1 %v4319_v0 }
0x3249   :  { %3994 = vmatpush3.bf16.msra.mxu1 %v4957_v19 }
0x324a   :  { %3999 = vmatprep.subr.bf16.mxu1 %v4319_v0 }
0x3317   :  { %v2848_v41 = vpop.f32.mrb[92].mxu1 }
0x3318   :  { %v2854_v44 = vpack.c.bf16 %v2848_v41, %v2848_v41  ;;  %v3989_v50 = vpop.f32.mrb[93].mxu1 }
0x3319   :  { %v2851_v51 = vpop.f32.mrb[94].mxu1 }
0x331a   :  { %v3990_v52 = vpop.f32.mrb[95].mxu1  ;;  %3996 = vmatmul.mubr.msk.bf16.vlgmr.msra.gmra.mrb[96].mxu1 %vm312_vm2, %v2854_v44 }
0x331b   :  { %4000 = vmatpush3.bf16.msra.mxu1 %v4839_v26  ;;  %4003 = vmatprep.mubr.msk.bf16.mxu1 %vm4320_vm0, %v4319_v0 }
0x331c   :  { %4001 = vmatprep.subr.bf16.mxu1 %v4319_v0 }
0x331f   :  { %4002 = vmatpush3.bf16.msra.mxu1 %v4845_v33 }
0x3320   :  { %4007 = vmatprep.subr.bf16.mxu1 %v4319_v0 }
0x3322   :  { %4004 = vmatmul.mubr.msk.bf16.vlgmr.msra.gmra.mrb[100].mxu1 %vm312_vm2, %v2671_v8 }
0x3323   :  { %4008 = vmatpush3.bf16.msra.mxu1 %v4970_v7  ;;  %4023 = vmatprep.mubr.msk.bf16.mxu1 %vm4320_vm0, %v4319_v0 }
0x3324   :  { %4009 = vmatprep.subr.bf16.mxu1 %v4319_v0 }
0x3327   :  { %4010 = vmatpush3.bf16.msra.mxu1 %v4976_v12 }
0x3328   :  { %4011 = vmatprep.subr.bf16.mxu1 %v4319_v0 }
0x332b   :  { %4012 = vmatpush3.bf16.msra.mxu1 %v4980_v61 }
0x332c   :  { %4013 = vmatprep.subr.bf16.mxu1 %v4319_v0 }
0x332f   :  { %4014 = vmatpush3.bf16.msra.mxu1 %v4984_v45 }
0x3330   :  { %4015 = vmatprep.subr.bf16.mxu1 %v4319_v0 }
0x3333   :  { %4016 = vmatpush3.bf16.msra.mxu1 %v4988_v20 }
0x3334   :  { %4017 = vmatprep.subr.bf16.mxu1 %v4319_v0 }
0x3337   :  { %4018 = vmatpush3.bf16.msra.mxu1 %v4992_v22 }
0x3338   :  { %4019 = vmatprep.subr.bf16.mxu1 %v4319_v0 }
0x333b   :  { %4020 = vmatpush3.bf16.msra.mxu1 %v4996_v1  ;;  %v4213_v1 = vld [vmem:[#allocation7] sm:$0xff]  }
0x333c   :  { %4021 = vmatprep.subr.bf16.mxu1 %v4319_v0 }
0x333f   :  { %4022 = vmatpush3.bf16.msra.mxu1 %v5000_v2  ;;  %v4214_v2 = vld [vmem:[#allocation7 + $0x8] sm:$0xff]  }
0x3340   :  { %4027 = vmatprep.subr.bf16.mxu1 %v4319_v0 }
0x33ed   :  { %v2892_v26 = vpop.f32.mrb[96].mxu1 }
0x33ee   :  { %v3997_v33 = vpop.f32.mrb[97].mxu1 }
0x33ef   :  { %v2895_v49 = vpop.f32.mrb[98].mxu1 }
0x33f0   :  { %v3998_v19 = vpop.f32.mrb[99].mxu1 }
0x33f5   :  { %v2932_v7 = vpop.f32.mrb[100].mxu1 }
0x33f6   :  { %v2933_v12 = vadd.f32 %v2932_v7, %v2892_v26  ;;  %v4005_v61 = vpop.f32.mrb[101].mxu1 }
0x33f7   :  { %v2935_v45 = vpop.f32.mrb[102].mxu1 }
0x33f8   :  { %v2938_v20 = vadd.f32 %v2933_v12, %v4579_v59  ;;  %v4006_v22 = vpop.f32.mrb[103].mxu1  ;;  %v4216_v59 = vld [vmem:[#allocation7 + $0x18] sm:$0xff]  }
0x33fa   :  { %v2939_v47 = vmax.f32 %v2938_v20, 0.0 }
0x33fc   :  { %v2940_v58 = vpack.c.bf16 %v2939_v47, %v2939_v47 }
0x33fe   :  { %4024 = vmatmul.mubr.bf16.vlgmr.msra.gmra.mrb[104].mxu1 %v2940_v58 }
0x33ff   :  { %4028 = vmatpush3.bf16.msra.mxu1 %v4213_v1  ;;  %4043 = vmatprep.mubr.msk.bf16.mxu1 %vm4320_vm0, %v4319_v0 }
0x3400   :  { %4029 = vmatprep.subr.bf16.mxu1 %v4319_v0 }
0x3403   :  { %4030 = vmatpush3.bf16.msra.mxu1 %v4214_v2 }
0x3404   :  { %4031 = vmatprep.subr.bf16.mxu1 %v4319_v0 }
0x3407   :  { %4032 = vmatpush3.bf16.msra.mxu1 %v4215_v53 }
0x3408   :  { %4033 = vmatprep.subr.bf16.mxu1 %v4319_v0 }
0x340b   :  { %4034 = vmatpush3.bf16.msra.mxu1 %v4216_v59 }
0x340c   :  { %4035 = vmatprep.subr.bf16.mxu1 %v4319_v0 }
0x340f   :  { %4036 = vmatpush3.bf16.msra.mxu1 %v4217_v54 }
0x3410   :  { %4037 = vmatprep.subr.bf16.mxu1 %v4319_v0 }
0x3413   :  { %4038 = vmatpush3.bf16.msra.mxu1 %v4881_v55 }
0x3414   :  { %4039 = vmatprep.subr.bf16.mxu1 %v4319_v0 }
0x3417   :  { %4040 = vmatpush3.bf16.msra.mxu1 %v4885_v57 }
0x3418   :  { %4041 = vmatprep.subr.bf16.mxu1 %v4319_v0 }
0x341b   :  { %4042 = vmatpush3.bf16.msra.mxu1 %v4889_v31 }
0x34d1   :  { %v2975_v21 = vpop.f32.mrb[104].mxu1 }
0x34d2   :  { %v2976_v63 = vadd.f32 %v2975_v21, %v4591_v16  ;;  %v4025_v56 = vpop.f32.mrb[105].mxu1 }
0x34d3   :  { %v2978_v4 = vpop.f32.mrb[106].mxu1 }
0x34d4   :  { %v2981_v3 = vmax.f32 %v2976_v63, 0.0  ;;  %v4026_v6 = vpop.f32.mrb[107].mxu1 }
0x34d6   :  { %v2982_v10 = vpack.c.bf16 %v2981_v3, %v2981_v3 }
0x34d8   :  { %4044 = vmatmul.mubr.bf16.vlgmr.msra.gmra.mrb[84].mxu1 %v2982_v10 }
0x35ab   :  { %v3017_v11 = vpop.f32.mrb[84].mxu1 }
0x35ac   :  { %v4063_v55 = vadd.f32 %v3017_v11, %v4602_v28  ;;  %v4045_v8 = vpop.f32.mrb[85].mxu1 }
0x35ad   :  { %v3020_v9 = vpop.f32.mrb[86].mxu1 }
0x35ae   :  { %v3024_v57 = vmul.f32 %v4063_v55, %v4442_v25  ;;  %v4046_v15 = vpop.f32.mrb[87].mxu1 }
0x35b0   :  { %4184 = vtanh.f32 %v3024_v57 }
0x35ba   :  { %v4185_v0 = vpop.eup %4184 }
0x35bb   :  { %v3026_v31 = vmul.f32 %v4185_v0, %v4448_v34 }
0x35bd   :  { %v3027_v16 = vadd.f32 %v3026_v31, %v4451_v35 }
0x35bf   :  { %3030 = vrot.lane.b32.xlu0 %v3027_v16, %s4317_s0  ;;  %v3028_v37 = vmul.f32 %v3027_v16, %v5128_v5 }
0x3631   :  { %v3031_v36 = vpop.permute.xlu0 %3030 }
0x3632   :  { %v3033_v24 = vmul.f32 %v3031_v36, %v3027_v16 }
0x3634   :  { %3035 = vrot.lane.b32.xlu1 %v3033_v24, %s4321_s2 }
0x36a6   :  { %v3036_v28 = vpop.permute.xlu1 %3035 }
0x36a7   :  { %v3038_v23 = vadd.f32 %v3036_v28, %v3028_v37 }
0x36a9   :  { %4186 = vtanh.f32 %v3038_v23 }
0x36b3   :  { %v4187_v38 = vpop.eup %4186 }
0x36b4   :  { %3041 = vrot.lane.b32.xlu1 %v4187_v38, %s4317_s0 }
0x3726   :  { %v3042_v25 = vpop.permute.xlu1 %3041 }
0x3727   :  { %v3044_v39 = vmul.f32 %v3042_v25, %v3027_v16 }
0x3729   :  { %v3045_v40 = vpack.c.bf16 %v3044_v39, %v3044_v39 }
0x372b   :  { %3047 = vrot.lane.b32.xlu0 %v3045_v40, %s4321_s2 }
0x379d   :  { %v3048_v34 = vpop.permute.xlu0 %3047 }
0x379e   :  { %4052 = vmatmul.mubr.msk.bf16.vlgmr.msra.gmra.mrb[96].mxu0 %vm312_vm2, %v3048_v34 }
0x3871   :  { %v3086_v35 = vpop.f32.mrb[96].mxu0 }
0x3872   :  { %v3087_v42 = vadd.f32 %v3086_v35, %v4505_v60  ;;  %v4053_v5 = vpop.f32.mrb[97].mxu0 }
0x3873   :  { %v3089_v27 = vpop.f32.mrb[98].mxu0 }
0x3874   :  { %3093 = vst [vmem:[#allocation8 + $0x38] sm:$0xff] %v3087_v42  ;;  %v4054_v46 = vpop.f32.mrb[99].mxu0 }
0x3875   :  { %4295 = shalt.err (!%p4292_p0)
}
0x3876   :  { %s4296_s28 = scalar_lea.hbm %s5230_s3, 1024 }
0x3877   :  { %p4297_p1 = scmp.ne.s32.totalorder %s5230_s3, %s4296_s28  ;;  %p4300_p2 = scmp.lt.u32.totalorder %s4296_s28, %s5230_s3 }
0x3879   :  { %p4302_p3 = pnand %p4300_p2, %p4297_p1 }
0x387b   :  { %4305 = shalt.err (!%p4302_p3)
}
0x387c   :  { %3105 = dma.vmem_to_hbm [thread:$0]  %s3100_s24, 1024, %s5230_s3, [#allocation4], %s4314_s1, %s4314_s1, %s4315_s7  }
0x387d   :  { %4310 = dma.done.wait [#allocation4], 1024  }
0x387e   :  { %4311 = vsyncadd [#allocation4], 4294966272 }
0x387f   :  { %3109 = vsyncpa [#allocation3], 1 }
0x3880   :  { %3110 = vsyncpa [#allocation6], 1 }
0x3881   :  { %3111 = vsyncpa [#allocation4], 1 }

</bundles_post_ra>
